<compile_context>
chip_gen: v6e
topology: v6e:2x2x1
jax: 0.10.0
libtpu: 0.0.40
codegen_flags: <defaults>
</compile_context>

<pallas_src>
import math
import functools

import jax
import jax.numpy as jnp
from jax.experimental import pallas as pl
from jax.experimental.pallas import tpu as pltpu

LN_EPS = 1e-5
BN_EPS = 1e-5


def _erf_as(x):
    # Abramowitz-Stegun 7.1.26 polynomial approximation of erf (|err| < 1.5e-7).
    a1, a2, a3, a4, a5 = 0.254829592, -0.284496736, 1.421413741, -1.453152027, 1.061405429
    p = 0.3275911
    ax = jnp.abs(x)
    t = 1.0 / (1.0 + p * ax)
    y = 1.0 - ((((a5 * t + a4) * t + a3) * t + a2) * t + a1) * t * jnp.exp(-ax * ax)
    return jnp.where(x < 0.0, -y, y)


def _gelu_exact(x):
    # x * Phi(x) with exact-erf semantics (matches PyTorch F.gelu default).
    return 0.5 * x * (1.0 + _erf_as(x * 0.7071067811865476))


# --------------------------------------------------------------------------
# Fused kernel: one grid step == one decoder layer (weights streamed per layer).
# Step 0 additionally applies norm0; the last step runs the BN + classifier epilogue.
# --------------------------------------------------------------------------
def _detr_decoder_kernel(nheads, num_patch, mem_len,
                         tgt_ref, mem_ref, qpos_ref, kpos_ref,
                         n0g_ref, n0b_ref,
                         wq_ref, bq_ref, wk_ref, bk_ref, wv_ref, bv_ref,
                         wo_ref, bo_ref,
                         g1_ref, b1_ref,
                         wff1_ref, bff1_ref, wff2_ref, bff2_ref,
                         g3_ref, b3_ref,
                         bn_rm_ref, bn_rv_ref, bn_g_ref, bn_b_ref, clsw_ref,
                         otgt_ref, ocls_ref):
    NP = num_patch
    S = mem_len
    D = tgt_ref.shape[1]
    bs = tgt_ref.shape[0] // NP          # static Python int
    H = nheads
    hd = D // H
    scale = 1.0 / math.sqrt(hd)
    l = pl.program_id(0)

    def ln(x, g, b):
        mu = jnp.mean(x, axis=-1, keepdims=True)
        var = jnp.mean((x - mu) ** 2, axis=-1, keepdims=True)
        return (x - mu) * jax.lax.rsqrt(var + LN_EPS) * g + b

    # ---- step 0: norm0 into the carried tgt block ------------------------------
    @pl.when(l == 0)
    def _():
        otgt_ref[...] = ln(tgt_ref[...], n0g_ref[...], n0b_ref[...])

    t = otgt_ref[...]                                              # (bs*NP, D) f32

    # ---- cross-attention: q = t + qpos, k = mem + kpos, v = mem ----------------
    # (bf16 matmul operands, f32 accumulation; LN/softmax/residuals stay f32)
    q_in = (t + qpos_ref[...]).astype(jnp.bfloat16)                # (bs*NP, D)
    k_in = (mem_ref[...] + kpos_ref[...]).astype(jnp.bfloat16)     # (bs*S,  D)
    v_in = mem_ref[...].astype(jnp.bfloat16)

    q = jnp.dot(q_in, wq_ref[0], preferred_element_type=jnp.float32) + bq_ref[0]
    k = jnp.dot(k_in, wk_ref[0], preferred_element_type=jnp.float32) + bk_ref[0]
    v = jnp.dot(v_in, wv_ref[0], preferred_element_type=jnp.float32) + bv_ref[0]

    wo = wo_ref[0]                                                 # (D, D) bf16

    attn_blocks = []
    for b in range(bs):              # static loop: attention is per batch element
        qb = q[b * NP:(b + 1) * NP, :].astype(jnp.bfloat16)        # (NP, D)
        kb = k[b * S:(b + 1) * S, :].astype(jnp.bfloat16)          # (S,  D)
        vb = v[b * S:(b + 1) * S, :].astype(jnp.bfloat16)          # (S,  D)
        ob = jnp.zeros((NP, D), jnp.float32)
        for h in range(H):           # static loop: 2-D slices feed dots directly
            qh = qb[:, h * hd:(h + 1) * hd]                        # (NP, hd)
            kh = kb[:, h * hd:(h + 1) * hd]                        # (S,  hd)
            vh = vb[:, h * hd:(h + 1) * hd]                        # (S,  hd)
            # scores: contraction on last dim of both operands (NT matmul form)
            s = jax.lax.dot_general(
                qh, kh, (((1,), (1,)), ((), ())),
                preferred_element_type=jnp.float32) * scale        # (NP, S)
            s = s - jnp.max(s, axis=-1, keepdims=True)
            p = jnp.exp(s)
            p = p * pl.reciprocal(jnp.sum(p, axis=-1, keepdims=True), approx=True)
            ctx = jnp.dot(p.astype(jnp.bfloat16), vh,
                          preferred_element_type=jnp.float32)      # (NP, hd)
            # output projection folded per head: += ctx_h @ Wo[h*hd:(h+1)*hd, :]
            ob = ob + jnp.dot(ctx.astype(jnp.bfloat16), wo[h * hd:(h + 1) * hd, :],
                              preferred_element_type=jnp.float32)  # (NP, D)
        attn_blocks.append(ob)
    attn = jnp.concatenate(attn_blocks, axis=0) + bo_ref[0]        # (bs*NP, D)

    # residual + LayerNorm1 (dropout1 = identity, eval mode)
    x = ln(t + attn, g1_ref[0], b1_ref[0])

    # feed-forward (batch folded into M): linear1 -> exact-erf GELU -> linear2
    h1 = jnp.dot(x.astype(jnp.bfloat16), wff1_ref[0],
                 preferred_element_type=jnp.float32) + bff1_ref[0]
    h1 = _gelu_exact(h1)
    h2 = jnp.dot(h1.astype(jnp.bfloat16), wff2_ref[0],
                 preferred_element_type=jnp.float32) + bff2_ref[0]

    # residual + LayerNorm3 (dropout3 = identity)
    new_t = ln(x + h2, g3_ref[0], b3_ref[0])
    otgt_ref[...] = new_t

    # ---- last step: fused BatchNorm(eval) + classifier epilogue ----------------
    @pl.when(l == pl.num_programs(0) - 1)
    def _():
        xn = (new_t - bn_rm_ref[...]) * jax.lax.rsqrt(bn_rv_ref[...] + BN_EPS) \
            * bn_g_ref[...] + bn_b_ref[...]
        # lane-dense (padded to 128) classifier output -> unmasked stores
        ocls_ref[...] = jnp.dot(xn.astype(jnp.bfloat16), clsw_ref[...],
                                preferred_element_type=jnp.float32)


def detr_decoder_forward(params, tgt, memory, query_pos, key_pos, nheads):
    bs, NP, D = tgt.shape
    S = memory.shape[1]
    L = params["wq"].shape[0]
    FF = params["w_ff1"].shape[2]
    C = params["cls_w"].shape[1]
    C_pad = ((C + 127) // 128) * 128
    f32 = jnp.float32
    bf16 = jnp.bfloat16

    # Batch folded into the matmul M dimension: everything 2-D inside the kernel.
    tgt2 = tgt.reshape(bs * NP, D).astype(f32)
    mem2 = memory.reshape(bs * S, D).astype(f32)
    qpos2 = query_pos.reshape(bs * NP, D).astype(f32)
    kpos2 = key_pos.reshape(bs * S, D).astype(f32)

    # Matmul weights -> bf16 (MXU-native); biases / norm params stay f32.
    wq = params["wq"].astype(bf16)
    wk = params["wk"].astype(bf16)
    wv = params["wv"].astype(bf16)
    wo = params["wo"].astype(bf16)
    wff1 = params["w_ff1"].astype(bf16)
    wff2 = params["w_ff2"].astype(bf16)
    cls_w = jnp.zeros((D, C_pad), f32).at[:, :C].set(params["cls_w"]).astype(bf16)

    def const_spec(shape):
        zeros = (0,) * len(shape)
        return pl.BlockSpec(shape, lambda l: zeros)

    def layer_spec(shape):  # (L, *shape) array, streamed one layer per grid step
        zeros = (0,) * len(shape)
        return pl.BlockSpec((1,) + tuple(shape), lambda l: (l,) + zeros)

    in_specs = [
        const_spec((bs * NP, D)),                    # tgt (batch-folded)
        const_spec((bs * S, D)),                     # memory
        const_spec((bs * NP, D)),                    # query_pos
        const_spec((bs * S, D)),                     # key_pos
        const_spec((1, D)), const_spec((1, D)),      # norm0 gamma, beta
        layer_spec((D, D)), layer_spec((1, D)),      # wq, bq
        layer_spec((D, D)), layer_spec((1, D)),      # wk, bk
        layer_spec((D, D)), layer_spec((1, D)),      # wv, bv
        layer_spec((D, D)), layer_spec((1, D)),      # wo, bo
        layer_spec((1, D)), layer_spec((1, D)),      # ln1 gamma, beta
        layer_spec((D, FF)), layer_spec((1, FF)),    # linear1 w, b
        layer_spec((FF, D)), layer_spec((1, D)),     # linear2 w, b
        layer_spec((1, D)), layer_spec((1, D)),      # ln3 gamma, beta
        const_spec((1, D)), const_spec((1, D)),      # bn running mean, var
        const_spec((1, D)), const_spec((1, D)),      # bn gamma, beta
        const_spec((D, C_pad)),                      # classifier weight (lane-padded)
    ]
    out_specs = [
        pl.BlockSpec((bs * NP, D), lambda l: (0, 0)),       # carried tgt
        pl.BlockSpec((bs * NP, C_pad), lambda l: (0, 0)),   # classifier scores
    ]

    # Explicit scoped-VMEM limit from the actual resident footprint (x2 for
    # double buffering + headroom for in-kernel temporaries), clamped below
    # v7x's 64 MiB physical VMEM.
    f32b, bf16b = 4, 2
    resident = (
        (3 * bs * NP * D + 2 * bs * S * D) * f32b          # activations + tgt out
        + bs * NP * C_pad * f32b                            # cls out block
        + (4 * D * D + D * FF + FF * D) * bf16b             # one layer's matmul weights
        + (8 * D + FF) * f32b                               # per-layer biases / ln params
        + (6 * D) * f32b + D * C_pad * bf16b                # norm0/bn consts + cls weight
    )
    vmem_limit = int(min(56 * 1024 * 1024, 2 * resident + 16 * 1024 * 1024))

    kern = functools.partial(_detr_decoder_kernel, nheads, NP, S)
    otgt, ocls = pl.pallas_call(
        kern,
        grid_spec=pltpu.PrefetchScalarGridSpec(
            num_scalar_prefetch=0,
            grid=(L,),
            in_specs=in_specs,
            out_specs=out_specs,
        ),
        out_shape=(jax.ShapeDtypeStruct((bs * NP, D), f32),
                   jax.ShapeDtypeStruct((bs * NP, C_pad), f32)),
        compiler_params=pltpu.CompilerParams(
            dimension_semantics=("arbitrary",),       # sequential layer dependency
            vmem_limit_bytes=vmem_limit),
    )(tgt2, mem2, qpos2, kpos2,
      params["norm0_g"], params["norm0_b"],
      wq, params["bq"], wk, params["bk"], wv, params["bv"],
      wo, params["bo"],
      params["ln1_g"], params["ln1_b"],
      wff1, params["b_ff1"], wff2, params["b_ff2"],
      params["ln3_g"], params["ln3_b"],
      params["bn"]["rm"], params["bn"]["rv"], params["bn"]["g"], params["bn"]["b"],
      cls_w)

    return otgt.reshape(bs, NP, D), ocls.reshape(bs, NP, C_pad)[:, :, :C]


# --------------------------------------------------------------------------
# Pure-JAX f32 reference (same math as the PyTorch module, eval mode)
# --------------------------------------------------------------------------
def _ref_ln(x, g, b):
    mu = x.mean(-1, keepdims=True)
    var = ((x - mu) ** 2).mean(-1, keepdims=True)
    return (x - mu) / jnp.sqrt(var + LN_EPS) * g + b


def _ref_layer(tgt, memory, qpos, kpos, lp, nheads):
    D = tgt.shape[-1]
    hd = D // nheads
    q = (tgt + qpos) @ lp["wq"] + lp["bq"]
    k = (memory + kpos) @ lp["wk"] + lp["bk"]
    v = memory @ lp["wv"] + lp["bv"]

    def split(x):
        b, n, _ = x.shape
        return x.reshape(b, n, nheads, hd).transpose(0, 2, 1, 3)

    qh, kh, vh = split(q), split(k), split(v)
    s = jnp.einsum("bhqd,bhkd->bhqk", qh, kh) / math.sqrt(hd)
    a = jax.nn.softmax(s, axis=-1)
    o = jnp.einsum("bhqk,bhkd->bhqd", a, vh)
    b_, _, n, _ = o.shape
    attn = o.transpose(0, 2, 1, 3).reshape(b_, n, D) @ lp["wo"] + lp["bo"]

    x = _ref_ln(tgt + attn, lp["ln1_g"], lp["ln1_b"])
    h = jax.nn.gelu(x @ lp["w_ff1"] + lp["b_ff1"], approximate=False)
    y = x + (h @ lp["w_ff2"] + lp["b_ff2"])
    return _ref_ln(y, lp["ln3_g"], lp["ln3_b"])


def reference_forward(params, tgt, memory, qpos, kpos, nheads):
    L = params["wq"].shape[0]
    layer_keys = ["wq", "bq", "wk", "bk", "wv", "bv", "wo", "bo",
                  "ln1_g", "ln1_b", "w_ff1", "b_ff1", "w_ff2", "b_ff2",
                  "ln3_g", "ln3_b"]
    t = _ref_ln(tgt, params["norm0_g"], params["norm0_b"])
    for l in range(L):
        lp = {k: params[k][l] for k in layer_keys}
        t = _ref_layer(t, memory, qpos, kpos, lp, nheads)
    bn = params["bn"]
    xn = (t - bn["rm"]) / jnp.sqrt(bn["rv"] + BN_EPS) * bn["g"] + bn["b"]
    cls = xn @ params["cls_w"]
    return t, cls


# --------------------------------------------------------------------------
# Deterministic parameter init + driver
# --------------------------------------------------------------------------
def make_params(key, L, D, FF, C):
    ks = jax.random.split(key, 16)

    def uni(k, fan_in, shape):
        bound = 1.0 / math.sqrt(fan_in)
        return jax.random.uniform(k, shape, jnp.float32, -bound, bound)

    return {
        "norm0_g": jnp.ones((1, D), jnp.float32),
        "norm0_b": jnp.zeros((1, D), jnp.float32),
        # per-layer weights stacked on a leading layer axis (distinct per layer)
        "wq": uni(ks[0], D, (L, D, D)), "bq": uni(ks[1], D, (L, 1, D)),
        "wk": uni(ks[2], D, (L, D, D)), "bk": uni(ks[3], D, (L, 1, D)),
        "wv": uni(ks[4], D, (L, D, D)), "bv": uni(ks[5], D, (L, 1, D)),
        "wo": uni(ks[6], D, (L, D, D)), "bo": uni(ks[7], D, (L, 1, D)),
        "ln1_g": jnp.ones((L, 1, D), jnp.float32),
        "ln1_b": jnp.zeros((L, 1, D), jnp.float32),
        "w_ff1": uni(ks[8], D, (L, D, FF)), "b_ff1": uni(ks[9], D, (L, 1, FF)),
        "w_ff2": uni(ks[10], FF, (L, FF, D)), "b_ff2": uni(ks[11], FF, (L, 1, D)),
        "ln3_g": jnp.ones((L, 1, D), jnp.float32),
        "ln3_b": jnp.zeros((L, 1, D), jnp.float32),
        "bn": {  # BatchNorm1d eval-mode running stats
            "rm": 0.1 * jax.random.normal(ks[12], (1, D), jnp.float32),
            "rv": 1.0 + 0.1 * jax.random.uniform(ks[13], (1, D), jnp.float32),
            "g": jnp.ones((1, D), jnp.float32),
            "b": jnp.zeros((1, D), jnp.float32),
        },
        "cls_w": 0.001 * jax.random.normal(ks[14], (D, C), jnp.float32),
    }


if __name__ == "__main__":
    # small config consistent with the module
    BS, NP, S = 2, 8, 16           # batch, num_patch (queries), memory length
    D, NHEADS, FF = 32, 4, 64      # dim, nheads, dim_feedforward
    NUM_LAYERS, NUM_CLASSES = 2, 8

    key = jax.random.PRNGKey(0)
    k_p, k_t, k_m, k_q, k_k = jax.random.split(key, 5)
    params = make_params(k_p, NUM_LAYERS, D, FF, NUM_CLASSES)

    tgt = jax.random.normal(k_t, (BS, NP, D), jnp.float32)
    memory = jax.random.normal(k_m, (BS, S, D), jnp.float32)
    query_pos = jax.random.normal(k_q, (BS, NP, D), jnp.float32)
    key_pos = jax.random.normal(k_k, (BS, S, D), jnp.float32)

    out_tgt, out_cls = detr_decoder_forward(
        params, tgt, memory, query_pos, key_pos, NHEADS)
    jax.block_until_ready((out_tgt, out_cls))

    ref_tgt, ref_cls = reference_forward(
        params, tgt, memory, query_pos, key_pos, NHEADS)

    assert out_tgt.shape == (BS, NP, D) and out_cls.shape == (BS, NP, NUM_CLASSES)
    # Tolerance accounts for bf16 matmul operands and the EUP approximate-reciprocal
    # softmax denominator (LN / softmax stats / residuals stay f32 in the kernel).
    assert jnp.allclose(out_tgt, ref_tgt, atol=5e-2, rtol=5e-2), \
        float(jnp.max(jnp.abs(out_tgt - ref_tgt)))
    assert jnp.allclose(out_cls, ref_cls, atol=1e-2, rtol=5e-2), \
        float(jnp.max(jnp.abs(out_cls - ref_cls)))
    print("KERNEL_OK")
</pallas_src>

<mosaic_0001>
module attributes {stable_mosaic.version = 11 : i64} {
  func.func @_detr_decoder_kernel(%arg0: i32, %arg1: memref<16x32xf32, #tpu.memory_space<vmem>>, %arg2: memref<32x32xf32, #tpu.memory_space<vmem>>, %arg3: memref<16x32xf32, #tpu.memory_space<vmem>>, %arg4: memref<32x32xf32, #tpu.memory_space<vmem>>, %arg5: memref<1x32xf32, #tpu.memory_space<vmem>>, %arg6: memref<1x32xf32, #tpu.memory_space<vmem>>, %arg7: memref<1x32x32xbf16, #tpu.memory_space<vmem>>, %arg8: memref<1x1x32xf32, #tpu.memory_space<vmem>>, %arg9: memref<1x32x32xbf16, #tpu.memory_space<vmem>>, %arg10: memref<1x1x32xf32, #tpu.memory_space<vmem>>, %arg11: memref<1x32x32xbf16, #tpu.memory_space<vmem>>, %arg12: memref<1x1x32xf32, #tpu.memory_space<vmem>>, %arg13: memref<1x32x32xbf16, #tpu.memory_space<vmem>>, %arg14: memref<1x1x32xf32, #tpu.memory_space<vmem>>, %arg15: memref<1x1x32xf32, #tpu.memory_space<vmem>>, %arg16: memref<1x1x32xf32, #tpu.memory_space<vmem>>, %arg17: memref<1x32x64xbf16, #tpu.memory_space<vmem>>, %arg18: memref<1x1x64xf32, #tpu.memory_space<vmem>>, %arg19: memref<1x64x32xbf16, #tpu.memory_space<vmem>>, %arg20: memref<1x1x32xf32, #tpu.memory_space<vmem>>, %arg21: memref<1x1x32xf32, #tpu.memory_space<vmem>>, %arg22: memref<1x1x32xf32, #tpu.memory_space<vmem>>, %arg23: memref<1x32xf32, #tpu.memory_space<vmem>>, %arg24: memref<1x32xf32, #tpu.memory_space<vmem>>, %arg25: memref<1x32xf32, #tpu.memory_space<vmem>>, %arg26: memref<1x32xf32, #tpu.memory_space<vmem>>, %arg27: memref<32x128xbf16, #tpu.memory_space<vmem>>, %arg28: memref<16x32xf32, #tpu.memory_space<vmem>>, %arg29: memref<16x128xf32, #tpu.memory_space<vmem>>) attributes {dimension_semantics = [#tpu.dimension_semantics<arbitrary>], iteration_bounds = array<i64: 2>, scalar_prefetch = 0 : i64, scratch_operands = 0 : i64, tpu.core_type = #tpu.core_type<tc>, window_params = [{pipeline_mode = #tpu.pipeline_mode<synchronous>, transform_indices = @transform_0, window_bounds = array<i64: 16, 32>}, {pipeline_mode = #tpu.pipeline_mode<synchronous>, transform_indices = @transform_1, window_bounds = array<i64: 32, 32>}, {pipeline_mode = #tpu.pipeline_mode<synchronous>, transform_indices = @transform_2, window_bounds = array<i64: 16, 32>}, {pipeline_mode = #tpu.pipeline_mode<synchronous>, transform_indices = @transform_3, window_bounds = array<i64: 32, 32>}, {pipeline_mode = #tpu.pipeline_mode<synchronous>, transform_indices = @transform_4, window_bounds = array<i64: 1, 32>}, {pipeline_mode = #tpu.pipeline_mode<synchronous>, transform_indices = @transform_5, window_bounds = array<i64: 1, 32>}, {transform_indices = @transform_6, window_bounds = array<i64: 1, 32, 32>}, {transform_indices = @transform_7, window_bounds = array<i64: 1, 1, 32>}, {transform_indices = @transform_8, window_bounds = array<i64: 1, 32, 32>}, {transform_indices = @transform_9, window_bounds = array<i64: 1, 1, 32>}, {transform_indices = @transform_10, window_bounds = array<i64: 1, 32, 32>}, {transform_indices = @transform_11, window_bounds = array<i64: 1, 1, 32>}, {transform_indices = @transform_12, window_bounds = array<i64: 1, 32, 32>}, {transform_indices = @transform_13, window_bounds = array<i64: 1, 1, 32>}, {transform_indices = @transform_14, window_bounds = array<i64: 1, 1, 32>}, {transform_indices = @transform_15, window_bounds = array<i64: 1, 1, 32>}, {transform_indices = @transform_16, window_bounds = array<i64: 1, 32, 64>}, {transform_indices = @transform_17, window_bounds = array<i64: 1, 1, 64>}, {transform_indices = @transform_18, window_bounds = array<i64: 1, 64, 32>}, {transform_indices = @transform_19, window_bounds = array<i64: 1, 1, 32>}, {transform_indices = @transform_20, window_bounds = array<i64: 1, 1, 32>}, {transform_indices = @transform_21, window_bounds = array<i64: 1, 1, 32>}, {pipeline_mode = #tpu.pipeline_mode<synchronous>, transform_indices = @transform_22, window_bounds = array<i64: 1, 32>}, {pipeline_mode = #tpu.pipeline_mode<synchronous>, transform_indices = @transform_23, window_bounds = array<i64: 1, 32>}, {pipeline_mode = #tpu.pipeline_mode<synchronous>, transform_indices = @transform_24, window_bounds = array<i64: 1, 32>}, {pipeline_mode = #tpu.pipeline_mode<synchronous>, transform_indices = @transform_25, window_bounds = array<i64: 1, 32>}, {pipeline_mode = #tpu.pipeline_mode<synchronous>, transform_indices = @transform_26, window_bounds = array<i64: 32, 128>}, {pipeline_mode = #tpu.pipeline_mode<synchronous>, transform_indices = @transform_27, window_bounds = array<i64: 16, 32>}, {pipeline_mode = #tpu.pipeline_mode<synchronous>, transform_indices = @transform_28, window_bounds = array<i64: 16, 128>}]} {
    %c0_i32 = arith.constant 0 : i32
    %0 = arith.cmpi eq, %arg0, %c0_i32 : i32
    %1 = arith.extui %0 : i1 to i32
    %c0_i32_0 = arith.constant 0 : i32
    %2 = arith.cmpi ne, %1, %c0_i32_0 : i32
    scf.if %2 {
      %c0_140 = arith.constant 0 : index
      %c0_141 = arith.constant 0 : index
      %345 = vector.load %arg1[%c0_140, %c0_141] : memref<16x32xf32, #tpu.memory_space<vmem>>, vector<16x32xf32>
      %c0_142 = arith.constant 0 : index
      %c0_143 = arith.constant 0 : index
      %346 = vector.load %arg5[%c0_142, %c0_143] : memref<1x32xf32, #tpu.memory_space<vmem>>, vector<1x32xf32>
      %c0_144 = arith.constant 0 : index
      %c0_145 = arith.constant 0 : index
      %347 = vector.load %arg6[%c0_144, %c0_145] : memref<1x32xf32, #tpu.memory_space<vmem>>, vector<1x32xf32>
      %cst_146 = arith.constant dense<0.000000e+00> : vector<16xf32>
      %348 = vector.multi_reduction <add>, %345, %cst_146 [1] : vector<16x32xf32> to vector<16xf32>
      %349 = vector.shape_cast %348 : vector<16xf32> to vector<16x1xf32>
      %cst_147 = arith.constant 3.200000e+01 : f32
      %350 = vector.broadcast %cst_147 : f32 to vector<16x1xf32>
      %351 = arith.divf %349, %350 : vector<16x1xf32>
      %352 = vector.broadcast %351 : vector<16x1xf32> to vector<16x32xf32>
      %353 = arith.subf %345, %352 : vector<16x32xf32>
      %354 = arith.mulf %353, %353 : vector<16x32xf32>
      %cst_148 = arith.constant dense<0.000000e+00> : vector<16xf32>
      %355 = vector.multi_reduction <add>, %354, %cst_148 [1] : vector<16x32xf32> to vector<16xf32>
      %356 = vector.shape_cast %355 : vector<16xf32> to vector<16x1xf32>
      %cst_149 = arith.constant 3.200000e+01 : f32
      %357 = vector.broadcast %cst_149 : f32 to vector<16x1xf32>
      %358 = arith.divf %356, %357 : vector<16x1xf32>
      %359 = vector.broadcast %351 : vector<16x1xf32> to vector<16x32xf32>
      %360 = arith.subf %345, %359 : vector<16x32xf32>
      %cst_150 = arith.constant 9.99999974E-6 : f32
      %361 = vector.broadcast %cst_150 : f32 to vector<16x1xf32>
      %362 = arith.addf %358, %361 : vector<16x1xf32>
      %363 = math.rsqrt %362 : vector<16x1xf32>
      %364 = vector.broadcast %363 : vector<16x1xf32> to vector<16x32xf32>
      %365 = arith.mulf %360, %364 : vector<16x32xf32>
      %366 = vector.broadcast %346 : vector<1x32xf32> to vector<16x32xf32>
      %367 = arith.mulf %365, %366 : vector<16x32xf32>
      %368 = vector.broadcast %347 : vector<1x32xf32> to vector<16x32xf32>
      %369 = arith.addf %367, %368 : vector<16x32xf32>
      %c0_151 = arith.constant 0 : index
      %c0_152 = arith.constant 0 : index
      %370 = vector.load %arg28[%c0_151, %c0_152] : memref<16x32xf32, #tpu.memory_space<vmem>>, vector<16x32xf32>
      tpu.vector_store %arg28[%c0_151, %c0_152], %369 {strides = array<i32>} : memref<16x32xf32, #tpu.memory_space<vmem>>, vector<16x32xf32>,
    } else {
    }
    %c0 = arith.constant 0 : index
    %c0_1 = arith.constant 0 : index
    %3 = vector.load %arg28[%c0, %c0_1] : memref<16x32xf32, #tpu.memory_space<vmem>>, vector<16x32xf32>
    %c0_2 = arith.constant 0 : index
    %c0_3 = arith.constant 0 : index
    %4 = vector.load %arg3[%c0_2, %c0_3] : memref<16x32xf32, #tpu.memory_space<vmem>>, vector<16x32xf32>
    %5 = arith.addf %3, %4 : vector<16x32xf32>
    %6 = arith.truncf %5 : vector<16x32xf32> to vector<16x32xbf16>
    %c0_4 = arith.constant 0 : index
    %c0_5 = arith.constant 0 : index
    %7 = vector.load %arg2[%c0_4, %c0_5] : memref<32x32xf32, #tpu.memory_space<vmem>>, vector<32x32xf32>
    %c0_6 = arith.constant 0 : index
    %c0_7 = arith.constant 0 : index
    %8 = vector.load %arg4[%c0_6, %c0_7] : memref<32x32xf32, #tpu.memory_space<vmem>>, vector<32x32xf32>
    %9 = arith.addf %7, %8 : vector<32x32xf32>
    %10 = arith.truncf %9 : vector<32x32xf32> to vector<32x32xbf16>
    %c0_8 = arith.constant 0 : index
    %c0_9 = arith.constant 0 : index
    %11 = vector.load %arg2[%c0_8, %c0_9] : memref<32x32xf32, #tpu.memory_space<vmem>>, vector<32x32xf32>
    %12 = arith.truncf %11 : vector<32x32xf32> to vector<32x32xbf16>
    %c0_10 = arith.constant 0 : index
    %c0_11 = arith.constant 0 : index
    %c0_12 = arith.constant 0 : index
    %13 = vector.load %arg7[%c0_10, %c0_11, %c0_12] : memref<1x32x32xbf16, #tpu.memory_space<vmem>>, vector<1x32x32xbf16>
    %14 = vector.shape_cast %13 : vector<1x32x32xbf16> to vector<32x32xbf16>
    %cst = arith.constant dense<0.000000e+00> : vector<16x32xf32>
    %15 = tpu.matmul %6, %14, %cst {dimension_numbers = #tpu.dot_dimension_numbers<[1], [0], [0], [1], [0, 0, 1, 1], [], []>} : vector<16x32xbf16>, vector<32x32xbf16>, vector<16x32xf32> -> vector<16x32xf32>
    %c0_13 = arith.constant 0 : index
    %c0_14 = arith.constant 0 : index
    %c0_15 = arith.constant 0 : index
    %16 = vector.load %arg8[%c0_13, %c0_14, %c0_15] : memref<1x1x32xf32, #tpu.memory_space<vmem>>, vector<1x1x32xf32>
    %17 = vector.shape_cast %16 : vector<1x1x32xf32> to vector<1x32xf32>
    %18 = vector.broadcast %17 : vector<1x32xf32> to vector<16x32xf32>
    %19 = arith.addf %15, %18 : vector<16x32xf32>
    %c0_16 = arith.constant 0 : index
    %c0_17 = arith.constant 0 : index
    %c0_18 = arith.constant 0 : index
    %20 = vector.load %arg9[%c0_16, %c0_17, %c0_18] : memref<1x32x32xbf16, #tpu.memory_space<vmem>>, vector<1x32x32xbf16>
    %21 = vector.shape_cast %20 : vector<1x32x32xbf16> to vector<32x32xbf16>
    %cst_19 = arith.constant dense<0.000000e+00> : vector<32x32xf32>
    %22 = tpu.matmul %10, %21, %cst_19 {dimension_numbers = #tpu.dot_dimension_numbers<[1], [0], [0], [1], [0, 0, 1, 1], [], []>} : vector<32x32xbf16>, vector<32x32xbf16>, vector<32x32xf32> -> vector<32x32xf32>
    %c0_20 = arith.constant 0 : index
    %c0_21 = arith.constant 0 : index
    %c0_22 = arith.constant 0 : index
    %23 = vector.load %arg10[%c0_20, %c0_21, %c0_22] : memref<1x1x32xf32, #tpu.memory_space<vmem>>, vector<1x1x32xf32>
    %24 = vector.shape_cast %23 : vector<1x1x32xf32> to vector<1x32xf32>
    %25 = vector.broadcast %24 : vector<1x32xf32> to vector<32x32xf32>
    %26 = arith.addf %22, %25 : vector<32x32xf32>
    %c0_23 = arith.constant 0 : index
    %c0_24 = arith.constant 0 : index
    %c0_25 = arith.constant 0 : index
    %27 = vector.load %arg11[%c0_23, %c0_24, %c0_25] : memref<1x32x32xbf16, #tpu.memory_space<vmem>>, vector<1x32x32xbf16>
    %28 = vector.shape_cast %27 : vector<1x32x32xbf16> to vector<32x32xbf16>
    %cst_26 = arith.constant dense<0.000000e+00> : vector<32x32xf32>
    %29 = tpu.matmul %12, %28, %cst_26 {dimension_numbers = #tpu.dot_dimension_numbers<[1], [0], [0], [1], [0, 0, 1, 1], [], []>} : vector<32x32xbf16>, vector<32x32xbf16>, vector<32x32xf32> -> vector<32x32xf32>
    %c0_27 = arith.constant 0 : index
    %c0_28 = arith.constant 0 : index
    %c0_29 = arith.constant 0 : index
    %30 = vector.load %arg12[%c0_27, %c0_28, %c0_29] : memref<1x1x32xf32, #tpu.memory_space<vmem>>, vector<1x1x32xf32>
    %31 = vector.shape_cast %30 : vector<1x1x32xf32> to vector<1x32xf32>
    %32 = vector.broadcast %31 : vector<1x32xf32> to vector<32x32xf32>
    %33 = arith.addf %29, %32 : vector<32x32xf32>
    %c0_30 = arith.constant 0 : index
    %c0_31 = arith.constant 0 : index
    %c0_32 = arith.constant 0 : index
    %34 = vector.load %arg13[%c0_30, %c0_31, %c0_32] : memref<1x32x32xbf16, #tpu.memory_space<vmem>>, vector<1x32x32xbf16>
    %35 = vector.shape_cast %34 : vector<1x32x32xbf16> to vector<32x32xbf16>
    %36 = vector.extract_strided_slice %19 {offsets = [0, 0], sizes = [8, 32], strides = [1, 1]} : vector<16x32xf32> to vector<8x32xf32>
    %37 = arith.truncf %36 : vector<8x32xf32> to vector<8x32xbf16>
    %38 = vector.extract_strided_slice %26 {offsets = [0, 0], sizes = [16, 32], strides = [1, 1]} : vector<32x32xf32> to vector<16x32xf32>
    %39 = arith.truncf %38 : vector<16x32xf32> to vector<16x32xbf16>
    %40 = vector.extract_strided_slice %33 {offsets = [0, 0], sizes = [16, 32], strides = [1, 1]} : vector<32x32xf32> to vector<16x32xf32>
    %41 = arith.truncf %40 : vector<16x32xf32> to vector<16x32xbf16>
    %cst_33 = arith.constant 0.000000e+00 : f32
    %42 = vector.broadcast %cst_33 : f32 to vector<8x32xf32>
    %43 = vector.extract_strided_slice %37 {offsets = [0, 0], sizes = [8, 8], strides = [1, 1]} : vector<8x32xbf16> to vector<8x8xbf16>
    %44 = vector.extract_strided_slice %39 {offsets = [0, 0], sizes = [16, 8], strides = [1, 1]} : vector<16x32xbf16> to vector<16x8xbf16>
    %45 = vector.extract_strided_slice %41 {offsets = [0, 0], sizes = [16, 8], strides = [1, 1]} : vector<16x32xbf16> to vector<16x8xbf16>
    %cst_34 = arith.constant dense<0.000000e+00> : vector<8x16xf32>
    %46 = tpu.matmul %43, %44, %cst_34 {dimension_numbers = #tpu.dot_dimension_numbers<[1], [1], [0], [0], [0, 0, 1, 0], [], []>} : vector<8x8xbf16>, vector<16x8xbf16>, vector<8x16xf32> -> vector<8x16xf32>
    %cst_35 = arith.constant 0.353553385 : f32
    %47 = vector.broadcast %cst_35 : f32 to vector<8x16xf32>
    %48 = arith.mulf %46, %47 : vector<8x16xf32>
    %cst_36 = arith.constant dense<0xFF800000> : vector<8xf32>
    %49 = vector.multi_reduction <maximumf>, %48, %cst_36 [1] : vector<8x16xf32> to vector<8xf32>
    %50 = vector.shape_cast %49 : vector<8xf32> to vector<8x1xf32>
    %51 = vector.broadcast %50 : vector<8x1xf32> to vector<8x16xf32>
    %52 = arith.subf %48, %51 : vector<8x16xf32>
    %53 = math.exp %52 : vector<8x16xf32>
    %cst_37 = arith.constant dense<0.000000e+00> : vector<8xf32>
    %54 = vector.multi_reduction <add>, %53, %cst_37 [1] : vector<8x16xf32> to vector<8xf32>
    %55 = vector.shape_cast %54 : vector<8xf32> to vector<8x1xf32>
    %56 = tpu.reciprocal %55 {approx = true} : vector<8x1xf32> -> vector<8x1xf32>
    %57 = vector.broadcast %56 : vector<8x1xf32> to vector<8x16xf32>
    %58 = arith.mulf %53, %57 : vector<8x16xf32>
    %59 = arith.truncf %58 : vector<8x16xf32> to vector<8x16xbf16>
    %cst_38 = arith.constant dense<0.000000e+00> : vector<8x8xf32>
    %60 = tpu.matmul %59, %45, %cst_38 {dimension_numbers = #tpu.dot_dimension_numbers<[1], [0], [0], [1], [0, 0, 1, 1], [], []>} : vector<8x16xbf16>, vector<16x8xbf16>, vector<8x8xf32> -> vector<8x8xf32>
    %61 = arith.truncf %60 : vector<8x8xf32> to vector<8x8xbf16>
    %62 = vector.extract_strided_slice %35 {offsets = [0, 0], sizes = [8, 32], strides = [1, 1]} : vector<32x32xbf16> to vector<8x32xbf16>
    %cst_39 = arith.constant dense<0.000000e+00> : vector<8x32xf32>
    %63 = tpu.matmul %61, %62, %cst_39 {dimension_numbers = #tpu.dot_dimension_numbers<[1], [0], [0], [1], [0, 0, 1, 1], [], []>} : vector<8x8xbf16>, vector<8x32xbf16>, vector<8x32xf32> -> vector<8x32xf32>
    %64 = arith.addf %42, %63 : vector<8x32xf32>
    %65 = vector.extract_strided_slice %37 {offsets = [0, 8], sizes = [8, 8], strides = [1, 1]} : vector<8x32xbf16> to vector<8x8xbf16>
    %66 = vector.extract_strided_slice %39 {offsets = [0, 8], sizes = [16, 8], strides = [1, 1]} : vector<16x32xbf16> to vector<16x8xbf16>
    %67 = vector.extract_strided_slice %41 {offsets = [0, 8], sizes = [16, 8], strides = [1, 1]} : vector<16x32xbf16> to vector<16x8xbf16>
    %cst_40 = arith.constant dense<0.000000e+00> : vector<8x16xf32>
    %68 = tpu.matmul %65, %66, %cst_40 {dimension_numbers = #tpu.dot_dimension_numbers<[1], [1], [0], [0], [0, 0, 1, 0], [], []>} : vector<8x8xbf16>, vector<16x8xbf16>, vector<8x16xf32> -> vector<8x16xf32>
    %cst_41 = arith.constant 0.353553385 : f32
    %69 = vector.broadcast %cst_41 : f32 to vector<8x16xf32>
    %70 = arith.mulf %68, %69 : vector<8x16xf32>
    %cst_42 = arith.constant dense<0xFF800000> : vector<8xf32>
    %71 = vector.multi_reduction <maximumf>, %70, %cst_42 [1] : vector<8x16xf32> to vector<8xf32>
    %72 = vector.shape_cast %71 : vector<8xf32> to vector<8x1xf32>
    %73 = vector.broadcast %72 : vector<8x1xf32> to vector<8x16xf32>
    %74 = arith.subf %70, %73 : vector<8x16xf32>
    %75 = math.exp %74 : vector<8x16xf32>
    %cst_43 = arith.constant dense<0.000000e+00> : vector<8xf32>
    %76 = vector.multi_reduction <add>, %75, %cst_43 [1] : vector<8x16xf32> to vector<8xf32>
    %77 = vector.shape_cast %76 : vector<8xf32> to vector<8x1xf32>
    %78 = tpu.reciprocal %77 {approx = true} : vector<8x1xf32> -> vector<8x1xf32>
    %79 = vector.broadcast %78 : vector<8x1xf32> to vector<8x16xf32>
    %80 = arith.mulf %75, %79 : vector<8x16xf32>
    %81 = arith.truncf %80 : vector<8x16xf32> to vector<8x16xbf16>
    %cst_44 = arith.constant dense<0.000000e+00> : vector<8x8xf32>
    %82 = tpu.matmul %81, %67, %cst_44 {dimension_numbers = #tpu.dot_dimension_numbers<[1], [0], [0], [1], [0, 0, 1, 1], [], []>} : vector<8x16xbf16>, vector<16x8xbf16>, vector<8x8xf32> -> vector<8x8xf32>
    %83 = arith.truncf %82 : vector<8x8xf32> to vector<8x8xbf16>
    %84 = vector.extract_strided_slice %35 {offsets = [8, 0], sizes = [8, 32], strides = [1, 1]} : vector<32x32xbf16> to vector<8x32xbf16>
    %cst_45 = arith.constant dense<0.000000e+00> : vector<8x32xf32>
    %85 = tpu.matmul %83, %84, %cst_45 {dimension_numbers = #tpu.dot_dimension_numbers<[1], [0], [0], [1], [0, 0, 1, 1], [], []>} : vector<8x8xbf16>, vector<8x32xbf16>, vector<8x32xf32> -> vector<8x32xf32>
    %86 = arith.addf %64, %85 : vector<8x32xf32>
    %87 = vector.extract_strided_slice %37 {offsets = [0, 16], sizes = [8, 8], strides = [1, 1]} : vector<8x32xbf16> to vector<8x8xbf16>
    %88 = vector.extract_strided_slice %39 {offsets = [0, 16], sizes = [16, 8], strides = [1, 1]} : vector<16x32xbf16> to vector<16x8xbf16>
    %89 = vector.extract_strided_slice %41 {offsets = [0, 16], sizes = [16, 8], strides = [1, 1]} : vector<16x32xbf16> to vector<16x8xbf16>
    %cst_46 = arith.constant dense<0.000000e+00> : vector<8x16xf32>
    %90 = tpu.matmul %87, %88, %cst_46 {dimension_numbers = #tpu.dot_dimension_numbers<[1], [1], [0], [0], [0, 0, 1, 0], [], []>} : vector<8x8xbf16>, vector<16x8xbf16>, vector<8x16xf32> -> vector<8x16xf32>
    %cst_47 = arith.constant 0.353553385 : f32
    %91 = vector.broadcast %cst_47 : f32 to vector<8x16xf32>
    %92 = arith.mulf %90, %91 : vector<8x16xf32>
    %cst_48 = arith.constant dense<0xFF800000> : vector<8xf32>
    %93 = vector.multi_reduction <maximumf>, %92, %cst_48 [1] : vector<8x16xf32> to vector<8xf32>
    %94 = vector.shape_cast %93 : vector<8xf32> to vector<8x1xf32>
    %95 = vector.broadcast %94 : vector<8x1xf32> to vector<8x16xf32>
    %96 = arith.subf %92, %95 : vector<8x16xf32>
    %97 = math.exp %96 : vector<8x16xf32>
    %cst_49 = arith.constant dense<0.000000e+00> : vector<8xf32>
    %98 = vector.multi_reduction <add>, %97, %cst_49 [1] : vector<8x16xf32> to vector<8xf32>
    %99 = vector.shape_cast %98 : vector<8xf32> to vector<8x1xf32>
    %100 = tpu.reciprocal %99 {approx = true} : vector<8x1xf32> -> vector<8x1xf32>
    %101 = vector.broadcast %100 : vector<8x1xf32> to vector<8x16xf32>
    %102 = arith.mulf %97, %101 : vector<8x16xf32>
    %103 = arith.truncf %102 : vector<8x16xf32> to vector<8x16xbf16>
    %cst_50 = arith.constant dense<0.000000e+00> : vector<8x8xf32>
    %104 = tpu.matmul %103, %89, %cst_50 {dimension_numbers = #tpu.dot_dimension_numbers<[1], [0], [0], [1], [0, 0, 1, 1], [], []>} : vector<8x16xbf16>, vector<16x8xbf16>, vector<8x8xf32> -> vector<8x8xf32>
    %105 = arith.truncf %104 : vector<8x8xf32> to vector<8x8xbf16>
    %106 = vector.extract_strided_slice %35 {offsets = [16, 0], sizes = [8, 32], strides = [1, 1]} : vector<32x32xbf16> to vector<8x32xbf16>
    %cst_51 = arith.constant dense<0.000000e+00> : vector<8x32xf32>
    %107 = tpu.matmul %105, %106, %cst_51 {dimension_numbers = #tpu.dot_dimension_numbers<[1], [0], [0], [1], [0, 0, 1, 1], [], []>} : vector<8x8xbf16>, vector<8x32xbf16>, vector<8x32xf32> -> vector<8x32xf32>
    %108 = arith.addf %86, %107 : vector<8x32xf32>
    %109 = vector.extract_strided_slice %37 {offsets = [0, 24], sizes = [8, 8], strides = [1, 1]} : vector<8x32xbf16> to vector<8x8xbf16>
    %110 = vector.extract_strided_slice %39 {offsets = [0, 24], sizes = [16, 8], strides = [1, 1]} : vector<16x32xbf16> to vector<16x8xbf16>
    %111 = vector.extract_strided_slice %41 {offsets = [0, 24], sizes = [16, 8], strides = [1, 1]} : vector<16x32xbf16> to vector<16x8xbf16>
    %cst_52 = arith.constant dense<0.000000e+00> : vector<8x16xf32>
    %112 = tpu.matmul %109, %110, %cst_52 {dimension_numbers = #tpu.dot_dimension_numbers<[1], [1], [0], [0], [0, 0, 1, 0], [], []>} : vector<8x8xbf16>, vector<16x8xbf16>, vector<8x16xf32> -> vector<8x16xf32>
    %cst_53 = arith.constant 0.353553385 : f32
    %113 = vector.broadcast %cst_53 : f32 to vector<8x16xf32>
    %114 = arith.mulf %112, %113 : vector<8x16xf32>
    %cst_54 = arith.constant dense<0xFF800000> : vector<8xf32>
    %115 = vector.multi_reduction <maximumf>, %114, %cst_54 [1] : vector<8x16xf32> to vector<8xf32>
    %116 = vector.shape_cast %115 : vector<8xf32> to vector<8x1xf32>
    %117 = vector.broadcast %116 : vector<8x1xf32> to vector<8x16xf32>
    %118 = arith.subf %114, %117 : vector<8x16xf32>
    %119 = math.exp %118 : vector<8x16xf32>
    %cst_55 = arith.constant dense<0.000000e+00> : vector<8xf32>
    %120 = vector.multi_reduction <add>, %119, %cst_55 [1] : vector<8x16xf32> to vector<8xf32>
    %121 = vector.shape_cast %120 : vector<8xf32> to vector<8x1xf32>
    %122 = tpu.reciprocal %121 {approx = true} : vector<8x1xf32> -> vector<8x1xf32>
    %123 = vector.broadcast %122 : vector<8x1xf32> to vector<8x16xf32>
    %124 = arith.mulf %119, %123 : vector<8x16xf32>
    %125 = arith.truncf %124 : vector<8x16xf32> to vector<8x16xbf16>
    %cst_56 = arith.constant dense<0.000000e+00> : vector<8x8xf32>
    %126 = tpu.matmul %125, %111, %cst_56 {dimension_numbers = #tpu.dot_dimension_numbers<[1], [0], [0], [1], [0, 0, 1, 1], [], []>} : vector<8x16xbf16>, vector<16x8xbf16>, vector<8x8xf32> -> vector<8x8xf32>
    %127 = arith.truncf %126 : vector<8x8xf32> to vector<8x8xbf16>
    %128 = vector.extract_strided_slice %35 {offsets = [24, 0], sizes = [8, 32], strides = [1, 1]} : vector<32x32xbf16> to vector<8x32xbf16>
    %cst_57 = arith.constant dense<0.000000e+00> : vector<8x32xf32>
    %129 = tpu.matmul %127, %128, %cst_57 {dimension_numbers = #tpu.dot_dimension_numbers<[1], [0], [0], [1], [0, 0, 1, 1], [], []>} : vector<8x8xbf16>, vector<8x32xbf16>, vector<8x32xf32> -> vector<8x32xf32>
    %130 = arith.addf %108, %129 : vector<8x32xf32>
    %131 = vector.extract_strided_slice %19 {offsets = [8, 0], sizes = [8, 32], strides = [1, 1]} : vector<16x32xf32> to vector<8x32xf32>
    %132 = arith.truncf %131 : vector<8x32xf32> to vector<8x32xbf16>
    %133 = vector.extract_strided_slice %26 {offsets = [16, 0], sizes = [16, 32], strides = [1, 1]} : vector<32x32xf32> to vector<16x32xf32>
    %134 = arith.truncf %133 : vector<16x32xf32> to vector<16x32xbf16>
    %135 = vector.extract_strided_slice %33 {offsets = [16, 0], sizes = [16, 32], strides = [1, 1]} : vector<32x32xf32> to vector<16x32xf32>
    %136 = arith.truncf %135 : vector<16x32xf32> to vector<16x32xbf16>
    %cst_58 = arith.constant 0.000000e+00 : f32
    %137 = vector.broadcast %cst_58 : f32 to vector<8x32xf32>
    %138 = vector.extract_strided_slice %132 {offsets = [0, 0], sizes = [8, 8], strides = [1, 1]} : vector<8x32xbf16> to vector<8x8xbf16>
    %139 = vector.extract_strided_slice %134 {offsets = [0, 0], sizes = [16, 8], strides = [1, 1]} : vector<16x32xbf16> to vector<16x8xbf16>
    %140 = vector.extract_strided_slice %136 {offsets = [0, 0], sizes = [16, 8], strides = [1, 1]} : vector<16x32xbf16> to vector<16x8xbf16>
    %cst_59 = arith.constant dense<0.000000e+00> : vector<8x16xf32>
    %141 = tpu.matmul %138, %139, %cst_59 {dimension_numbers = #tpu.dot_dimension_numbers<[1], [1], [0], [0], [0, 0, 1, 0], [], []>} : vector<8x8xbf16>, vector<16x8xbf16>, vector<8x16xf32> -> vector<8x16xf32>
    %cst_60 = arith.constant 0.353553385 : f32
    %142 = vector.broadcast %cst_60 : f32 to vector<8x16xf32>
    %143 = arith.mulf %141, %142 : vector<8x16xf32>
    %cst_61 = arith.constant dense<0xFF800000> : vector<8xf32>
    %144 = vector.multi_reduction <maximumf>, %143, %cst_61 [1] : vector<8x16xf32> to vector<8xf32>
    %145 = vector.shape_cast %144 : vector<8xf32> to vector<8x1xf32>
    %146 = vector.broadcast %145 : vector<8x1xf32> to vector<8x16xf32>
    %147 = arith.subf %143, %146 : vector<8x16xf32>
    %148 = math.exp %147 : vector<8x16xf32>
    %cst_62 = arith.constant dense<0.000000e+00> : vector<8xf32>
    %149 = vector.multi_reduction <add>, %148, %cst_62 [1] : vector<8x16xf32> to vector<8xf32>
    %150 = vector.shape_cast %149 : vector<8xf32> to vector<8x1xf32>
    %151 = tpu.reciprocal %150 {approx = true} : vector<8x1xf32> -> vector<8x1xf32>
    %152 = vector.broadcast %151 : vector<8x1xf32> to vector<8x16xf32>
    %153 = arith.mulf %148, %152 : vector<8x16xf32>
    %154 = arith.truncf %153 : vector<8x16xf32> to vector<8x16xbf16>
    %cst_63 = arith.constant dense<0.000000e+00> : vector<8x8xf32>
    %155 = tpu.matmul %154, %140, %cst_63 {dimension_numbers = #tpu.dot_dimension_numbers<[1], [0], [0], [1], [0, 0, 1, 1], [], []>} : vector<8x16xbf16>, vector<16x8xbf16>, vector<8x8xf32> -> vector<8x8xf32>
    %156 = arith.truncf %155 : vector<8x8xf32> to vector<8x8xbf16>
    %157 = vector.extract_strided_slice %35 {offsets = [0, 0], sizes = [8, 32], strides = [1, 1]} : vector<32x32xbf16> to vector<8x32xbf16>
    %cst_64 = arith.constant dense<0.000000e+00> : vector<8x32xf32>
    %158 = tpu.matmul %156, %157, %cst_64 {dimension_numbers = #tpu.dot_dimension_numbers<[1], [0], [0], [1], [0, 0, 1, 1], [], []>} : vector<8x8xbf16>, vector<8x32xbf16>, vector<8x32xf32> -> vector<8x32xf32>
    %159 = arith.addf %137, %158 : vector<8x32xf32>
    %160 = vector.extract_strided_slice %132 {offsets = [0, 8], sizes = [8, 8], strides = [1, 1]} : vector<8x32xbf16> to vector<8x8xbf16>
    %161 = vector.extract_strided_slice %134 {offsets = [0, 8], sizes = [16, 8], strides = [1, 1]} : vector<16x32xbf16> to vector<16x8xbf16>
    %162 = vector.extract_strided_slice %136 {offsets = [0, 8], sizes = [16, 8], strides = [1, 1]} : vector<16x32xbf16> to vector<16x8xbf16>
    %cst_65 = arith.constant dense<0.000000e+00> : vector<8x16xf32>
    %163 = tpu.matmul %160, %161, %cst_65 {dimension_numbers = #tpu.dot_dimension_numbers<[1], [1], [0], [0], [0, 0, 1, 0], [], []>} : vector<8x8xbf16>, vector<16x8xbf16>, vector<8x16xf32> -> vector<8x16xf32>
    %cst_66 = arith.constant 0.353553385 : f32
    %164 = vector.broadcast %cst_66 : f32 to vector<8x16xf32>
    %165 = arith.mulf %163, %164 : vector<8x16xf32>
    %cst_67 = arith.constant dense<0xFF800000> : vector<8xf32>
    %166 = vector.multi_reduction <maximumf>, %165, %cst_67 [1] : vector<8x16xf32> to vector<8xf32>
    %167 = vector.shape_cast %166 : vector<8xf32> to vector<8x1xf32>
    %168 = vector.broadcast %167 : vector<8x1xf32> to vector<8x16xf32>
    %169 = arith.subf %165, %168 : vector<8x16xf32>
    %170 = math.exp %169 : vector<8x16xf32>
    %cst_68 = arith.constant dense<0.000000e+00> : vector<8xf32>
    %171 = vector.multi_reduction <add>, %170, %cst_68 [1] : vector<8x16xf32> to vector<8xf32>
    %172 = vector.shape_cast %171 : vector<8xf32> to vector<8x1xf32>
    %173 = tpu.reciprocal %172 {approx = true} : vector<8x1xf32> -> vector<8x1xf32>
    %174 = vector.broadcast %173 : vector<8x1xf32> to vector<8x16xf32>
    %175 = arith.mulf %170, %174 : vector<8x16xf32>
    %176 = arith.truncf %175 : vector<8x16xf32> to vector<8x16xbf16>
    %cst_69 = arith.constant dense<0.000000e+00> : vector<8x8xf32>
    %177 = tpu.matmul %176, %162, %cst_69 {dimension_numbers = #tpu.dot_dimension_numbers<[1], [0], [0], [1], [0, 0, 1, 1], [], []>} : vector<8x16xbf16>, vector<16x8xbf16>, vector<8x8xf32> -> vector<8x8xf32>
    %178 = arith.truncf %177 : vector<8x8xf32> to vector<8x8xbf16>
    %179 = vector.extract_strided_slice %35 {offsets = [8, 0], sizes = [8, 32], strides = [1, 1]} : vector<32x32xbf16> to vector<8x32xbf16>
    %cst_70 = arith.constant dense<0.000000e+00> : vector<8x32xf32>
    %180 = tpu.matmul %178, %179, %cst_70 {dimension_numbers = #tpu.dot_dimension_numbers<[1], [0], [0], [1], [0, 0, 1, 1], [], []>} : vector<8x8xbf16>, vector<8x32xbf16>, vector<8x32xf32> -> vector<8x32xf32>
    %181 = arith.addf %159, %180 : vector<8x32xf32>
    %182 = vector.extract_strided_slice %132 {offsets = [0, 16], sizes = [8, 8], strides = [1, 1]} : vector<8x32xbf16> to vector<8x8xbf16>
    %183 = vector.extract_strided_slice %134 {offsets = [0, 16], sizes = [16, 8], strides = [1, 1]} : vector<16x32xbf16> to vector<16x8xbf16>
    %184 = vector.extract_strided_slice %136 {offsets = [0, 16], sizes = [16, 8], strides = [1, 1]} : vector<16x32xbf16> to vector<16x8xbf16>
    %cst_71 = arith.constant dense<0.000000e+00> : vector<8x16xf32>
    %185 = tpu.matmul %182, %183, %cst_71 {dimension_numbers = #tpu.dot_dimension_numbers<[1], [1], [0], [0], [0, 0, 1, 0], [], []>} : vector<8x8xbf16>, vector<16x8xbf16>, vector<8x16xf32> -> vector<8x16xf32>
    %cst_72 = arith.constant 0.353553385 : f32
    %186 = vector.broadcast %cst_72 : f32 to vector<8x16xf32>
    %187 = arith.mulf %185, %186 : vector<8x16xf32>
    %cst_73 = arith.constant dense<0xFF800000> : vector<8xf32>
    %188 = vector.multi_reduction <maximumf>, %187, %cst_73 [1] : vector<8x16xf32> to vector<8xf32>
    %189 = vector.shape_cast %188 : vector<8xf32> to vector<8x1xf32>
    %190 = vector.broadcast %189 : vector<8x1xf32> to vector<8x16xf32>
    %191 = arith.subf %187, %190 : vector<8x16xf32>
    %192 = math.exp %191 : vector<8x16xf32>
    %cst_74 = arith.constant dense<0.000000e+00> : vector<8xf32>
    %193 = vector.multi_reduction <add>, %192, %cst_74 [1] : vector<8x16xf32> to vector<8xf32>
    %194 = vector.shape_cast %193 : vector<8xf32> to vector<8x1xf32>
    %195 = tpu.reciprocal %194 {approx = true} : vector<8x1xf32> -> vector<8x1xf32>
    %196 = vector.broadcast %195 : vector<8x1xf32> to vector<8x16xf32>
    %197 = arith.mulf %192, %196 : vector<8x16xf32>
    %198 = arith.truncf %197 : vector<8x16xf32> to vector<8x16xbf16>
    %cst_75 = arith.constant dense<0.000000e+00> : vector<8x8xf32>
    %199 = tpu.matmul %198, %184, %cst_75 {dimension_numbers = #tpu.dot_dimension_numbers<[1], [0], [0], [1], [0, 0, 1, 1], [], []>} : vector<8x16xbf16>, vector<16x8xbf16>, vector<8x8xf32> -> vector<8x8xf32>
    %200 = arith.truncf %199 : vector<8x8xf32> to vector<8x8xbf16>
    %201 = vector.extract_strided_slice %35 {offsets = [16, 0], sizes = [8, 32], strides = [1, 1]} : vector<32x32xbf16> to vector<8x32xbf16>
    %cst_76 = arith.constant dense<0.000000e+00> : vector<8x32xf32>
    %202 = tpu.matmul %200, %201, %cst_76 {dimension_numbers = #tpu.dot_dimension_numbers<[1], [0], [0], [1], [0, 0, 1, 1], [], []>} : vector<8x8xbf16>, vector<8x32xbf16>, vector<8x32xf32> -> vector<8x32xf32>
    %203 = arith.addf %181, %202 : vector<8x32xf32>
    %204 = vector.extract_strided_slice %132 {offsets = [0, 24], sizes = [8, 8], strides = [1, 1]} : vector<8x32xbf16> to vector<8x8xbf16>
    %205 = vector.extract_strided_slice %134 {offsets = [0, 24], sizes = [16, 8], strides = [1, 1]} : vector<16x32xbf16> to vector<16x8xbf16>
    %206 = vector.extract_strided_slice %136 {offsets = [0, 24], sizes = [16, 8], strides = [1, 1]} : vector<16x32xbf16> to vector<16x8xbf16>
    %cst_77 = arith.constant dense<0.000000e+00> : vector<8x16xf32>
    %207 = tpu.matmul %204, %205, %cst_77 {dimension_numbers = #tpu.dot_dimension_numbers<[1], [1], [0], [0], [0, 0, 1, 0], [], []>} : vector<8x8xbf16>, vector<16x8xbf16>, vector<8x16xf32> -> vector<8x16xf32>
    %cst_78 = arith.constant 0.353553385 : f32
    %208 = vector.broadcast %cst_78 : f32 to vector<8x16xf32>
    %209 = arith.mulf %207, %208 : vector<8x16xf32>
    %cst_79 = arith.constant dense<0xFF800000> : vector<8xf32>
    %210 = vector.multi_reduction <maximumf>, %209, %cst_79 [1] : vector<8x16xf32> to vector<8xf32>
    %211 = vector.shape_cast %210 : vector<8xf32> to vector<8x1xf32>
    %212 = vector.broadcast %211 : vector<8x1xf32> to vector<8x16xf32>
    %213 = arith.subf %209, %212 : vector<8x16xf32>
    %214 = math.exp %213 : vector<8x16xf32>
    %cst_80 = arith.constant dense<0.000000e+00> : vector<8xf32>
    %215 = vector.multi_reduction <add>, %214, %cst_80 [1] : vector<8x16xf32> to vector<8xf32>
    %216 = vector.shape_cast %215 : vector<8xf32> to vector<8x1xf32>
    %217 = tpu.reciprocal %216 {approx = true} : vector<8x1xf32> -> vector<8x1xf32>
    %218 = vector.broadcast %217 : vector<8x1xf32> to vector<8x16xf32>
    %219 = arith.mulf %214, %218 : vector<8x16xf32>
    %220 = arith.truncf %219 : vector<8x16xf32> to vector<8x16xbf16>
    %cst_81 = arith.constant dense<0.000000e+00> : vector<8x8xf32>
    %221 = tpu.matmul %220, %206, %cst_81 {dimension_numbers = #tpu.dot_dimension_numbers<[1], [0], [0], [1], [0, 0, 1, 1], [], []>} : vector<8x16xbf16>, vector<16x8xbf16>, vector<8x8xf32> -> vector<8x8xf32>
    %222 = arith.truncf %221 : vector<8x8xf32> to vector<8x8xbf16>
    %223 = vector.extract_strided_slice %35 {offsets = [24, 0], sizes = [8, 32], strides = [1, 1]} : vector<32x32xbf16> to vector<8x32xbf16>
    %cst_82 = arith.constant dense<0.000000e+00> : vector<8x32xf32>
    %224 = tpu.matmul %222, %223, %cst_82 {dimension_numbers = #tpu.dot_dimension_numbers<[1], [0], [0], [1], [0, 0, 1, 1], [], []>} : vector<8x8xbf16>, vector<8x32xbf16>, vector<8x32xf32> -> vector<8x32xf32>
    %225 = arith.addf %203, %224 : vector<8x32xf32>
    %226 = tpu.concatenate %130, %225 in 0 : vector<8x32xf32>, vector<8x32xf32> -> vector<16x32xf32>
    %c0_83 = arith.constant 0 : index
    %c0_84 = arith.constant 0 : index
    %c0_85 = arith.constant 0 : index
    %227 = vector.load %arg14[%c0_83, %c0_84, %c0_85] : memref<1x1x32xf32, #tpu.memory_space<vmem>>, vector<1x1x32xf32>
    %228 = vector.shape_cast %227 : vector<1x1x32xf32> to vector<1x32xf32>
    %229 = vector.broadcast %228 : vector<1x32xf32> to vector<16x32xf32>
    %230 = arith.addf %226, %229 : vector<16x32xf32>
    %231 = arith.addf %3, %230 : vector<16x32xf32>
    %c0_86 = arith.constant 0 : index
    %c0_87 = arith.constant 0 : index
    %c0_88 = arith.constant 0 : index
    %232 = vector.load %arg15[%c0_86, %c0_87, %c0_88] : memref<1x1x32xf32, #tpu.memory_space<vmem>>, vector<1x1x32xf32>
    %233 = vector.shape_cast %232 : vector<1x1x32xf32> to vector<1x32xf32>
    %c0_89 = arith.constant 0 : index
    %c0_90 = arith.constant 0 : index
    %c0_91 = arith.constant 0 : index
    %234 = vector.load %arg16[%c0_89, %c0_90, %c0_91] : memref<1x1x32xf32, #tpu.memory_space<vmem>>, vector<1x1x32xf32>
    %235 = vector.shape_cast %234 : vector<1x1x32xf32> to vector<1x32xf32>
    %cst_92 = arith.constant dense<0.000000e+00> : vector<16xf32>
    %236 = vector.multi_reduction <add>, %231, %cst_92 [1] : vector<16x32xf32> to vector<16xf32>
    %237 = vector.shape_cast %236 : vector<16xf32> to vector<16x1xf32>
    %cst_93 = arith.constant 3.200000e+01 : f32
    %238 = vector.broadcast %cst_93 : f32 to vector<16x1xf32>
    %239 = arith.divf %237, %238 : vector<16x1xf32>
    %240 = vector.broadcast %239 : vector<16x1xf32> to vector<16x32xf32>
    %241 = arith.subf %231, %240 : vector<16x32xf32>
    %242 = arith.mulf %241, %241 : vector<16x32xf32>
    %cst_94 = arith.constant dense<0.000000e+00> : vector<16xf32>
    %243 = vector.multi_reduction <add>, %242, %cst_94 [1] : vector<16x32xf32> to vector<16xf32>
    %244 = vector.shape_cast %243 : vector<16xf32> to vector<16x1xf32>
    %cst_95 = arith.constant 3.200000e+01 : f32
    %245 = vector.broadcast %cst_95 : f32 to vector<16x1xf32>
    %246 = arith.divf %244, %245 : vector<16x1xf32>
    %247 = vector.broadcast %239 : vector<16x1xf32> to vector<16x32xf32>
    %248 = arith.subf %231, %247 : vector<16x32xf32>
    %cst_96 = arith.constant 9.99999974E-6 : f32
    %249 = vector.broadcast %cst_96 : f32 to vector<16x1xf32>
    %250 = arith.addf %246, %249 : vector<16x1xf32>
    %251 = math.rsqrt %250 : vector<16x1xf32>
    %252 = vector.broadcast %251 : vector<16x1xf32> to vector<16x32xf32>
    %253 = arith.mulf %248, %252 : vector<16x32xf32>
    %254 = vector.broadcast %233 : vector<1x32xf32> to vector<16x32xf32>
    %255 = arith.mulf %253, %254 : vector<16x32xf32>
    %256 = vector.broadcast %235 : vector<1x32xf32> to vector<16x32xf32>
    %257 = arith.addf %255, %256 : vector<16x32xf32>
    %258 = arith.truncf %257 : vector<16x32xf32> to vector<16x32xbf16>
    %c0_97 = arith.constant 0 : index
    %c0_98 = arith.constant 0 : index
    %c0_99 = arith.constant 0 : index
    %259 = vector.load %arg17[%c0_97, %c0_98, %c0_99] : memref<1x32x64xbf16, #tpu.memory_space<vmem>>, vector<1x32x64xbf16>
    %260 = vector.shape_cast %259 : vector<1x32x64xbf16> to vector<32x64xbf16>
    %cst_100 = arith.constant dense<0.000000e+00> : vector<16x64xf32>
    %261 = tpu.matmul %258, %260, %cst_100 {dimension_numbers = #tpu.dot_dimension_numbers<[1], [0], [0], [1], [0, 0, 1, 1], [], []>} : vector<16x32xbf16>, vector<32x64xbf16>, vector<16x64xf32> -> vector<16x64xf32>
    %c0_101 = arith.constant 0 : index
    %c0_102 = arith.constant 0 : index
    %c0_103 = arith.constant 0 : index
    %262 = vector.load %arg18[%c0_101, %c0_102, %c0_103] : memref<1x1x64xf32, #tpu.memory_space<vmem>>, vector<1x1x64xf32>
    %263 = vector.shape_cast %262 : vector<1x1x64xf32> to vector<1x64xf32>
    %264 = vector.broadcast %263 : vector<1x64xf32> to vector<16x64xf32>
    %265 = arith.addf %261, %264 : vector<16x64xf32>
    %cst_104 = arith.constant 5.000000e-01 : f32
    %266 = vector.broadcast %cst_104 : f32 to vector<16x64xf32>
    %267 = arith.mulf %266, %265 : vector<16x64xf32>
    %cst_105 = arith.constant 0.707106769 : f32
    %268 = vector.broadcast %cst_105 : f32 to vector<16x64xf32>
    %269 = arith.mulf %265, %268 : vector<16x64xf32>
    %270 = math.absf %269 : vector<16x64xf32>
    %cst_106 = arith.constant 0.327591091 : f32
    %271 = vector.broadcast %cst_106 : f32 to vector<16x64xf32>
    %272 = arith.mulf %271, %270 : vector<16x64xf32>
    %cst_107 = arith.constant 1.000000e+00 : f32
    %273 = vector.broadcast %cst_107 : f32 to vector<16x64xf32>
    %274 = arith.addf %273, %272 : vector<16x64xf32>
    %cst_108 = arith.constant 1.000000e+00 : f32
    %275 = vector.broadcast %cst_108 : f32 to vector<16x64xf32>
    %276 = arith.divf %275, %274 : vector<16x64xf32>
    %cst_109 = arith.constant 1.06140542 : f32
    %277 = vector.broadcast %cst_109 : f32 to vector<16x64xf32>
    %278 = arith.mulf %277, %276 : vector<16x64xf32>
    %cst_110 = arith.constant -1.45315206 : f32
    %279 = vector.broadcast %cst_110 : f32 to vector<16x64xf32>
    %280 = arith.addf %278, %279 : vector<16x64xf32>
    %281 = arith.mulf %280, %276 : vector<16x64xf32>
    %cst_111 = arith.constant 1.42141378 : f32
    %282 = vector.broadcast %cst_111 : f32 to vector<16x64xf32>
    %283 = arith.addf %281, %282 : vector<16x64xf32>
    %284 = arith.mulf %283, %276 : vector<16x64xf32>
    %cst_112 = arith.constant -0.284496725 : f32
    %285 = vector.broadcast %cst_112 : f32 to vector<16x64xf32>
    %286 = arith.addf %284, %285 : vector<16x64xf32>
    %287 = arith.mulf %286, %276 : vector<16x64xf32>
    %cst_113 = arith.constant 0.254829586 : f32
    %288 = vector.broadcast %cst_113 : f32 to vector<16x64xf32>
    %289 = arith.addf %287, %288 : vector<16x64xf32>
    %290 = arith.mulf %289, %276 : vector<16x64xf32>
    %cst_114 = arith.constant 0.000000e+00 : f32
    %291 = vector.broadcast %cst_114 : f32 to vector<16x64xf32>
    %292 = arith.subf %291, %270 : vector<16x64xf32>
    %293 = arith.mulf %292, %270 : vector<16x64xf32>
    %294 = math.exp %293 : vector<16x64xf32>
    %295 = arith.mulf %290, %294 : vector<16x64xf32>
    %cst_115 = arith.constant 1.000000e+00 : f32
    %296 = vector.broadcast %cst_115 : f32 to vector<16x64xf32>
    %297 = arith.subf %296, %295 : vector<16x64xf32>
    %cst_116 = arith.constant 0.000000e+00 : f32
    %298 = vector.broadcast %cst_116 : f32 to vector<16x64xf32>
    %299 = arith.cmpf olt, %269, %298 : vector<16x64xf32>
    %cst_117 = arith.constant 0.000000e+00 : f32
    %300 = vector.broadcast %cst_117 : f32 to vector<16x64xf32>
    %301 = arith.subf %300, %297 : vector<16x64xf32>
    %302 = arith.select %299, %301, %297 : vector<16x64xi1>, vector<16x64xf32>
    %cst_118 = arith.constant 1.000000e+00 : f32
    %303 = vector.broadcast %cst_118 : f32 to vector<16x64xf32>
    %304 = arith.addf %303, %302 : vector<16x64xf32>
    %305 = arith.mulf %267, %304 : vector<16x64xf32>
    %306 = arith.truncf %305 : vector<16x64xf32> to vector<16x64xbf16>
    %c0_119 = arith.constant 0 : index
    %c0_120 = arith.constant 0 : index
    %c0_121 = arith.constant 0 : index
    %307 = vector.load %arg19[%c0_119, %c0_120, %c0_121] : memref<1x64x32xbf16, #tpu.memory_space<vmem>>, vector<1x64x32xbf16>
    %308 = vector.shape_cast %307 : vector<1x64x32xbf16> to vector<64x32xbf16>
    %cst_122 = arith.constant dense<0.000000e+00> : vector<16x32xf32>
    %309 = tpu.matmul %306, %308, %cst_122 {dimension_numbers = #tpu.dot_dimension_numbers<[1], [0], [0], [1], [0, 0, 1, 1], [], []>} : vector<16x64xbf16>, vector<64x32xbf16>, vector<16x32xf32> -> vector<16x32xf32>
    %c0_123 = arith.constant 0 : index
    %c0_124 = arith.constant 0 : index
    %c0_125 = arith.constant 0 : index
    %310 = vector.load %arg20[%c0_123, %c0_124, %c0_125] : memref<1x1x32xf32, #tpu.memory_space<vmem>>, vector<1x1x32xf32>
    %311 = vector.shape_cast %310 : vector<1x1x32xf32> to vector<1x32xf32>
    %312 = vector.broadcast %311 : vector<1x32xf32> to vector<16x32xf32>
    %313 = arith.addf %309, %312 : vector<16x32xf32>
    %314 = arith.addf %257, %313 : vector<16x32xf32>
    %c0_126 = arith.constant 0 : index
    %c0_127 = arith.constant 0 : index
    %c0_128 = arith.constant 0 : index
    %315 = vector.load %arg21[%c0_126, %c0_127, %c0_128] : memref<1x1x32xf32, #tpu.memory_space<vmem>>, vector<1x1x32xf32>
    %316 = vector.shape_cast %315 : vector<1x1x32xf32> to vector<1x32xf32>
    %c0_129 = arith.constant 0 : index
    %c0_130 = arith.constant 0 : index
    %c0_131 = arith.constant 0 : index
    %317 = vector.load %arg22[%c0_129, %c0_130, %c0_131] : memref<1x1x32xf32, #tpu.memory_space<vmem>>, vector<1x1x32xf32>
    %318 = vector.shape_cast %317 : vector<1x1x32xf32> to vector<1x32xf32>
    %cst_132 = arith.constant dense<0.000000e+00> : vector<16xf32>
    %319 = vector.multi_reduction <add>, %314, %cst_132 [1] : vector<16x32xf32> to vector<16xf32>
    %320 = vector.shape_cast %319 : vector<16xf32> to vector<16x1xf32>
    %cst_133 = arith.constant 3.200000e+01 : f32
    %321 = vector.broadcast %cst_133 : f32 to vector<16x1xf32>
    %322 = arith.divf %320, %321 : vector<16x1xf32>
    %323 = vector.broadcast %322 : vector<16x1xf32> to vector<16x32xf32>
    %324 = arith.subf %314, %323 : vector<16x32xf32>
    %325 = arith.mulf %324, %324 : vector<16x32xf32>
    %cst_134 = arith.constant dense<0.000000e+00> : vector<16xf32>
    %326 = vector.multi_reduction <add>, %325, %cst_134 [1] : vector<16x32xf32> to vector<16xf32>
    %327 = vector.shape_cast %326 : vector<16xf32> to vector<16x1xf32>
    %cst_135 = arith.constant 3.200000e+01 : f32
    %328 = vector.broadcast %cst_135 : f32 to vector<16x1xf32>
    %329 = arith.divf %327, %328 : vector<16x1xf32>
    %330 = vector.broadcast %322 : vector<16x1xf32> to vector<16x32xf32>
    %331 = arith.subf %314, %330 : vector<16x32xf32>
    %cst_136 = arith.constant 9.99999974E-6 : f32
    %332 = vector.broadcast %cst_136 : f32 to vector<16x1xf32>
    %333 = arith.addf %329, %332 : vector<16x1xf32>
    %334 = math.rsqrt %333 : vector<16x1xf32>
    %335 = vector.broadcast %334 : vector<16x1xf32> to vector<16x32xf32>
    %336 = arith.mulf %331, %335 : vector<16x32xf32>
    %337 = vector.broadcast %316 : vector<1x32xf32> to vector<16x32xf32>
    %338 = arith.mulf %336, %337 : vector<16x32xf32>
    %339 = vector.broadcast %318 : vector<1x32xf32> to vector<16x32xf32>
    %340 = arith.addf %338, %339 : vector<16x32xf32>
    %c0_137 = arith.constant 0 : index
    %c0_138 = arith.constant 0 : index
    %341 = vector.load %arg28[%c0_137, %c0_138] : memref<16x32xf32, #tpu.memory_space<vmem>>, vector<16x32xf32>
    tpu.vector_store %arg28[%c0_137, %c0_138], %340 {strides = array<i32>} : memref<16x32xf32, #tpu.memory_space<vmem>>, vector<16x32xf32>,
    %c1_i32 = arith.constant 1 : i32
    %342 = arith.cmpi eq, %arg0, %c1_i32 : i32
    %343 = arith.extui %342 : i1 to i32
    %c0_i32_139 = arith.constant 0 : i32
    %344 = arith.cmpi ne, %343, %c0_i32_139 : i32
    scf.if %344 {
      %c0_140 = arith.constant 0 : index
      %c0_141 = arith.constant 0 : index
      %345 = vector.load %arg23[%c0_140, %c0_141] : memref<1x32xf32, #tpu.memory_space<vmem>>, vector<1x32xf32>
      %346 = vector.broadcast %345 : vector<1x32xf32> to vector<16x32xf32>
      %347 = arith.subf %340, %346 : vector<16x32xf32>
      %c0_142 = arith.constant 0 : index
      %c0_143 = arith.constant 0 : index
      %348 = vector.load %arg24[%c0_142, %c0_143] : memref<1x32xf32, #tpu.memory_space<vmem>>, vector<1x32xf32>
      %cst_144 = arith.constant 9.99999974E-6 : f32
      %349 = vector.broadcast %cst_144 : f32 to vector<1x32xf32>
      %350 = arith.addf %348, %349 : vector<1x32xf32>
      %351 = math.rsqrt %350 : vector<1x32xf32>
      %352 = vector.broadcast %351 : vector<1x32xf32> to vector<16x32xf32>
      %353 = arith.mulf %347, %352 : vector<16x32xf32>
      %c0_145 = arith.constant 0 : index
      %c0_146 = arith.constant 0 : index
      %354 = vector.load %arg25[%c0_145, %c0_146] : memref<1x32xf32, #tpu.memory_space<vmem>>, vector<1x32xf32>
      %355 = vector.broadcast %354 : vector<1x32xf32> to vector<16x32xf32>
      %356 = arith.mulf %353, %355 : vector<16x32xf32>
      %c0_147 = arith.constant 0 : index
      %c0_148 = arith.constant 0 : index
      %357 = vector.load %arg26[%c0_147, %c0_148] : memref<1x32xf32, #tpu.memory_space<vmem>>, vector<1x32xf32>
      %358 = vector.broadcast %357 : vector<1x32xf32> to vector<16x32xf32>
      %359 = arith.addf %356, %358 : vector<16x32xf32>
      %360 = arith.truncf %359 : vector<16x32xf32> to vector<16x32xbf16>
      %c0_149 = arith.constant 0 : index
      %c0_150 = arith.constant 0 : index
      %361 = vector.load %arg27[%c0_149, %c0_150] : memref<32x128xbf16, #tpu.memory_space<vmem>>, vector<32x128xbf16>
      %cst_151 = arith.constant dense<0.000000e+00> : vector<16x128xf32>
      %362 = tpu.matmul %360, %361, %cst_151 {dimension_numbers = #tpu.dot_dimension_numbers<[1], [0], [0], [1], [0, 0, 1, 1], [], []>} : vector<16x32xbf16>, vector<32x128xbf16>, vector<16x128xf32> -> vector<16x128xf32>
      %c0_152 = arith.constant 0 : index
      %c0_153 = arith.constant 0 : index
      %363 = vector.load %arg29[%c0_152, %c0_153] : memref<16x128xf32, #tpu.memory_space<vmem>>, vector<16x128xf32>
      tpu.vector_store %arg29[%c0_152, %c0_153], %362 {strides = array<i32>} : memref<16x128xf32, #tpu.memory_space<vmem>>, vector<16x128xf32>,
    } else {
    }
    return
  }
  func.func @transform_0(%arg0: i32) -> (i32, i32) {
    %c0_i32 = arith.constant 0 : i32
    %c0_i32_0 = arith.constant 0 : i32
    %c0_i32_1 = arith.constant 0 : i32
    return %c0_i32, %c0_i32_0 : i32, i32
  }
  func.func @transform_1(%arg0: i32) -> (i32, i32) {
    %c0_i32 = arith.constant 0 : i32
    %c0_i32_0 = arith.constant 0 : i32
    %c0_i32_1 = arith.constant 0 : i32
    return %c0_i32, %c0_i32_0 : i32, i32
  }
  func.func @transform_2(%arg0: i32) -> (i32, i32) {
    %c0_i32 = arith.constant 0 : i32
    %c0_i32_0 = arith.constant 0 : i32
    %c0_i32_1 = arith.constant 0 : i32
    return %c0_i32, %c0_i32_0 : i32, i32
  }
  func.func @transform_3(%arg0: i32) -> (i32, i32) {
    %c0_i32 = arith.constant 0 : i32
    %c0_i32_0 = arith.constant 0 : i32
    %c0_i32_1 = arith.constant 0 : i32
    return %c0_i32, %c0_i32_0 : i32, i32
  }
  func.func @transform_4(%arg0: i32) -> (i32, i32) {
    %c0_i32 = arith.constant 0 : i32
    %c0_i32_0 = arith.constant 0 : i32
    %c0_i32_1 = arith.constant 0 : i32
    return %c0_i32, %c0_i32_0 : i32, i32
  }
  func.func @transform_5(%arg0: i32) -> (i32, i32) {
    %c0_i32 = arith.constant 0 : i32
    %c0_i32_0 = arith.constant 0 : i32
    %c0_i32_1 = arith.constant 0 : i32
    return %c0_i32, %c0_i32_0 : i32, i32
  }
  func.func @transform_6(%arg0: i32) -> (i32, i32, i32) {
    %c0_i32 = arith.constant 0 : i32
    %c0_i32_0 = arith.constant 0 : i32
    %c0_i32_1 = arith.constant 0 : i32
    return %arg0, %c0_i32, %c0_i32_0 : i32, i32, i32
  }
  func.func @transform_7(%arg0: i32) -> (i32, i32, i32) {
    %c0_i32 = arith.constant 0 : i32
    %c0_i32_0 = arith.constant 0 : i32
    %c0_i32_1 = arith.constant 0 : i32
    return %arg0, %c0_i32, %c0_i32_0 : i32, i32, i32
  }
  func.func @transform_8(%arg0: i32) -> (i32, i32, i32) {
    %c0_i32 = arith.constant 0 : i32
    %c0_i32_0 = arith.constant 0 : i32
    %c0_i32_1 = arith.constant 0 : i32
    return %arg0, %c0_i32, %c0_i32_0 : i32, i32, i32
  }
  func.func @transform_9(%arg0: i32) -> (i32, i32, i32) {
    %c0_i32 = arith.constant 0 : i32
    %c0_i32_0 = arith.constant 0 : i32
    %c0_i32_1 = arith.constant 0 : i32
    return %arg0, %c0_i32, %c0_i32_0 : i32, i32, i32
  }
  func.func @transform_10(%arg0: i32) -> (i32, i32, i32) {
    %c0_i32 = arith.constant 0 : i32
    %c0_i32_0 = arith.constant 0 : i32
    %c0_i32_1 = arith.constant 0 : i32
    return %arg0, %c0_i32, %c0_i32_0 : i32, i32, i32
  }
  func.func @transform_11(%arg0: i32) -> (i32, i32, i32) {
    %c0_i32 = arith.constant 0 : i32
    %c0_i32_0 = arith.constant 0 : i32
    %c0_i32_1 = arith.constant 0 : i32
    return %arg0, %c0_i32, %c0_i32_0 : i32, i32, i32
  }
  func.func @transform_12(%arg0: i32) -> (i32, i32, i32) {
    %c0_i32 = arith.constant 0 : i32
    %c0_i32_0 = arith.constant 0 : i32
    %c0_i32_1 = arith.constant 0 : i32
    return %arg0, %c0_i32, %c0_i32_0 : i32, i32, i32
  }
  func.func @transform_13(%arg0: i32) -> (i32, i32, i32) {
    %c0_i32 = arith.constant 0 : i32
    %c0_i32_0 = arith.constant 0 : i32
    %c0_i32_1 = arith.constant 0 : i32
    return %arg0, %c0_i32, %c0_i32_0 : i32, i32, i32
  }
  func.func @transform_14(%arg0: i32) -> (i32, i32, i32) {
    %c0_i32 = arith.constant 0 : i32
    %c0_i32_0 = arith.constant 0 : i32
    %c0_i32_1 = arith.constant 0 : i32
    return %arg0, %c0_i32, %c0_i32_0 : i32, i32, i32
  }
  func.func @transform_15(%arg0: i32) -> (i32, i32, i32) {
    %c0_i32 = arith.constant 0 : i32
    %c0_i32_0 = arith.constant 0 : i32
    %c0_i32_1 = arith.constant 0 : i32
    return %arg0, %c0_i32, %c0_i32_0 : i32, i32, i32
  }
  func.func @transform_16(%arg0: i32) -> (i32, i32, i32) {
    %c0_i32 = arith.constant 0 : i32
    %c0_i32_0 = arith.constant 0 : i32
    %c0_i32_1 = arith.constant 0 : i32
    return %arg0, %c0_i32, %c0_i32_0 : i32, i32, i32
  }
  func.func @transform_17(%arg0: i32) -> (i32, i32, i32) {
    %c0_i32 = arith.constant 0 : i32
    %c0_i32_0 = arith.constant 0 : i32
    %c0_i32_1 = arith.constant 0 : i32
    return %arg0, %c0_i32, %c0_i32_0 : i32, i32, i32
  }
  func.func @transform_18(%arg0: i32) -> (i32, i32, i32) {
    %c0_i32 = arith.constant 0 : i32
    %c0_i32_0 = arith.constant 0 : i32
    %c0_i32_1 = arith.constant 0 : i32
    return %arg0, %c0_i32, %c0_i32_0 : i32, i32, i32
  }
  func.func @transform_19(%arg0: i32) -> (i32, i32, i32) {
    %c0_i32 = arith.constant 0 : i32
    %c0_i32_0 = arith.constant 0 : i32
    %c0_i32_1 = arith.constant 0 : i32
    return %arg0, %c0_i32, %c0_i32_0 : i32, i32, i32
  }
  func.func @transform_20(%arg0: i32) -> (i32, i32, i32) {
    %c0_i32 = arith.constant 0 : i32
    %c0_i32_0 = arith.constant 0 : i32
    %c0_i32_1 = arith.constant 0 : i32
    return %arg0, %c0_i32, %c0_i32_0 : i32, i32, i32
  }
  func.func @transform_21(%arg0: i32) -> (i32, i32, i32) {
    %c0_i32 = arith.constant 0 : i32
    %c0_i32_0 = arith.constant 0 : i32
    %c0_i32_1 = arith.constant 0 : i32
    return %arg0, %c0_i32, %c0_i32_0 : i32, i32, i32
  }
  func.func @transform_22(%arg0: i32) -> (i32, i32) {
    %c0_i32 = arith.constant 0 : i32
    %c0_i32_0 = arith.constant 0 : i32
    %c0_i32_1 = arith.constant 0 : i32
    return %c0_i32, %c0_i32_0 : i32, i32
  }
  func.func @transform_23(%arg0: i32) -> (i32, i32) {
    %c0_i32 = arith.constant 0 : i32
    %c0_i32_0 = arith.constant 0 : i32
    %c0_i32_1 = arith.constant 0 : i32
    return %c0_i32, %c0_i32_0 : i32, i32
  }
  func.func @transform_24(%arg0: i32) -> (i32, i32) {
    %c0_i32 = arith.constant 0 : i32
    %c0_i32_0 = arith.constant 0 : i32
    %c0_i32_1 = arith.constant 0 : i32
    return %c0_i32, %c0_i32_0 : i32, i32
  }
  func.func @transform_25(%arg0: i32) -> (i32, i32) {
    %c0_i32 = arith.constant 0 : i32
    %c0_i32_0 = arith.constant 0 : i32
    %c0_i32_1 = arith.constant 0 : i32
    return %c0_i32, %c0_i32_0 : i32, i32
  }
  func.func @transform_26(%arg0: i32) -> (i32, i32) {
    %c0_i32 = arith.constant 0 : i32
    %c0_i32_0 = arith.constant 0 : i32
    %c0_i32_1 = arith.constant 0 : i32
    return %c0_i32, %c0_i32_0 : i32, i32
  }
  func.func @transform_27(%arg0: i32) -> (i32, i32) {
    %c0_i32 = arith.constant 0 : i32
    %c0_i32_0 = arith.constant 0 : i32
    %c0_i32_1 = arith.constant 0 : i32
    return %c0_i32, %c0_i32_0 : i32, i32
  }
  func.func @transform_28(%arg0: i32) -> (i32, i32) {
    %c0_i32 = arith.constant 0 : i32
    %c0_i32_0 = arith.constant 0 : i32
    %c0_i32_1 = arith.constant 0 : i32
    return %c0_i32, %c0_i32_0 : i32, i32
  }
}

</mosaic_0001>

<bundles_post_ra>
// kernel: tpu_custom_call.1
= control target key start
LH: loop header
LB: loop body
LE: loop exit
PB: predicated region body
PF: predicated region fallthrough
CT: control target
= control target key end

     0   :  { %s5841_s0 = inlined_call_operand.hbm [shape: f32[16,32], index: 0, kind: input, shape index: {}]   ;;  %s5842_s1 = inlined_call_operand.vmem [shape: f32[32,32], index: 1, kind: input, shape index: {}]   ;;  %s5843_s2 = inlined_call_operand.hbm [shape: f32[16,32], index: 2, kind: input, shape index: {}]   ;;  %s5844_s3 = inlined_call_operand.vmem [shape: f32[32,32], index: 3, kind: input, shape index: {}]   ;;  %s5845_s4 = inlined_call_operand.hbm [shape: f32[1,32], index: 4, kind: input, shape index: {}]   ;;  %s5846_s5 = inlined_call_operand.hbm [shape: f32[1,32], index: 5, kind: input, shape index: {}]   ;;  %s5847_s6 = inlined_call_operand.vmem [shape: bf16[2,32,32], index: 6, kind: input, shape index: {}]   ;;  %s5848_s7 = inlined_call_operand.hbm [shape: f32[2,1,32], index: 7, kind: input, shape index: {}]   ;;  %s5849_s8 = inlined_call_operand.hbm [shape: bf16[2,32,32], index: 8, kind: input, shape index: {}]   ;;  %s5850_s9 = inlined_call_operand.hbm [shape: f32[2,1,32], index: 9, kind: input, shape index: {}]   ;;  %s5851_s10 = inlined_call_operand.hbm [shape: bf16[2,32,32], index: 10, kind: input, shape index: {}]   ;;  %s5852_s11 = inlined_call_operand.hbm [shape: f32[2,1,32], index: 11, kind: input, shape index: {}]   ;;  %s5853_s12 = inlined_call_operand.hbm [shape: bf16[2,32,32], index: 12, kind: input, shape index: {}]   ;;  %s5854_s13 = inlined_call_operand.hbm [shape: f32[2,1,32], index: 13, kind: input, shape index: {}]   ;;  %s5855_s14 = inlined_call_operand.hbm [shape: f32[2,1,32], index: 14, kind: input, shape index: {}]   ;;  %s5856_s15 = inlined_call_operand.hbm [shape: f32[2,1,32], index: 15, kind: input, shape index: {}]   ;;  %s5857_s16 = inlined_call_operand.hbm [shape: bf16[2,32,64], index: 16, kind: input, shape index: {}]   ;;  %s5858_s17 = inlined_call_operand.hbm [shape: f32[2,1,64], index: 17, kind: input, shape index: {}]   ;;  %s5859_s18 = inlined_call_operand.vmem [shape: bf16[2,64,32], index: 18, kind: input, shape index: {}]   ;;  %s5860_s19 = inlined_call_operand.vmem [shape: f32[2,1,32], index: 19, kind: input, shape index: {}]   ;;  %s5861_s20 = inlined_call_operand.vmem [shape: f32[2,1,32], index: 20, kind: input, shape index: {}]   ;;  %s5862_s21 = inlined_call_operand.vmem [shape: f32[2,1,32], index: 21, kind: input, shape index: {}]   ;;  %s5863_s22 = inlined_call_operand.vmem [shape: f32[1,32], index: 22, kind: input, shape index: {}]   ;;  %s5864_s23 = inlined_call_operand.vmem [shape: f32[1,32], index: 23, kind: input, shape index: {}]   ;;  %s5865_s24 = inlined_call_operand.vmem [shape: f32[1,32], index: 24, kind: input, shape index: {}]   ;;  %s5866_s25 = inlined_call_operand.vmem [shape: f32[1,32], index: 25, kind: input, shape index: {}]   ;;  %s5867_s26 = inlined_call_operand.hbm [shape: bf16[32,128], index: 26, kind: input, shape index: {}]   ;;  %s5868_s27 = inlined_call_operand.hbm [shape: f32[16,32], index: 27, kind: output, shape index: {0}]   ;;  %s5869_s28 = inlined_call_operand.hbm [shape: f32[16,128], index: 28, kind: output, shape index: {1}]  }
   0x1   :  { %5912 = sst [smem:[#allocation39_spill]] %s5841_s0 }
   0x2   :  { %5913 = sst [smem:[#allocation40_spill]] %s5842_s1 }
   0x3   :  { %5914 = sst [smem:[#allocation41_spill]] %s5843_s2 }
   0x4   :  { %5915 = sst [smem:[#allocation42_spill]] %s5844_s3 }
   0x5   :  { %5916 = sst [smem:[#allocation43_spill]] %s5845_s4 }
   0x6   :  { %5917 = sst [smem:[#allocation44_spill]] %s5846_s5 }
   0x7   :  { %5918 = sst [smem:[#allocation45_spill]] %s5847_s6 }
   0x8   :  { %5919 = sst [smem:[#allocation46_spill]] %s5848_s7 }
   0x9   :  { %5920 = sst [smem:[#allocation47_spill]] %s5849_s8 }
   0xa   :  { %5921 = sst [smem:[#allocation48_spill]] %s5850_s9 }
   0xb   :  { %5922 = sst [smem:[#allocation49_spill]] %s5851_s10 }
   0xc   :  { %5923 = sst [smem:[#allocation50_spill]] %s5852_s11 }
   0xd   :  { %5924 = sst [smem:[#allocation51_spill]] %s5853_s12 }
   0xe   :  { %5925 = sst [smem:[#allocation52_spill]] %s5854_s13 }
   0xf   :  { %5926 = sst [smem:[#allocation53_spill]] %s5855_s14 }
  0x10   :  { %5927 = sst [smem:[#allocation54_spill]] %s5858_s17 }
  0x11   :  { %5928 = sst [smem:[#allocation55_spill]] %s5859_s18 }
  0x12   :  { %5929 = sst [smem:[#allocation56_spill]] %s5860_s19 }
  0x13   :  { %5930 = sst [smem:[#allocation57_spill]] %s5861_s20 }
  0x14   :  { %5931 = sst [smem:[#allocation58_spill]] %s5862_s21 }
  0x15   :  { %5932 = sst [smem:[#allocation59_spill]] %s5863_s22 }
  0x16   :  { %5933 = sst [smem:[#allocation60_spill]] %s5864_s23 }
  0x17   :  { %5934 = sst [smem:[#allocation61_spill]] %s5865_s24 }
  0x18   :  { %5935 = sst [smem:[#allocation62_spill]] %s5866_s25 }
  0x19   :  { %5936 = sst [smem:[#allocation63_spill]] %s5868_s27 }
  0x1a   :  { %5937 = sst [smem:[#allocation64_spill]] %s5869_s28 }
  0x1b   :  { %34 = vsyncpa [#allocation3], 0 }
  0x1c   :  { %35 = vsyncpa [#allocation6], 0 }
  0x1d   :  { %36 = vsyncpa [#allocation9], 0 }
  0x1e   :  { %37 = vsyncpa [#allocation4], 0 }
  0x1f   :  { %38 = vsyncpa [#allocation24], 0  ;;  %s4989_s8 = smov 0   ;;  %s4991_s5 = smov 0  }
  0x20   :  { %s4993_s9 = smov 0   ;;  %s4995_s30 = smov 0  }
  0x21 LB: > { %5938 = sst [smem:[#allocation32_spill]] %s4803_s5  ;;  %s5008_s3 = sadd.s32 4294967295, %s4811_s30   ;;  %s4811_s30 = sphi %s4995_s30, %s6026_s30   ;;  %s4807_s9 = sphi %s4993_s9, %s6029_s9   ;;  %s4803_s5 = sphi %s4991_s5, %s6028_s5   ;;  %s4799_s8 = sphi %s4989_s8, %s6027_s8  }
  0x22   : > { %5939 = sst [smem:[#allocation33_spill]] %s4807_s9  ;;  %s5011_s6 = sadd.s32 1, %s4811_s30  }
  0x23   : > { %5940 = sst [smem:[#allocation34_spill]] %s5008_s3  ;;  %s200_s10 = ssub.s32 %s4811_s30, %s5011_s6 }
  0x24   : > { %5941 = sst [smem:[#allocation35_spill]] %s5011_s6  ;;  %s203_s0 = sadd.s32 1, %s4807_s9 }
  0x25   : > { %p201_p0 = scmp.eq.s32.totalorder %s200_s10, 0  ;;  %p210_p1 = scmp.ne.s32.totalorder %s4807_s9, %s4803_s5 }
  0x26   : > { %p211_p2 = scmp.eq.s32.totalorder %s4811_s30, 0  ;;  %p216_p3 = scmp.ne.s32.totalorder %s4803_s5, %s4799_s8 }
  0x27   : > { %s5021_s11 = scalar_select %p201_p0, %s4807_s9, %s203_s0  }
  0x28   : > { %p5023_p4 = por %p211_p2, %p210_p1  ;;  %p5878_p5 = scmp.eq.s32.totalorder %s5008_s3, 0 }
  0x29   : > { %5942 = sst [smem:[#allocation36_spill]] %s5021_s11  ;;  %p3651_p6 = scmp.ge.s32.totalorder %s4811_s30, 1 }
  0x2a   : > { %p738_p7 = scmp.lt.s32.totalorder %s4811_s30, 3  ;;  %p5032_p8 = por %p5878_p5, %p216_p3 }
  0x2b   : > { %s4813_s12 = smov [#allocation2]   ;;  %p4137_p13 = scmp.lt.s32.totalorder %s4811_s30, 2 }
  0x2c   : > { %s5944_s2 = scalar_select %p5032_p8, 1, 0 }
  0x2d   : > { %p5037_p10 = pnand %p3651_p6, %p738_p7  ;;  %s750_s1 = sshll.u32 %s4813_s12, 4  ;;  %s751_s1 = int_to_ptr.vmem [resolvable:$true] %s750_s1 }
  0x2e   : > { %5945 = sst [smem:[#allocation37_spill]] %s5944_s2  ;;  %s838_s8 = sand.u32 1, %s4811_s30  }
  0x2f   : > { %s5946_s7 = scalar_select %p5037_p10, 1, 0 }
  0x30   : > { %p4082_p11 = pneg %p5037_p10  ;;  %s5052_s10 = sand.u32 1, %s4807_s9  }
  0x31   : > { %5947 = sst [smem:[#allocation38_spill]] %s5946_s7  ;;  %p5056_p0 = pnand %p4137_p13, %p5023_p4 }
  0x32   : > { %p5045_p12 = pnand %p4082_p11, %p5878_p5  ;;  %s4278_s11 = scalar_lea.vmem %s751_s1, 256 }
  0x33   : > { %s5949_s0 = scalar_select %p5056_p0, 1, 0 }
  0x34   : > { %s5948_s4 = scalar_select %p5045_p12, 1, 0 }
  0x35   : > { %p5062_p1 = pneg %p5045_p12  ;;  %p4279_p2 = scmp.ne.s32.totalorder %s751_s1, %s4278_s11 }
  0x36   : > { %p4286_p7 = scmp.lt.s32.totalorder %s751_s1, %s751_s1  ;;  %p4287_p11 = scmp.lt.s32.totalorder %s4278_s11, %s4278_s11 }
  0x37   : > { %s5950_s12 = scalar_select %p5062_p1, 1, 0 }
  0x38   : > { %p4281_p3 = pnand %p4279_p2, %p5062_p1  ;;  %p4288_p9 = por %p4287_p11, %p4286_p7 }
  0x3a   : > { %p4282_p6 = pneg %p4281_p3 }
  0x3c   : > { %p4289_p5 = pnand %p4288_p9, %p4282_p6 }
  0x3e   : > { %4292 = shalt.err (!%p4289_p5)
}
  0x3f   : > { %s5884_s29 = smov 128   ;;  %s5885_s9 = smov 8  }
  0x40   : > { %s5951_s27 = sld [smem:[#allocation39_spill]]  ;;  %s5077_s25 = sshll.u32 %s4811_s30, 4 }
  0x41   : > { %s5952_s22 = sld [smem:[#allocation46_spill]]  ;;  %s841_s21 = scalar_lea.vmem [#allocation10], %s5052_s10 }
  0x42   : > { %s848_s20 = sshll.u32 %s841_s21, 4  ;;  %s5086_s19 = scalar_lea.sflag [#allocation3], %s838_s8  ;;  %s849_s20 = int_to_ptr.vmem [resolvable:$true] %s848_s20 }
  0x43   : > { %p5092_p5 = pneg %p5056_p0 }
  0x46   : > { %4085 = dma.hbm_to_vmem [thread:$0]  (!%p5045_p12), %s5951_s27, 256, %s751_s1, [#allocation3], %s5884_s29, %s5884_s29, %s5885_s9  }
  0x47   : > { %s5083_s23 = scalar_lea.hbm %s5952_s22, %s5077_s25  ;;  %s4298_s6 = scalar_lea.hbm %s5952_s22, 32 }
  0x48   : > { %s4293_s18 = scalar_lea.hbm %s5083_s23, 16  ;;  %p4299_p2 = scmp.lt.s32.totalorder %s5083_s23, %s5952_s22 }
  0x49   : > { %p4294_p4 = scmp.ne.s32.totalorder %s5083_s23, %s4293_s18  ;;  %p4300_p3 = scmp.lt.s32.totalorder %s4298_s6, %s4293_s18 }
  0x4a   : > { %s5953_s27 = scalar_select %p5092_p5, 1, 0 }
  0x4b   : > { %p4296_p9 = pnand %p5092_p5, %p4294_p4  ;;  %p4301_p6 = por %p4300_p3, %p4299_p2 }
  0x4d   : > { %p4297_p13 = pneg %p4296_p9 }
  0x4f   : > { %p4302_p7 = pnand %p4301_p6, %p4297_p13 }
  0x51   : > { %4305 = shalt.err (!%p4302_p7)
}
  0x52   : > { %s4306_s8 = scalar_lea.vmem %s849_s20, 16  ;;  %s4816_s11 = smov [#allocation10]  }
  0x53   : > { %p4307_p11 = scmp.ne.s32.totalorder %s849_s20, %s4306_s8  ;;  %s4311_s29 = sshll.u32 %s4816_s11, 4  ;;  %s4312_s29 = int_to_ptr.vmem [resolvable:$false] %s4311_s29 }
  0x54   : > { %s4313_s9 = scalar_lea.vmem %s4312_s29, 32  ;;  %p4314_p4 = scmp.lt.s32.totalorder %s849_s20, %s4312_s29 }
  0x55   : > { %p4309_p8 = pnand %p4307_p11, %p5092_p5  ;;  %p4315_p9 = scmp.lt.s32.totalorder %s4313_s9, %s4306_s8 }
  0x57   : > { %p4310_p10 = pneg %p4309_p8  ;;  %p4316_p12 = por %p4315_p9, %p4314_p4 }
  0x59   : > { %p4317_p1 = pnand %p4316_p12, %p4310_p10 }
  0x5b   : > { %4320 = shalt.err (!%p4317_p1)
}
  0x5c   : > { %4101 = dma.hbm_to_vmem [thread:$0]  (!%p5056_p0), %s5083_s23, 16, %s849_s20, %s5086_s19  }
  0x5d   : > { %s5112_s18 = sshll.u32 %s5052_s10, 4  ;;  %s5115_s24 = sshll.u32 %s4811_s30, 8 }
  0x5e   : > { %s5954_s9 = sld [smem:[#allocation47_spill]]  ;;  %s859_s21 = scalar_lea.vmem [#allocation11], %s5112_s18 }
  0x5f   : > { %s866_s8 = sshll.u32 %s859_s21, 4  ;;  %s5124_s8 = int_to_ptr.vmem [resolvable:$true] %s866_s8 }
  0x64   : > { %s5955_s6 = smov %s5954_s9  ;;  %s5121_s1 = scalar_lea.hbm %s5954_s9, %s5115_s24 }
  0x65   : > { %s4321_s11 = scalar_lea.hbm %s5121_s1, 256  ;;  %s4326_s30 = scalar_lea.hbm %s5955_s6, 512 }
  0x66   : > { %p4322_p8 = scmp.ne.s32.totalorder %s5121_s1, %s4321_s11  ;;  %p4327_p1 = scmp.lt.s32.totalorder %s5121_s1, %s5955_s6 }
  0x67   : > { %p4328_p13 = scmp.lt.s32.totalorder %s4326_s30, %s4321_s11 }
  0x68   : > { %p4324_p10 = pnand %p4322_p8, %p5092_p5 }
  0x69   : > { %p4329_p2 = por %p4328_p13, %p4327_p1 }
  0x6a   : > { %p4325_p12 = pneg %p4324_p10 }
  0x6c   : > { %p4330_p3 = pnand %p4329_p2, %p4325_p12 }
  0x6e   : > { %4333 = shalt.err (!%p4330_p3)
}
  0x6f   : > { %s4334_s29 = scalar_lea.vmem %s5124_s8, 256  ;;  %s4817_s9 = smov [#allocation11]  }
  0x70   : > { %p4335_p6 = scmp.ne.s32.totalorder %s5124_s8, %s4334_s29  ;;  %s4339_s21 = sshll.u32 %s4817_s9, 4  ;;  %s4340_s21 = int_to_ptr.vmem [resolvable:$false] %s4339_s21 }
  0x71   : > { %s4341_s20 = scalar_lea.vmem %s4340_s21, 512  ;;  %p4342_p4 = scmp.lt.s32.totalorder %s5124_s8, %s4340_s21 }
  0x72   : > { %p4337_p7 = pnand %p4335_p6, %p5092_p5  ;;  %p4343_p9 = scmp.lt.s32.totalorder %s4341_s20, %s4334_s29 }
  0x74   : > { %p4338_p11 = pneg %p4337_p7  ;;  %p4344_p8 = por %p4343_p9, %p4342_p4 }
  0x76   : > { %p4345_p10 = pnand %p4344_p8, %p4338_p11 }
  0x78   : > { %4348 = shalt.err (!%p4345_p10)
}
  0x79   : > { %s5902_s22 = smov 64   ;;  %s5904_s11 = smov 4  }
  0x7a   : > { %4104 = dma.hbm_to_vmem [thread:$0]  (!%p5056_p0), %s5121_s1, 256, %s5124_s8, %s5086_s19, %s5902_s22, %s5902_s22, %s5904_s11  }
  0x7b   : > { %s5956_s28 = sld [smem:[#allocation48_spill]]  ;;  %s879_s9 = scalar_lea.vmem [#allocation12], %s5052_s10 }
  0x7c   : > { %s886_s21 = sshll.u32 %s879_s9, 4  ;;  %s887_s21 = int_to_ptr.vmem [resolvable:$true] %s886_s21 }
  0x81   : > { %s884_s29 = scalar_lea.hbm %s5956_s28, %s5077_s25  ;;  %s4354_s5 = scalar_lea.hbm %s5956_s28, 32 }
  0x82   : > { %s4349_s20 = scalar_lea.hbm %s884_s29, 16  ;;  %p4355_p2 = scmp.lt.s32.totalorder %s884_s29, %s5956_s28 }
  0x83   : > { %p4350_p12 = scmp.ne.s32.totalorder %s884_s29, %s4349_s20  ;;  %p4356_p3 = scmp.lt.s32.totalorder %s4354_s5, %s4349_s20 }
  0x85   : > { %p4352_p1 = pnand %p4350_p12, %p5092_p5  ;;  %p4357_p6 = por %p4356_p3, %p4355_p2 }
  0x87   : > { %p4353_p13 = pneg %p4352_p1 }
  0x89   : > { %p4358_p7 = pnand %p4357_p6, %p4353_p13 }
  0x8b   : > { %4361 = shalt.err (!%p4358_p7)
}
  0x8c   : > { %s4362_s1 = scalar_lea.vmem %s887_s21, 16  ;;  %s4820_s8 = smov [#allocation12]  }
  0x8d   : > { %p4363_p11 = scmp.ne.s32.totalorder %s887_s21, %s4362_s1  ;;  %s4367_s23 = sshll.u32 %s4820_s8, 4  ;;  %s4368_s23 = int_to_ptr.vmem [resolvable:$false] %s4367_s23 }
  0x8e   : > { %s4369_s30 = scalar_lea.vmem %s4368_s23, 32  ;;  %p4370_p8 = scmp.lt.s32.totalorder %s887_s21, %s4368_s23 }
  0x8f   : > { %p4365_p4 = pnand %p4363_p11, %p5092_p5  ;;  %p4371_p10 = scmp.lt.s32.totalorder %s4369_s30, %s4362_s1 }
  0x91   : > { %p4366_p9 = pneg %p4365_p4  ;;  %p4372_p12 = por %p4371_p10, %p4370_p8 }
  0x93   : > { %p4373_p1 = pnand %p4372_p12, %p4366_p9 }
  0x95   : > { %4376 = shalt.err (!%p4373_p1)
}
  0x96   : > { %4107 = dma.hbm_to_vmem [thread:$0]  (!%p5056_p0), %s884_s29, 16, %s887_s21, %s5086_s19  }
  0x97   : > { %s5957_s2 = sld [smem:[#allocation49_spill]]  ;;  %s897_s6 = scalar_lea.vmem [#allocation13], %s5112_s18 }
  0x98   : > { %s904_s9 = sshll.u32 %s897_s6, 4  ;;  %s905_s9 = int_to_ptr.vmem [resolvable:$true] %s904_s9 }
  0x9d   : > { %s5172_s7 = scalar_lea.hbm %s5957_s2, %s5115_s24  ;;  %s4382_s29 = scalar_lea.hbm %s5957_s2, 512 }
  0x9e   : > { %s4377_s20 = scalar_lea.hbm %s5172_s7, 256  ;;  %p4383_p6 = scmp.lt.s32.totalorder %s5172_s7, %s5957_s2 }
  0x9f   : > { %p4378_p13 = scmp.ne.s32.totalorder %s5172_s7, %s4377_s20  ;;  %p4384_p7 = scmp.lt.s32.totalorder %s4382_s29, %s4377_s20 }
  0xa1   : > { %p4380_p2 = pnand %p4378_p13, %p5092_p5  ;;  %p4385_p11 = por %p4384_p7, %p4383_p6 }
  0xa3   : > { %p4381_p3 = pneg %p4380_p2 }
  0xa5   : > { %p4386_p4 = pnand %p4385_p11, %p4381_p3 }
  0xa7   : > { %4389 = shalt.err (!%p4386_p4)
}
  0xa8   : > { %s4390_s30 = scalar_lea.vmem %s905_s9, 256  ;;  %s4821_s5 = smov [#allocation13]  }
  0xa9   : > { %p4391_p9 = scmp.ne.s32.totalorder %s905_s9, %s4390_s30  ;;  %s4395_s3 = sshll.u32 %s4821_s5, 4  ;;  %s4396_s3 = int_to_ptr.vmem [resolvable:$false] %s4395_s3 }
  0xaa   : > { %s4397_s6 = scalar_lea.vmem %s4396_s3, 512  ;;  %p4398_p12 = scmp.lt.s32.totalorder %s905_s9, %s4396_s3 }
  0xab   : > { %p4393_p8 = pnand %p4391_p9, %p5092_p5  ;;  %p4399_p1 = scmp.lt.s32.totalorder %s4397_s6, %s4390_s30 }
  0xad   : > { %p4394_p10 = pneg %p4393_p8  ;;  %p4400_p13 = por %p4399_p1, %p4398_p12 }
  0xaf   : > { %p4401_p2 = pnand %p4400_p13, %p4394_p10 }
  0xb1   : > { %4404 = shalt.err (!%p4401_p2)
}
  0xb2   : > { %4110 = dma.hbm_to_vmem [thread:$0]  (!%p5056_p0), %s5172_s7, 256, %s905_s9, %s5086_s19, %s5902_s22, %s5902_s22, %s5904_s11  }
  0xb3   : > { %s5958_s8 = sld [smem:[#allocation50_spill]]  ;;  %s917_s23 = scalar_lea.vmem [#allocation14], %s5052_s10 }
  0xb4   : > { %s924_s30 = sshll.u32 %s917_s23, 4  ;;  %s925_s30 = int_to_ptr.vmem [resolvable:$true] %s924_s30 }
  0xb9   : > { %s5959_s29 = smov %s5958_s8  ;;  %s922_s21 = scalar_lea.hbm %s5958_s8, %s5077_s25 }
  0xba   : > { %s4405_s5 = scalar_lea.hbm %s922_s21, 16  ;;  %s4410_s2 = scalar_lea.hbm %s5959_s29, 32 }
  0xbb   : > { %p4406_p3 = scmp.ne.s32.totalorder %s922_s21, %s4405_s5  ;;  %p4411_p11 = scmp.lt.s32.totalorder %s922_s21, %s5959_s29 }
  0xbc   : > { %p4412_p4 = scmp.lt.s32.totalorder %s4410_s2, %s4405_s5 }
  0xbd   : > { %p4408_p6 = pnand %p4406_p3, %p5092_p5 }
  0xbe   : > { %p4413_p9 = por %p4412_p4, %p4411_p11 }
  0xbf   : > { %p4409_p7 = pneg %p4408_p6 }
  0xc1   : > { %p4414_p8 = pnand %p4413_p9, %p4409_p7 }
  0xc3   : > { %4417 = shalt.err (!%p4414_p8)
}
  0xc4   : > { %s4418_s7 = scalar_lea.vmem %s925_s30, 16  ;;  %s4822_s9 = smov [#allocation14]  }
  0xc5   : > { %p4419_p10 = scmp.ne.s32.totalorder %s925_s30, %s4418_s7  ;;  %s4423_s20 = sshll.u32 %s4822_s9, 4  ;;  %s4424_s20 = int_to_ptr.vmem [resolvable:$false] %s4423_s20 }
  0xc6   : > { %s4425_s1 = scalar_lea.vmem %s4424_s20, 32  ;;  %p4426_p13 = scmp.lt.s32.totalorder %s925_s30, %s4424_s20 }
  0xc7   : > { %p4421_p12 = pnand %p4419_p10, %p5092_p5  ;;  %p4427_p2 = scmp.lt.s32.totalorder %s4425_s1, %s4418_s7 }
  0xc9   : > { %p4422_p1 = pneg %p4421_p12  ;;  %p4428_p3 = por %p4427_p2, %p4426_p13 }
  0xcb   : > { %p4429_p6 = pnand %p4428_p3, %p4422_p1 }
  0xcd   : > { %4432 = shalt.err (!%p4429_p6)
}
  0xce   : > { %4113 = dma.hbm_to_vmem [thread:$0]  (!%p5056_p0), %s922_s21, 16, %s925_s30, %s5086_s19  }
  0xcf   : > { %s5960_s2 = sld [smem:[#allocation51_spill]]  ;;  %s935_s23 = scalar_lea.vmem [#allocation15], %s5112_s18 }
  0xd0   : > { %s942_s5 = sshll.u32 %s935_s23, 4  ;;  %s943_s5 = int_to_ptr.vmem [resolvable:$true] %s942_s5 }
  0xd5   : > { %s5217_s8 = scalar_lea.hbm %s5960_s2, %s5115_s24  ;;  %s4438_s21 = scalar_lea.hbm %s5960_s2, 512 }
  0xd6   : > { %s4433_s3 = scalar_lea.hbm %s5217_s8, 256  ;;  %p4439_p9 = scmp.lt.s32.totalorder %s5217_s8, %s5960_s2 }
  0xd7   : > { %p4434_p7 = scmp.ne.s32.totalorder %s5217_s8, %s4433_s3  ;;  %p4440_p8 = scmp.lt.s32.totalorder %s4438_s21, %s4433_s3 }
  0xd9   : > { %p4436_p11 = pnand %p4434_p7, %p5092_p5  ;;  %p4441_p10 = por %p4440_p8, %p4439_p9 }
  0xdb   : > { %p4437_p4 = pneg %p4436_p11 }
  0xdd   : > { %p4442_p12 = pnand %p4441_p10, %p4437_p4 }
  0xdf   : > { %4445 = shalt.err (!%p4442_p12)
}
  0xe0   : > { %s4446_s20 = scalar_lea.vmem %s943_s5, 256  ;;  %s4823_s1 = smov [#allocation15]  }
  0xe1   : > { %p4447_p1 = scmp.ne.s32.totalorder %s943_s5, %s4446_s20  ;;  %s4451_s17 = sshll.u32 %s4823_s1, 4  ;;  %s4452_s17 = int_to_ptr.vmem [resolvable:$false] %s4451_s17 }
  0xe2   : > { %s4453_s28 = scalar_lea.vmem %s4452_s17, 512  ;;  %p4454_p3 = scmp.lt.s32.totalorder %s943_s5, %s4452_s17 }
  0xe3   : > { %p4449_p13 = pnand %p4447_p1, %p5092_p5  ;;  %p4455_p6 = scmp.lt.s32.totalorder %s4453_s28, %s4446_s20 }
  0xe5   : > { %p4450_p2 = pneg %p4449_p13  ;;  %p4456_p7 = por %p4455_p6, %p4454_p3 }
  0xe7   : > { %p4457_p11 = pnand %p4456_p7, %p4450_p2 }
  0xe9   : > { %4460 = shalt.err (!%p4457_p11)
}
  0xea   : > { %4116 = dma.hbm_to_vmem [thread:$0]  (!%p5056_p0), %s5217_s8, 256, %s943_s5, %s5086_s19, %s5902_s22, %s5902_s22, %s5904_s11  }
  0xeb   : > { %s5961_s13 = sld [smem:[#allocation52_spill]]  ;;  %s955_s7 = scalar_lea.vmem [#allocation16], %s5052_s10 }
  0xec   : > { %s962_s21 = sshll.u32 %s955_s7, 4  ;;  %s963_s21 = int_to_ptr.vmem [resolvable:$true] %s962_s21 }
  0xf1   : > { %s960_s6 = scalar_lea.hbm %s5961_s13, %s5077_s25  ;;  %s4466_s1 = scalar_lea.hbm %s5961_s13, 32 }
  0xf2   : > { %s4461_s30 = scalar_lea.hbm %s960_s6, 16  ;;  %p4467_p10 = scmp.lt.s32.totalorder %s960_s6, %s5961_s13 }
  0xf3   : > { %p4462_p4 = scmp.ne.s32.totalorder %s960_s6, %s4461_s30  ;;  %p4468_p12 = scmp.lt.s32.totalorder %s4466_s1, %s4461_s30 }
  0xf5   : > { %p4464_p9 = pnand %p4462_p4, %p5092_p5  ;;  %p4469_p1 = por %p4468_p12, %p4467_p10 }
  0xf7   : > { %p4465_p8 = pneg %p4464_p9 }
  0xf9   : > { %p4470_p13 = pnand %p4469_p1, %p4465_p8 }
  0xfb   : > { %4473 = shalt.err (!%p4470_p13)
}
  0xfc   : > { %s4474_s8 = scalar_lea.vmem %s963_s21, 16  ;;  %s4824_s5 = smov [#allocation16]  }
  0xfd   : > { %p4475_p2 = scmp.ne.s32.totalorder %s963_s21, %s4474_s8  ;;  %s4479_s23 = sshll.u32 %s4824_s5, 4  ;;  %s4480_s23 = int_to_ptr.vmem [resolvable:$false] %s4479_s23 }
  0xfe   : > { %s4481_s3 = scalar_lea.vmem %s4480_s23, 32  ;;  %p4482_p7 = scmp.lt.s32.totalorder %s963_s21, %s4480_s23 }
  0xff   : > { %p4477_p3 = pnand %p4475_p2, %p5092_p5  ;;  %p4483_p11 = scmp.lt.s32.totalorder %s4481_s3, %s4474_s8 }
 0x101   : > { %p4478_p6 = pneg %p4477_p3  ;;  %p4484_p4 = por %p4483_p11, %p4482_p7 }
 0x103   : > { %p4485_p9 = pnand %p4484_p4, %p4478_p6 }
 0x105   : > { %4488 = shalt.err (!%p4485_p9)
}
 0x106   : > { %4119 = dma.hbm_to_vmem [thread:$0]  (!%p5056_p0), %s960_s6, 16, %s963_s21, %s5086_s19  }
 0x107   : > { %s5962_s14 = sld [smem:[#allocation53_spill]]  ;;  %s972_s20 = scalar_lea.vmem [#allocation17], %s5052_s10 }
 0x108   : > { %s979_s1 = sshll.u32 %s972_s20, 4  ;;  %s980_s1 = int_to_ptr.vmem [resolvable:$true] %s979_s1 }
 0x10d   : > { %s977_s9 = scalar_lea.hbm %s5962_s14, %s5077_s25  ;;  %s4494_s5 = scalar_lea.hbm %s5962_s14, 32 }
 0x10e   : > { %s4489_s17 = scalar_lea.hbm %s977_s9, 16  ;;  %p4495_p1 = scmp.lt.s32.totalorder %s977_s9, %s5962_s14 }
 0x10f   : > { %p4490_p8 = scmp.ne.s32.totalorder %s977_s9, %s4489_s17  ;;  %p4496_p13 = scmp.lt.s32.totalorder %s4494_s5, %s4489_s17 }
 0x111   : > { %p4492_p10 = pnand %p4490_p8, %p5092_p5  ;;  %p4497_p2 = por %p4496_p13, %p4495_p1 }
 0x113   : > { %p4493_p12 = pneg %p4492_p10 }
 0x115   : > { %p4498_p3 = pnand %p4497_p2, %p4493_p12 }
 0x117   : > { %4501 = shalt.err (!%p4498_p3)
}
 0x118   : > { %s4502_s6 = scalar_lea.vmem %s980_s1, 16  ;;  %s4825_s21 = smov [#allocation17]  }
 0x119   : > { %p4503_p6 = scmp.ne.s32.totalorder %s980_s1, %s4502_s6  ;;  %s4507_s7 = sshll.u32 %s4825_s21, 4  ;;  %s4508_s7 = int_to_ptr.vmem [resolvable:$false] %s4507_s7 }
 0x11a   : > { %s4509_s30 = scalar_lea.vmem %s4508_s7, 32  ;;  %p4510_p4 = scmp.lt.s32.totalorder %s980_s1, %s4508_s7 }
 0x11b   : > { %p4505_p7 = pnand %p4503_p6, %p5092_p5  ;;  %p4511_p9 = scmp.lt.s32.totalorder %s4509_s30, %s4502_s6 }
 0x11d   : > { %p4506_p11 = pneg %p4505_p7  ;;  %p4512_p8 = por %p4511_p9, %p4510_p4 }
 0x11f   : > { %p4513_p10 = pnand %p4512_p8, %p4506_p11 }
 0x121   : > { %4516 = shalt.err (!%p4513_p10)
}
 0x122   : > { %4122 = dma.hbm_to_vmem [thread:$0]  (!%p5056_p0), %s977_s9, 16, %s980_s1, %s5086_s19  }
 0x123   : > { %s4826_s20 = smov [#allocation5]   ;;  %s5280_s5 = scalar_lea.hbm %s5856_s15, %s5077_s25 }
 0x124   : > { %s766_s17 = sshll.u32 %s4826_s20, 4  ;;  %p5963_p1 = scmp.ne.s32.totalorder %s5950_s12, 0  ;;  %s767_s17 = int_to_ptr.vmem [resolvable:$true] %s766_s17 }
 0x125   : > { %s4528_s23 = scalar_lea.vmem %s767_s17, 256  ;;  %p4536_p3 = scmp.lt.s32.totalorder %s767_s17, %s767_s17 }
 0x126   : > { %p4529_p12 = scmp.ne.s32.totalorder %s767_s17, %s4528_s23  ;;  %p4537_p6 = scmp.lt.s32.totalorder %s4528_s23, %s4528_s23 }
 0x128   : > { %p4531_p13 = pnand %p4529_p12, %p5963_p1  ;;  %p4538_p7 = por %p4537_p6, %p4536_p3 }
 0x12a   : > { %p4532_p2 = pneg %p4531_p13 }
 0x12c   : > { %p4539_p11 = pnand %p4538_p7, %p4532_p2 }
 0x12e   : > { %4542 = shalt.err (!%p4539_p11)
}
 0x12f   : > { %p5964_p4 = scmp.ne.s32.totalorder %s5948_s4, 0  ;;  %s5965_s9 = smov 8  }
 0x130   : > { %s5966_s1 = smov 128   ;;  %s5967_s21 = sld [smem:[#allocation41_spill]] }
 0x131   : > { %s989_s7 = scalar_lea.vmem [#allocation18], %s5052_s10  ;;  %s4827_s20 = smov [#allocation7]  }
 0x132   : > { %s996_s30 = sshll.u32 %s989_s7, 4  ;;  %s783_s28 = sshll.u32 %s4827_s20, 4  ;;  %s997_s30 = int_to_ptr.vmem [resolvable:$true] %s996_s30  ;;  %s784_s28 = int_to_ptr.vmem [resolvable:$true] %s783_s28 }
 0x133   : > { %s4543_s8 = scalar_lea.hbm %s5280_s5, 16  ;;  %s4548_s3 = scalar_lea.hbm %s5856_s15, 32 }
 0x134   : > { %p4544_p9 = scmp.ne.s32.totalorder %s5280_s5, %s4543_s8  ;;  %p4549_p12 = scmp.lt.s32.totalorder %s5280_s5, %s5856_s15 }
 0x135   : > { %p4550_p13 = scmp.lt.s32.totalorder %s4548_s3, %s4543_s8 }
 0x136   : > { %4088 = dma.hbm_to_vmem [thread:$0]  (!%p5964_p4), %s5967_s21, 256, %s767_s17, [#allocation6], %s5966_s1, %s5966_s1, %s5965_s9  }
 0x137   : > { %p4546_p8 = pnand %p4544_p9, %p5092_p5  ;;  %p4551_p2 = por %p4550_p13, %p4549_p12 }
 0x139   : > { %p4547_p10 = pneg %p4546_p8 }
 0x13b   : > { %p4552_p3 = pnand %p4551_p2, %p4547_p10 }
 0x13d   : > { %4555 = shalt.err (!%p4552_p3)
}
 0x13e   : > { %s4556_s17 = scalar_lea.vmem %s997_s30, 16  ;;  %s4828_s9 = smov [#allocation18]  }
 0x13f   : > { %p4557_p6 = scmp.ne.s32.totalorder %s997_s30, %s4556_s17  ;;  %s4561_s1 = sshll.u32 %s4828_s9, 4  ;;  %s4562_s1 = int_to_ptr.vmem [resolvable:$false] %s4561_s1 }
 0x140   : > { %s4563_s21 = scalar_lea.vmem %s4562_s1, 32  ;;  %p4564_p9 = scmp.lt.s32.totalorder %s997_s30, %s4562_s1 }
 0x141   : > { %p4559_p7 = pnand %p4557_p6, %p5092_p5  ;;  %p4565_p8 = scmp.lt.s32.totalorder %s4563_s21, %s4556_s17 }
 0x143   : > { %p4560_p11 = pneg %p4559_p7  ;;  %p4566_p4 = por %p4565_p8, %p4564_p9 }
 0x145   : > { %p4567_p1 = pnand %p4566_p4, %p4560_p11 }
 0x147   : > { %4570 = shalt.err (!%p4567_p1)
}
 0x148   : > { %4125 = dma.hbm_to_vmem [thread:$0]  (!%p5056_p0), %s5280_s5, 16, %s997_s30, %s5086_s19  }
 0x149   : > { %s4582_s22 = scalar_lea.vmem %s784_s28, 16  ;;  %p5968_p12 = scmp.ne.s32.totalorder %s5950_s12, 0 }
 0x14a   : > { %p4583_p10 = scmp.ne.s32.totalorder %s784_s28, %s4582_s22  ;;  %s4589_s11 = scalar_lea.vmem %s784_s28, 32 }
 0x14b   : > { %p4590_p3 = scmp.lt.s32.totalorder %s784_s28, %s784_s28  ;;  %p4591_p6 = scmp.lt.s32.totalorder %s4589_s11, %s4582_s22 }
 0x14c   : > { %p4585_p13 = pnand %p4583_p10, %p5968_p12 }
 0x14d   : > { %p4592_p7 = por %p4591_p6, %p4590_p3 }
 0x14e   : > { %p4586_p2 = pneg %p4585_p13 }
 0x150   : > { %p4593_p5 = pnand %p4592_p7, %p4586_p2 }
 0x152   : > { %4596 = shalt.err (!%p4593_p5)
}
 0x153   : > { %p5969_p1 = scmp.ne.s32.totalorder %s5948_s4, 0  ;;  %s5970_s8 = sld [smem:[#allocation43_spill]] }
 0x154   : > { %s5321_s23 = scalar_lea.hbm %s5857_s16, %s5115_s24  ;;  %s1007_s3 = scalar_lea.vmem [#allocation19], %s5112_s18 }
 0x155   : > { %s1014_s6 = sshll.u32 %s1007_s3, 4  ;;  %s4597_s17 = scalar_lea.hbm %s5321_s23, 256  ;;  %s1015_s6 = int_to_ptr.vmem [resolvable:$true] %s1014_s6 }
 0x156   : > { %p4598_p5 = scmp.ne.s32.totalorder %s5321_s23, %s4597_s17  ;;  %p5971_p4 = scmp.ne.s32.totalorder %s5953_s27, 0 }
 0x157   : > { %p4603_p8 = scmp.lt.s32.totalorder %s5321_s23, %s5857_s16 }
 0x158   : > { %p4600_p11 = pnand %p4598_p5, %p5971_p4 }
 0x159   : > { %4091 = dma.hbm_to_vmem [thread:$0]  (!%p5969_p1), %s5970_s8, 16, %s784_s28, [#allocation6]  }
 0x15a   : > { %p4601_p9 = pneg %p4600_p11  ;;  %s4602_s28 = scalar_lea.hbm %s5857_s16, 512 }
 0x15b   : > { %p4604_p10 = scmp.lt.s32.totalorder %s4602_s28, %s4597_s17 }
 0x15d   : > { %p4605_p13 = por %p4604_p10, %p4603_p8 }
 0x15f   : > { %p4606_p2 = pnand %p4605_p13, %p4601_p9 }
 0x161   : > { %4609 = shalt.err (!%p4606_p2)
}
 0x162   : > { %s4610_s18 = scalar_lea.vmem %s1015_s6, 256  ;;  %s4829_s24 = smov [#allocation19]  }
 0x163   : > { %p4611_p3 = scmp.ne.s32.totalorder %s1015_s6, %s4610_s18  ;;  %s4615_s11 = sshll.u32 %s4829_s24, 4  ;;  %s4616_s11 = int_to_ptr.vmem [resolvable:$false] %s4615_s11 }
 0x164   : > { %s4617_s7 = scalar_lea.vmem %s4616_s11, 512  ;;  %p4618_p5 = scmp.lt.s32.totalorder %s1015_s6, %s4616_s11 }
 0x165   : > { %p4613_p6 = pnand %p4611_p3, %p5971_p4  ;;  %p4619_p11 = scmp.lt.s32.totalorder %s4617_s7, %s4610_s18 }
 0x167   : > { %p4614_p7 = pneg %p4613_p6  ;;  %p4620_p1 = por %p4619_p11, %p4618_p5 }
 0x169   : > { %p4621_p12 = pnand %p4620_p1, %p4614_p7 }
 0x16b   : > { %4624 = shalt.err (!%p4621_p12)
}
 0x16c   : > { %s5972_s20 = smov 4   ;;  %s5973_s8 = smov 64  }
 0x16d   : > { %4128 = dma.hbm_to_vmem [thread:$0]  (!%p5056_p0), %s5321_s23, 256, %s1015_s6, %s5086_s19, %s5973_s8, %s5973_s8, %s5972_s20  }
 0x16e   : > { %s4830_s5 = smov [#allocation8]   ;;  %s4831_s3 = smov [#allocation21]  }
 0x16f   : > { %s794_s30 = sshll.u32 %s4830_s5, 4  ;;  %s816_s17 = sshll.u32 %s4831_s3, 4  ;;  %s795_s30 = int_to_ptr.vmem [resolvable:$true] %s794_s30  ;;  %s817_s17 = int_to_ptr.vmem [resolvable:$true] %s816_s17 }
 0x170   : > { %s4636_s9 = scalar_lea.vmem %s795_s30, 16  ;;  %p5974_p8 = scmp.ne.s32.totalorder %s5950_s12, 0 }
 0x171   : > { %p4637_p9 = scmp.ne.s32.totalorder %s795_s30, %s4636_s9  ;;  %s4643_s1 = scalar_lea.vmem %s795_s30, 32 }
 0x172   : > { %p4644_p12 = scmp.lt.s32.totalorder %s795_s30, %s795_s30  ;;  %p4645_p13 = scmp.lt.s32.totalorder %s4643_s1, %s4636_s9 }
 0x173   : > { %p4639_p10 = pnand %p4637_p9, %p5974_p8 }
 0x174   : > { %p4646_p2 = por %p4645_p13, %p4644_p12 }
 0x175   : > { %p4640_p1 = pneg %p4639_p10 }
 0x177   : > { %p4647_p3 = pnand %p4646_p2, %p4640_p1 }
 0x179   : > { %4650 = shalt.err (!%p4647_p3)
}
 0x17a   : > { %p5975_p6 = scmp.ne.s32.totalorder %s5948_s4, 0  ;;  %s5976_s6 = sld [smem:[#allocation44_spill]] }
 0x17b   : > { %s4662_s21 = scalar_lea.vmem %s817_s17, 256  ;;  %p4670_p9 = scmp.lt.s32.totalorder %s817_s17, %s817_s17 }
 0x17c   : > { %p4663_p7 = scmp.ne.s32.totalorder %s817_s17, %s4662_s21  ;;  %p4671_p10 = scmp.lt.s32.totalorder %s4662_s21, %s4662_s21 }
 0x17e   : > { %p4665_p5 = pnand %p4663_p7, %p5974_p8  ;;  %p4672_p0 = por %p4671_p10, %p4670_p9 }
 0x180   : > { %4094 = dma.hbm_to_vmem [thread:$0]  (!%p5975_p6), %s5976_s6, 16, %s795_s30, [#allocation9]  }
 0x181   : > { %p4666_p11 = pneg %p4665_p5 }
 0x183   : > { %p4673_p4 = pnand %p4672_p0, %p4666_p11 }
 0x185   : > { %4676 = shalt.err (!%p4673_p4)
}
 0x186   : > { %4097 = dma.hbm_to_vmem [thread:$0]  (!%p5975_p6), %s5867_s26, 256, %s817_s17, [#allocation6], %s5973_s8, %s5973_s8, %s5972_s20  }
 0x187   : > { %s5977_s11 = sld [smem:[#allocation54_spill]]  ;;  %s1027_s5 = scalar_lea.vmem [#allocation20], %s5052_s10 }
 0x188   : > { %s1034_s30 = sshll.u32 %s1027_s5, 4  ;;  %p5978_p4 = scmp.ne.s32.totalorder %s5953_s27, 0  ;;  %s1035_s30 = int_to_ptr.vmem [resolvable:$true] %s1034_s30 }
 0x18d   : > { %s1032_s7 = scalar_lea.hbm %s5977_s11, %s5077_s25  ;;  %s4682_s1 = scalar_lea.hbm %s5977_s11, 32 }
 0x18e   : > { %s4677_s3 = scalar_lea.hbm %s1032_s7, 16  ;;  %p4683_p12 = scmp.lt.s32.totalorder %s1032_s7, %s5977_s11 }
 0x18f   : > { %p4678_p0 = scmp.ne.s32.totalorder %s1032_s7, %s4677_s3  ;;  %p4684_p13 = scmp.lt.s32.totalorder %s4682_s1, %s4677_s3 }
 0x191   : > { %p4680_p8 = pnand %p4678_p0, %p5978_p4  ;;  %p4685_p2 = por %p4684_p13, %p4683_p12 }
 0x193   : > { %p4681_p1 = pneg %p4680_p8 }
 0x195   : > { %p4686_p3 = pnand %p4685_p2, %p4681_p1 }
 0x197   : > { %4689 = shalt.err (!%p4686_p3)
}
 0x198   : > { %s4690_s25 = scalar_lea.vmem %s1035_s30, 16  ;;  %s4832_s10 = smov [#allocation20]  }
 0x199   : > { %p4691_p6 = scmp.ne.s32.totalorder %s1035_s30, %s4690_s25  ;;  %s4695_s20 = sshll.u32 %s4832_s10, 4  ;;  %s4696_s20 = int_to_ptr.vmem [resolvable:$false] %s4695_s20 }
 0x19a   : > { %s4697_s8 = scalar_lea.vmem %s4696_s20, 32  ;;  %p4698_p11 = scmp.lt.s32.totalorder %s1035_s30, %s4696_s20 }
 0x19b   : > { %p4693_p7 = pnand %p4691_p6, %p5978_p4  ;;  %p4699_p9 = scmp.lt.s32.totalorder %s4697_s8, %s4690_s25 }
 0x19d   : > { %p4694_p5 = pneg %p4693_p7  ;;  %p4700_p10 = por %p4699_p9, %p4698_p11 }
 0x19f   : > { %p4701_p0 = pnand %p4700_p10, %p4694_p5 }
 0x1a1   : > { %4704 = shalt.err (!%p4701_p0)
}
 0x1a2   : > { %p5979_p8 = scmp.ne.s32.totalorder %s5949_s0, 0  ;;  %s5980_s17 = sld [smem:[#allocation38_spill]] }
 0x1a4   : > { %4131 = dma.hbm_to_vmem [thread:$0]  (!%p5979_p8), %s1032_s7, 16, %s1035_s30, %s5086_s19  }
 0x1a8   : > { %p5981_p1 = scmp.ne.s32.totalorder %s5980_s17, 0 }
 0x1a9   : > { %s5982_s6 = sld [smem:[#allocation34_spill]] (!%p5981_p1) }
 0x1aa   : > { %1069 = sbr.rel (%p5981_p1) target bundleno = 6350 (0x18ce), region = 128 }
 0x1af   : > { %p5983_p12 = scmp.eq.s32.totalorder %s5982_s6, 0 }
 0x1b1   : > { %4770 = dma.done.wait (%p5983_p12), [#allocation3], 256   ;;  %p5984_p4 = pmov %p5983_p12 }
 0x1b3   : > { %4772 = vsyncadd (%p5984_p4), [#allocation3], 4294967040  ;;  %p5985_p13 = pmov %p5984_p4 }
 0x1b4   : > { %p5986_p2 = pmov %p5984_p4 }
 0x1b5   : > { %4774 = dma.done.wait (%p5985_p13), [#allocation6], 272  }
 0x1b6   : > { %4776 = vsyncadd (%p5986_p2), [#allocation6], 4294967024  ;;  %p5987_p3 = pmov %p5986_p2 }
 0x1b7   : > { %p5988_p6 = pmov %p5986_p2 }
 0x1b8   : > { %4778 = dma.done.wait (%p5987_p3), [#allocation9], 16  }
 0x1b9   : > { %4780 = vsyncadd (%p5988_p6), [#allocation9], 4294967280  ;;  %s5989_s19 = sld [smem:[#allocation32_spill]]  ;;  %s1087_s27 = sand.u32 1, %s5982_s6  }
 0x1ba   : > { %s5990_s0 = sld [smem:[#allocation37_spill]]  ;;  %s1088_s22 = scalar_lea.sflag [#allocation3], %s1087_s27 }
 0x1bf   : > { %s5395_s21 = sand.u32 1, %s5989_s19  }
 0x1c0   : > { %p5991_p7 = scmp.ne.s32.totalorder %s5990_s0, 0 }
 0x1c2   : > { %4782 = dma.done.wait (%p5991_p7), %s1088_s22, 1136  }
 0x1c3   : > { %4784 = vsyncadd (%p5991_p7), %s1088_s22, 4294966160  ;;  %s5403_s12 = sshll.u32 %s5395_s21, 4  ;;  %p5992_p5 = pmov %p5986_p2 }
 0x1c4   : > { %s5410_s3 = scalar_lea.vmem [#allocation15], %s5403_s12 }
 0x1c5   : > { %4786 = dma.done.wait (%p5992_p5), [#allocation6], 256   ;;  %p5993_p11 = pmov %p5986_p2 }
 0x1c6   : > { %p1308_p9 = scmp.lt.s32.totalorder %s5982_s6, 1  ;;  %s5994_s19 = sld [smem:[#allocation45_spill]] }
 0x1c7   : > { %4788 = vsyncadd (%p5993_p11), [#allocation6], 4294967040  ;;  %s5995_s23 = sld [smem:[#allocation55_spill]]  ;;  %p5999_p10 = scmp.ne.s32.totalorder %s5982_s6, 0 }
 0x1c8   : > { %s5423_s25 = scalar_select %p1308_p9, %s5982_s6, 1 }
 0x1c9   : > { %s5996_s4 = sld [smem:[#allocation56_spill]] }
 0x1ca   : > { %s3764_s10 = sshll.u32 %s5423_s25, 4  ;;  %s3765_s20 = sshll.u32 %s5423_s25, 5 }
 0x1cb   : > { %s5997_s18 = sld [smem:[#allocation57_spill]] }
 0x1cc   : > { %s5430_s0 = scalar_lea.vmem %s5994_s19, %s3764_s10  ;;  %s5998_s13 = sld [smem:[#allocation58_spill]] }
 0x1cd   : > { %s5435_s1 = scalar_lea.vmem %s5995_s23, %s3765_s20 }
 0x1ce   : > { %1331 = sbr.rel (%p5999_p10) target bundleno = 781 (0x30d), region = 196 }
 0x1cf   : > { %s1320_s30 = scalar_lea.vmem %s5996_s4, %s5423_s25 }
 0x1d1   : > { %s1323_s24 = scalar_lea.vmem %s5997_s18, %s5423_s25 }
 0x1d2   : > { %s1326_s14 = scalar_lea.vmem %s5998_s13, %s5423_s25 }
 0x1d3   : > { %v1332_v0 = vld [vmem:[#allocation2] sm:$0xff]  ;;  %vm1336_vm0 = vcmask 261120   ;;  %v1333_v1 = vld [vmem:[#allocation2 + $0x8] sm:$0xff] }
 0x1d4   : > { %v1337_v2 = vsel %vm1336_vm0, %v1332_v0, 0.0  ;;  %v1340_v3 = vsel %vm1336_vm0, %v1333_v1, 0.0  ;;  %v3692_v21 = vld [vmem:[#allocation7] ss:$0 sm:$0xff]  ;;  %v3693_v23 = vld [vmem:[#allocation8] ss:$0 sm:$0xff] }
 0x1d5   : > { %1338 = vadd.xlane.f32.xlu0 %v1337_v2 }
 0x1d9   : > { %1341 = vadd.xlane.f32.xlu0 %v1340_v3 }
 0x25e   : > { %v1339_v4 = vpop.xlane.xlu0 %1338 }
 0x25f   : > { %v1344_v5 = vmul.f32 0.03125, %v1339_v4 }
 0x261   : > { %v1346_v6 = vsub.f32 %v1332_v0, %v1344_v5 }
 0x262   : > { %v1342_v7 = vpop.xlane.xlu0 %1341 }
 0x263   : > { %v1345_v8 = vmul.f32 0.03125, %v1342_v7  ;;  %v1348_v9 = vmul.f32 %v1346_v6, %v1346_v6 }
 0x265   : > { %v1347_v10 = vsub.f32 %v1333_v1, %v1345_v8  ;;  %v1350_v11 = vsel %vm1336_vm0, %v1348_v9, 0.0 }
 0x266   : > { %1351 = vadd.xlane.f32.xlu1 %v1350_v11 }
 0x267   : > { %v1349_v12 = vmul.f32 %v1347_v10, %v1347_v10 }
 0x269   : > { %v1353_v13 = vsel %vm1336_vm0, %v1349_v12, 0.0 }
 0x26a   : > { %1354 = vadd.xlane.f32.xlu1 %v1353_v13 }
 0x2ef   : > { %v1352_v14 = vpop.xlane.xlu1 %1351 }
 0x2f0   : > { %v1356_v15 = vmul.f32 0.03125, %v1352_v14 }
 0x2f2   : > { %v1358_v16 = vadd.f32 1e-05, %v1356_v15 }
 0x2f3   : > { %v1355_v17 = vpop.xlane.xlu1 %1354 }
 0x2f4   : > { %4199 = vrsqrt.f32 %v1358_v16  ;;  %v1357_v18 = vmul.f32 0.03125, %v1355_v17 }
 0x2f6   : > { %v1359_v19 = vadd.f32 1e-05, %v1357_v18 }
 0x2f8   : > { %4201 = vrsqrt.f32 %v1359_v19 }
 0x301   : > { %v4200_v20 = vpop.eup %4199 }
 0x302   : > { %v1362_v22 = vmul.f32 %v4200_v20, %v1346_v6 }
 0x304   : > { %v1370_v24 = vmul.f32 %v3692_v21, %v1362_v22 }
 0x305   : > { %v4202_v25 = vpop.eup %4201 }
 0x306   : > { %v1378_v26 = vadd.f32 %v3693_v23, %v1370_v24  ;;  %v1363_v27 = vmul.f32 %v4202_v25, %v1347_v10 }
 0x308   : > { %1380 = vst.msk [vmem:[#allocation22] sm:$0xff] %vm1336_vm0, %v1378_v26  ;;  %v1371_v28 = vmul.f32 %v3692_v21, %v1363_v27 }
 0x30a   : > { %v1379_v29 = vadd.f32 %v3693_v23, %v1371_v28 }
 0x30c   : > { %1381 = vst.msk [vmem:[#allocation22 + $0x8] sm:$0xff] %vm1336_vm0, %v1379_v29 }
 0x30d PF: > { %v4203_v30 = vld [vmem:[%s5430_s0 + $0x8] sm:$0xff]   ;;  %v4833_v31 = vmov 0.0   ;;  %v4204_v32 = vld [vmem:[%s5430_s0] sm:$0xff]   ;;  %vm4834_vm1 = vmmov 0   ;;  %v1384_v35 = vld [vmem:[#allocation5] sm:$0xff]  ;;  %s6000_s13 = scalar_lea.vmem [#allocation11], %s5403_s12 }
 0x30e   : > { %3836 = vmatprep.subr.bf16.mxu1 %v4833_v31  ;;  %3840 = vmatprep.mubr.msk.bf16.mxu1 %vm4834_vm1, %v4833_v31  ;;  %v1385_v36 = vld [vmem:[#allocation5 + $0x8] sm:$0xff]  ;;  %s6001_s2 = smov %s6000_s13  ;;  %s6002_s18 = sld [smem:[#allocation40_spill]]  ;;  %vm1428_vm2 = vcmask 261120   ;;  %vm1636_vm3 = vcmask 64512   ;;  %vm1684_vm4 = vcmask 130048   ;;  %vm1857_vm5 = vcmask 1043456  }
 0x30f   : > { %3837 = vmatpush3.bf16.msra.mxu1 %v4203_v30  ;;  %v5462_v33 = vld [vmem:[#allocation22] sm:$0xff]  ;;  %s6003_s28 = sld [smem:[#allocation42_spill]]  ;;  %s6005_s11 = scalar_lea.vmem [#allocation12], %s5395_s21  ;;  %vm3092_vm8 = vcmask 523264  }
 0x310   : > { %3838 = vmatprep.subr.bf16.mxu1 %v4833_v31  ;;  %v1386_v37 = vadd.f32 %v1384_v35, %v5462_v33  ;;  %v4205_v39 = vld [vmem:[%s6000_s13 + $0x8] sm:$0xff]   ;;  %s4835_s6 = smov 120   ;;  %s6006_s7 = scalar_lea.vmem [#allocation13], %s5403_s12 }
 0x311   : > { %v4206_v40 = vld [vmem:[%s6001_s2] sm:$0xff]   ;;  %s6004_s2 = scalar_lea.vmem [#allocation10], %s5395_s21  ;;  %s6007_s5 = smov %s6006_s7 }
 0x312   : > { %v3694_v58 = vld [vmem:[%s6004_s2] ss:$0 sm:$0xff]  ;;  %s6008_s4 = scalar_lea.vmem [#allocation14], %s5395_s21  ;;  %s4836_s9 = smov 112  }
 0x313   : > { %v5464_v34 = vld [vmem:[#allocation22 + $0x8] sm:$0xff]  ;;  %3839 = vmatpush3.bf16.msra.mxu1 %v4204_v32  ;;  %v3698_v62 = vld [vmem:[%s6005_s11] ss:$0 sm:$0xff]  ;;  %s4837_s23 = smov 104   ;;  %s6010_s10 = scalar_lea.vmem [#allocation19], %s5403_s12 }
 0x314   : > { %v1387_v38 = vadd.f32 %v1385_v36, %v5464_v34  ;;  %v1389_v41 = vld [vmem:[%s6002_s18] sm:$0xff]  ;;  %v1390_v42 = vld [vmem:[%s6002_s18 + $0x8] sm:$0xff]  ;;  %v1391_v46 = vld [vmem:[%s6002_s18 + $0x10] sm:$0xff]  ;;  %3844 = vmatprep.subr.bf16.mxu1 %v4205_v39  ;;  %s6011_s20 = smov %s6010_s10  ;;  %s6012_s8 = scalar_lea.vmem [#allocation17], %s5395_s21 }
 0x315   : > { %v1393_v44 = vld [vmem:[%s6003_s28] sm:$0xff]  ;;  %v1394_v45 = vld [vmem:[%s6003_s28 + $0x8] sm:$0xff]  ;;  %v1392_v49 = vld [vmem:[%s6002_s18 + $0x18] sm:$0xff]  ;;  %v1403_v14 = vpack.c.bf16 %v1390_v42, %v1389_v41  ;;  %s6013_s12 = scalar_lea.vmem [#allocation18], %s5395_s21  ;;  %s6014_s17 = scalar_lea.vmem [#allocation20], %s5395_s21 }
 0x316   : > { %v1388_v43 = vpack.c.bf16 %v1387_v38, %v1386_v37  ;;  %v1397_v47 = vadd.f32 %v1393_v44, %v1389_v41  ;;  %v1398_v48 = vadd.f32 %v1394_v45, %v1390_v42  ;;  %v1395_v50 = vld [vmem:[%s6003_s28 + $0x10] sm:$0xff]  ;;  %v1396_v51 = vld [vmem:[%s6003_s28 + $0x18] sm:$0xff]  ;;  %v4208_v13 = vld [vmem:[%s6007_s5] sm:$0xff]   ;;  %v1404_v15 = vpack.c.bf16 %v1392_v49, %v1391_v46  ;;  %s6018_s11 = sld [smem:[#allocation34_spill]] }
 0x317   : > { %v1399_v53 = vadd.f32 %v1395_v50, %v1391_v46  ;;  %v1400_v54 = vadd.f32 %v1396_v51, %v1392_v49  ;;  %v4207_v12 = vld [vmem:[%s6006_s7 + $0x8] sm:$0xff]   ;;  %3856 = vmatprep.mubr.msk.bf16.mxu0 %vm1428_vm2, %v1403_v14 }
 0x318   : > { %3841 = vmatmul.mubr.msk.bf16.vlgmr.msra.gmra.mxu1 %vm1428_vm2, %v1388_v43  ;;  %v1401_v52 = vpack.c.bf16 %v1398_v48, %v1397_v47  ;;  %3852 = vmatprep.subr.bf16.mxu0 %v4207_v12  ;;  %v3703_v38 = vld [vmem:[%s6008_s4] ss:$0 sm:$0xff] }
 0x319   : > { %3845 = vmatpush3.bf16.msra.mxu1 %v4205_v39  ;;  %v1402_v55 = vpack.c.bf16 %v1400_v54, %v1399_v53  ;;  %3853 = vmatpush3.bf16.msra.mxu0 %v4207_v12 }
 0x31a   : > { %3846 = vmatprep.subr.bf16.mxu1 %v4206_v40  ;;  %3848 = vmatprep.mubr.msk.bf16.mxu1 %vm1428_vm2, %v1401_v52 }
 0x31b   : > { %3854 = vmatprep.subr.bf16.mxu0 %v4208_v13 }
 0x31c   : > { %p3747_p0 = scmp.ne.s32.totalorder %s6018_s11, 1 }
 0x31d   : > { %3847 = vmatpush3.bf16.msra.mxu1 %v4206_v40  ;;  %3855 = vmatpush3.bf16.msra.mxu0 %v4208_v13  ;;  %s6019_s25 = sld [smem:[#allocation60_spill]] (!%p3747_p0) }
 0x31e   : > { %3860 = vmatprep.subr.bf16.mxu1 %v4833_v31  ;;  %3866 = vmatprep.subr.bf16.mxu0 %v4833_v31  ;;  %s6020_s5 = sld [smem:[#allocation59_spill]] (!%p3747_p0) }
 0x320   : > { %3849 = vmatmul.mubr.msk.bf16.vlgmr.msra.gmra.mxu1 %vm1428_vm2, %v1402_v55  ;;  %3857 = vmatmul.mubr.msk.bf16.vlgmr.msra.gmra.mxu0 %vm1428_vm2, %v1404_v15 }
 0x321   : > { %3862 = vmatprep.mubr.msk.bf16.mxu1 %vm4834_vm1, %v4833_v31  ;;  %3868 = vmatprep.mubr.msk.bf16.mxu0 %vm4834_vm1, %v4833_v31 }
 0x3d8   : > { %v1466_v56 = vpop.f32.mrf.mxu1 }
 0x3d9   : > { %v1467_v8 = vadd.f32 %v3694_v58, %v1466_v56 }
 0x3da   : > { %v3842_v57 = vpop.f32.mrf.mxu1 }
 0x3db   : > { %v5517_v11 = vpack.c.bf16 %v1467_v8, %v1467_v8 }
 0x3dc   : > { %v1469_v59 = vpop.f32.mrf.mxu1 }
 0x3dd   : > { %v5505_v60 = vadd.f32 %v3694_v58, %v1469_v59  ;;  %v1630_v59 = vld [vmem:[%s5410_s3 + $0x4] sm:$0xf] }
 0x3de   : > { %v3843_v61 = vpop.f32.mrf.mxu1 }
 0x3df   : > { %v5565_v61 = vsel %vm1857_vm5, %v1630_v59, 0 }
 0x3e0   : > { %v3850_v63 = vpop.f32.mrf.mxu1  ;;  %v3858_v37 = vpop.f32.mrf.mxu0 }
 0x3e1   : > { %v1545_v0 = vadd.f32 %v3850_v63, %v3698_v62  ;;  %v1623_v39 = vadd.f32 %v3858_v37, %v3703_v38 }
 0x3e2   : > { %v1536_v1 = vpop.f32.mrf.mxu1  ;;  %v1614_v40 = vpop.f32.mrf.mxu0 }
 0x3e3   : > { %v1537_v5 = vadd.f32 %v3698_v62, %v1536_v1  ;;  %v1615_v42 = vadd.f32 %v3703_v38, %v1614_v40  ;;  %v1629_v1 = vld [vmem:[%s5410_s3] sm:$0xf] }
 0x3e4   : > { %v3851_v2 = vpop.f32.mrf.mxu1  ;;  %v3859_v41 = vpop.f32.mrf.mxu0 }
 0x3e5   : > { %v1548_v3 = vadd.f32 %v3851_v2, %v3698_v62  ;;  %v1626_v43 = vadd.f32 %v3859_v41, %v3703_v38 }
 0x3e6   : > { %v1539_v4 = vpop.f32.mrf.mxu1  ;;  %v1617_v44 = vpop.f32.mrf.mxu0 }
 0x3e7   : > { %v5509_v6 = vpack.c.bf16 %v1548_v3, %v1545_v0  ;;  %v1540_v7 = vadd.f32 %v3698_v62, %v1539_v4  ;;  %v5544_v45 = vpack.c.bf16 %v1626_v43, %v1623_v39  ;;  %v1618_v46 = vadd.f32 %v3703_v38, %v1617_v44 }
 0x3e8   : > { %v5572_v4 = vsel %vm1857_vm5, %v1629_v1, 0 }
 0x3e9   : > { %v5511_v9 = vpack.c.bf16 %v1540_v7, %v1537_v5  ;;  %v5546_v47 = vpack.c.bf16 %v1618_v46, %v1615_v42 }
 0x3eb   : > { %1745 = vrot.lane.b32.xlu0 %v5511_v9, %s4835_s6  ;;  %v1641_v10 = vsel %vm1636_vm3, %v5511_v9, 0  ;;  %3867 = vmatpush3.bf16.msra.mxu0 %v5546_v47 }
 0x3ec   : > { %3861 = vmatpush3.bf16.xpose.msra.mxu1 %v1641_v10  ;;  %3878 = vmatprep.subr.bf16.mxu0 %v4833_v31 }
 0x3ed   : > { %3872 = vmatprep.subr.bf16.mxu1 %v4833_v31 }
 0x3ef   : > { %1742 = vrot.lane.b32.xlu0 %v5517_v11, %s4835_s6 }
 0x3f3   : > { %3863 = vmatmul.mubr.msk.bf16.vlgmr.msra.gmra.mxu1 %vm1636_vm3, %v5517_v11 }
 0x3f4   : > { %3874 = vmatprep.mubr.msk.bf16.mxu1 %vm4834_vm1, %v4833_v31 }
 0x45d   : > { %v1746_v16 = vpop.permute.xlu0 %1745 }
 0x45e   : > { %v1751_v17 = vsel %vm1636_vm3, %v1746_v16, 0 }
 0x45f   : > { %3873 = vmatpush3.bf16.xpose.msra.mxu1 %v1751_v17 }
 0x460   : > { %3884 = vmatprep.subr.bf16.mxu1 %v4833_v31 }
 0x461   : > { %v1743_v18 = vpop.permute.xlu0 %1742 }
 0x466   : > { %3875 = vmatmul.mubr.msk.bf16.vlgmr.msra.gmra.mxu1 %vm1636_vm3, %v1743_v18 }
 0x467   : > { %3886 = vmatprep.mubr.msk.bf16.mxu1 %vm4834_vm1, %v4833_v31  ;;  %3885 = vmatpush3.bf16.msra.mxu1 %v5565_v61 }
 0x468   : > { %3896 = vmatprep.subr.bf16.mxu1 %v4833_v31 }
 0x4b3   : > { %v1677_v19 = vpop.f32.mrf.mxu1 }
 0x4b4   : > { %v1683_v20 = vmul.f32 0.35355338, %v1677_v19 }
 0x4b5   : > { %v3864_v21 = vpop.f32.mrf.mxu1 }
 0x4b6   : > { %v1685_v22 = vsel %vm1684_vm4, %v1683_v20, -inf }
 0x4b7   : > { %1686 = vmax.xlane.f32.xlu1 %v1685_v22  ;;  %v1680_v23 = vpop.f32.mrf.mxu1 }
 0x4b9   : > { %v3865_v24 = vpop.f32.mrf.mxu1 }
 0x526   : > { %v1787_v25 = vpop.f32.mrf.mxu1 }
 0x527   : > { %v1793_v26 = vmul.f32 0.35355338, %v1787_v25 }
 0x528   : > { %v3876_v27 = vpop.f32.mrf.mxu1 }
 0x529   : > { %v1794_v28 = vsel %vm1684_vm4, %v1793_v26, -inf }
 0x52a   : > { %1795 = vmax.xlane.f32.xlu1 %v1794_v28  ;;  %v1790_v29 = vpop.f32.mrf.mxu1 }
 0x52c   : > { %v3877_v30 = vpop.f32.mrf.mxu1 }
 0x540   : > { %v1687_v32 = vpop.xlane.xlu1 %1686 }
 0x541   : > { %v1688_v35 = vsub.f32 %v1683_v20, %v1687_v32 }
 0x543   : > { %v1689_v36 = vmul.f32 1.442695, %v1688_v35 }
 0x545   : > { %4215 = vpow2.f32 %v1689_v36 }
 0x552   : > { %v4216_v48 = vpop.eup %4215 }
 0x553   : > { %v1691_v49 = vsel %vm1684_vm4, %v4216_v48, 0.0 }
 0x554   : > { %1692 = vadd.xlane.f32.xlu0 %v1691_v49 }
 0x56a   : > { %2010 = vrot.lane.b32.xlu0 %v5546_v47, %s4836_s9 }
 0x5b3   : > { %v1796_v50 = vpop.xlane.xlu1 %1795 }
 0x5b4   : > { %v1797_v51 = vsub.f32 %v1793_v26, %v1796_v50 }
 0x5b6   : > { %v1798_v52 = vmul.f32 1.442695, %v1797_v51 }
 0x5b8   : > { %4217 = vpow2.f32 %v1798_v52 }
 0x5c5   : > { %v4218_v53 = vpop.eup %4217 }
 0x5c6   : > { %v1800_v54 = vsel %vm1684_vm4, %v4218_v53, 0.0 }
 0x5c7   : > { %1801 = vadd.xlane.f32.xlu1 %v1800_v54 }
 0x5d8   : > { %1807 = vrot.lane.b32.xlu1 %v5546_v47, %s4835_s6 }
 0x5dc   : > { %1949 = vrot.lane.b32.xlu1 %v5511_v9, %s4836_s9 }
 0x5dd   : > { %v1693_v55 = vpop.xlane.xlu0 %1692 }
 0x5de   : > { %4219 = vrcp.f32 %v1693_v55 }
 0x5e0   : > { %1947 = vrot.lane.b32.xlu1 %v5517_v11, %s4836_s9 }
 0x5e1   : > { %v2011_v10 = vpop.permute.xlu0 %2010 }
 0x5eb   : > { %v4220_v56 = vpop.eup %4219 }
 0x5ec   : > { %v1695_v57 = vmul.f32 %v4220_v56, %v4216_v48 }
 0x5ee   : > { %v1696_v58 = vpack.c.bf16 %v1695_v57, %v1695_v57 }
 0x5f0   : > { %3869 = vmatmul.mubr.msk.bf16.vlgmr.msra.gmra.mxu0 %vm1684_vm4, %v1696_v58 }
 0x5f1   : > { %3880 = vmatprep.mubr.msk.bf16.mxu0 %vm4834_vm1, %v4833_v31 }
 0x650   : > { %v1802_v62 = vpop.xlane.xlu1 %1801 }
 0x651   : > { %4221 = vrcp.f32 %v1802_v62 }
 0x654   : > { %v1808_v63 = vpop.permute.xlu1 %1807 }
 0x655   : > { %3879 = vmatpush3.bf16.msra.mxu0 %v1808_v63 }
 0x656   : > { %3890 = vmatprep.subr.bf16.mxu0 %v4833_v31 }
 0x658   : > { %v1950_v14 = vpop.permute.xlu1 %1949 }
 0x659   : > { %v1955_v18 = vsel %vm1636_vm3, %v1950_v14, 0 }
 0x65c   : > { %v1948_v21 = vpop.permute.xlu1 %1947 }
 0x65e   : > { %v4222_v0 = vpop.eup %4221 }
 0x65f   : > { %v1804_v2 = vmul.f32 %v4222_v0, %v4218_v53 }
 0x661   : > { %v1805_v3 = vpack.c.bf16 %v1804_v2, %v1804_v2 }
 0x663   : > { %3881 = vmatmul.mubr.msk.bf16.vlgmr.msra.gmra.mxu0 %vm1684_vm4, %v1805_v3 }
 0x664   : > { %3891 = vmatpush3.bf16.msra.mxu0 %v5572_v4  ;;  %3892 = vmatprep.mubr.msk.bf16.mxu0 %vm4834_vm1, %v4833_v31 }
 0x665   : > { %3902 = vmatprep.subr.bf16.mxu0 %v4833_v31 }
 0x6b0   : > { %v1734_v5 = vpop.f32.mrf.mxu0 }
 0x6b1   : > { %v1740_v7 = vpack.c.bf16 %v1734_v5, %v1734_v5 }
 0x6b2   : > { %v3870_v8 = vpop.f32.mrf.mxu0 }
 0x6b3   : > { %3893 = vmatmul.mubr.msk.bf16.vlgmr.msra.gmra.mxu0 %vm1636_vm3, %v1740_v7 }
 0x6b4   : > { %3903 = vmatpush3.bf16.msra.mxu0 %v2011_v10  ;;  %v1737_v12 = vpop.f32.mrf.mxu0  ;;  %3904 = vmatprep.mubr.msk.bf16.mxu0 %vm4834_vm1, %v4833_v31  ;;  %v5626_v10 = vpack.c.bf16 %v5505_v60, %v5505_v60 }
 0x6b5   : > { %3914 = vmatprep.subr.bf16.mxu0 %v4833_v31 }
 0x6b6   : > { %v3871_v13 = vpop.f32.mrf.mxu0 }
 0x723   : > { %v1847_v15 = vpop.f32.mrf.mxu0 }
 0x724   : > { %v1853_v16 = vpack.c.bf16 %v1847_v15, %v1847_v15 }
 0x725   : > { %v3882_v17 = vpop.f32.mrf.mxu0 }
 0x726   : > { %3887 = vmatmul.mubr.msk.bf16.vlgmr.msra.gmra.mxu1 %vm1636_vm3, %v1853_v16 }
 0x727   : > { %3897 = vmatpush3.bf16.xpose.msra.mxu1 %v1955_v18  ;;  %v1850_v19 = vpop.f32.mrf.mxu0  ;;  %3898 = vmatprep.mubr.msk.bf16.mxu1 %vm4834_vm1, %v4833_v31 }
 0x728   : > { %3908 = vmatprep.subr.bf16.mxu1 %v4833_v31 }
 0x729   : > { %v3883_v20 = vpop.f32.mrf.mxu0 }
 0x72e   : > { %3899 = vmatmul.mubr.msk.bf16.vlgmr.msra.gmra.mxu1 %vm1636_vm3, %v1948_v21 }
 0x72f   : > { %3910 = vmatprep.mubr.msk.bf16.mxu1 %vm4834_vm1, %v4833_v31 }
 0x773   : > { %v5591_v22 = vpop.f32.mrf.mxu0 }
 0x775   : > { %v3894_v23 = vpop.f32.mrf.mxu0 }
 0x776   : > { %v2268_v23 = vsel %vm1636_vm3, %v5509_v6, 0 }
 0x777   : > { %v1944_v24 = vpop.f32.mrf.mxu0 }
 0x779   : > { %v3895_v25 = vpop.f32.mrf.mxu0 }
 0x7e6   : > { %v5593_v26 = vpop.f32.mrf.mxu1 }
 0x7e7   : > { %v1942_v12 = vadd.f32 %v5591_v22, %v5593_v26 }
 0x7e8   : > { %v3888_v27 = vpop.f32.mrf.mxu1 }
 0x7ea   : > { %v1898_v28 = vpop.f32.mrf.mxu1 }
 0x7ec   : > { %v3889_v29 = vpop.f32.mrf.mxu1 }
 0x7ee   : > { %v1991_v30 = vpop.f32.mrf.mxu1 }
 0x7ef   : > { %v1997_v32 = vmul.f32 0.35355338, %v1991_v30 }
 0x7f0   : > { %v3900_v35 = vpop.f32.mrf.mxu1 }
 0x7f1   : > { %v1998_v36 = vsel %vm1684_vm4, %v1997_v32, -inf }
 0x7f2   : > { %1999 = vmax.xlane.f32.xlu1 %v1998_v36  ;;  %v1994_v37 = vpop.f32.mrf.mxu1 }
 0x7f4   : > { %v3901_v38 = vpop.f32.mrf.mxu1 }
 0x87b   : > { %v2000_v39 = vpop.xlane.xlu1 %1999 }
 0x87c   : > { %v2001_v40 = vsub.f32 %v1997_v32, %v2000_v39 }
 0x87e   : > { %v2002_v41 = vmul.f32 1.442695, %v2001_v40 }
 0x880   : > { %4223 = vpow2.f32 %v2002_v41 }
 0x88d   : > { %v4224_v42 = vpop.eup %4223 }
 0x88e   : > { %v2004_v43 = vsel %vm1684_vm4, %v4224_v42, 0.0 }
 0x88f   : > { %2005 = vadd.xlane.f32.xlu0 %v2004_v43 }
 0x8a5   : > { %2106 = vrot.lane.b32.xlu0 %v5511_v9, %s4837_s23 }
 0x8a9   : > { %2104 = vrot.lane.b32.xlu0 %v5517_v11, %s4837_s23  ;;  %v1631_v11 = vld [vmem:[%s5410_s3 + $0x8] sm:$0xf] }
 0x8aa   : > { %v5611_v52 = vsel %vm1857_vm5, %v1631_v11, 0 }
 0x8ab   : > { %3909 = vmatpush3.bf16.msra.mxu1 %v5611_v52 }
 0x8ac   : > { %3920 = vmatprep.subr.bf16.mxu1 %v4833_v31 }
 0x918   : > { %v2006_v44 = vpop.xlane.xlu0 %2005 }
 0x919   : > { %4225 = vrcp.f32 %v2006_v44 }
 0x91c   : > { %v2107_v49 = vpop.permute.xlu0 %2106 }
 0x91d   : > { %v2112_v51 = vsel %vm1636_vm3, %v2107_v49, 0 }
 0x920   : > { %v2105_v9 = vpop.permute.xlu0 %2104 }
 0x926   : > { %v4226_v46 = vpop.eup %4225 }
 0x927   : > { %v2008_v48 = vmul.f32 %v4226_v46, %v4224_v42 }
 0x929   : > { %v2009_v50 = vpack.c.bf16 %v2008_v48, %v2008_v48 }
 0x92b   : > { %3905 = vmatmul.mubr.msk.bf16.vlgmr.msra.gmra.mxu0 %vm1684_vm4, %v2009_v50 }
 0x92c   : > { %3915 = vmatpush3.bf16.xpose.msra.mxu0 %v2112_v51  ;;  %3916 = vmatprep.mubr.msk.bf16.mxu0 %vm4834_vm1, %v4833_v31 }
 0x92d   : > { %3926 = vmatprep.subr.bf16.mxu0 %v4833_v31 }
 0x933   : > { %3917 = vmatmul.mubr.msk.bf16.vlgmr.msra.gmra.mxu0 %vm1636_vm3, %v2105_v9 }
 0x934   : > { %3928 = vmatprep.mubr.msk.bf16.mxu0 %vm4834_vm1, %v4833_v31 }
 0x9eb   : > { %v2050_v53 = vpop.f32.mrf.mxu0 }
 0x9ec   : > { %v2056_v54 = vpack.c.bf16 %v2050_v53, %v2050_v53 }
 0x9ed   : > { %v3906_v55 = vpop.f32.mrf.mxu0 }
 0x9ee   : > { %3911 = vmatmul.mubr.msk.bf16.vlgmr.msra.gmra.mxu1 %vm1636_vm3, %v2056_v54 }
 0x9ef   : > { %v2053_v56 = vpop.f32.mrf.mxu0  ;;  %3922 = vmatprep.mubr.msk.bf16.mxu1 %vm4834_vm1, %v4833_v31 }
 0x9f1   : > { %v3907_v57 = vpop.f32.mrf.mxu0 }
 0x9f3   : > { %v2148_v58 = vpop.f32.mrf.mxu0 }
 0x9f4   : > { %v2154_v59 = vmul.f32 0.35355338, %v2148_v58 }
 0x9f5   : > { %v3918_v62 = vpop.f32.mrf.mxu0 }
 0x9f6   : > { %v2155_v63 = vsel %vm1684_vm4, %v2154_v59, -inf }
 0x9f7   : > { %2156 = vmax.xlane.f32.xlu0 %v2155_v63  ;;  %v2151_v0 = vpop.f32.mrf.mxu0 }
 0x9f9   : > { %v3919_v1 = vpop.f32.mrf.mxu0 }
 0xa80   : > { %v2157_v2 = vpop.xlane.xlu0 %2156 }
 0xa81   : > { %v2158_v3 = vsub.f32 %v2154_v59, %v2157_v2 }
 0xa83   : > { %v2159_v5 = vmul.f32 1.442695, %v2158_v3 }
 0xa85   : > { %4227 = vpow2.f32 %v2159_v5 }
 0xa92   : > { %v4228_v7 = vpop.eup %4227 }
 0xa93   : > { %v2161_v8 = vsel %vm1684_vm4, %v4228_v7, 0.0 }
 0xa94   : > { %2162 = vadd.xlane.f32.xlu1 %v2161_v8 }
 0xaa5   : > { %2167 = vrot.lane.b32.xlu1 %v5546_v47, %s4837_s23  ;;  %v1632_v47 = vld [vmem:[%s5410_s3 + $0xc] sm:$0xf]  ;;  %s6009_s3 = scalar_lea.vmem [#allocation16], %s5395_s21 }
 0xaa6   : > { %v5636_v18 = vsel %vm1857_vm5, %v1632_v47, 0 }
 0xaa7   : > { %3927 = vmatpush3.bf16.msra.mxu0 %v5636_v18 }
 0xaa8   : > { %3938 = vmatprep.subr.bf16.mxu0 %v4833_v31 }
 0xaa9   : > { %2371 = vrot.lane.b32.xlu1 %v5509_v6, %s4835_s6 }
 0xaad   : > { %2368 = vrot.lane.b32.xlu1 %v5626_v10, %s4835_s6 }
 0xaae   : > { %v2097_v13 = vpop.f32.mrf.mxu1 }
 0xaaf   : > { %v5632_v14 = vadd.f32 %v2097_v13, %v1942_v12 }
 0xab0   : > { %v3912_v15 = vpop.f32.mrf.mxu1 }
 0xab2   : > { %v2100_v16 = vpop.f32.mrf.mxu1 }
 0xab4   : > { %v3913_v17 = vpop.f32.mrf.mxu1 }
 0xb1d   : > { %v2163_v60 = vpop.xlane.xlu1 %2162 }
 0xb1e   : > { %4229 = vrcp.f32 %v2163_v60 }
 0xb21   : > { %v2168_v19 = vpop.permute.xlu1 %2167 }
 0xb22   : > { %3921 = vmatpush3.bf16.msra.mxu1 %v2168_v19 }
 0xb23   : > { %3932 = vmatprep.subr.bf16.mxu1 %v4833_v31 }
 0xb25   : > { %v2372_v24 = vpop.permute.xlu1 %2371 }
 0xb26   : > { %v2377_v25 = vsel %vm1636_vm3, %v2372_v24, 0 }
 0xb29   : > { %v2369_v26 = vpop.permute.xlu1 %2368 }
 0xb2b   : > { %v4230_v20 = vpop.eup %4229 }
 0xb2c   : > { %v2165_v21 = vmul.f32 %v4230_v20, %v4228_v7 }
 0xb2e   : > { %v2166_v22 = vpack.c.bf16 %v2165_v21, %v2165_v21 }
 0xb30   : > { %3923 = vmatmul.mubr.msk.bf16.vlgmr.msra.gmra.mxu1 %vm1684_vm4, %v2166_v22 }
 0xb31   : > { %3933 = vmatpush3.bf16.xpose.msra.mxu1 %v2268_v23  ;;  %3934 = vmatprep.mubr.msk.bf16.mxu1 %vm4834_vm1, %v4833_v31 }
 0xb32   : > { %3944 = vmatprep.subr.bf16.mxu1 %v4833_v31 }
 0xb38   : > { %3935 = vmatmul.mubr.msk.bf16.vlgmr.msra.gmra.mxu1 %vm1636_vm3, %v5626_v10 }
 0xb39   : > { %3945 = vmatpush3.bf16.xpose.msra.mxu1 %v2377_v25  ;;  %3946 = vmatprep.mubr.msk.bf16.mxu1 %vm4834_vm1, %v4833_v31 }
 0xb3a   : > { %3956 = vmatprep.subr.bf16.mxu1 %v4833_v31 }
 0xb40   : > { %3947 = vmatmul.mubr.msk.bf16.vlgmr.msra.gmra.mxu1 %vm1636_vm3, %v2369_v26 }
 0xb41   : > { %3957 = vmatpush3.bf16.msra.mxu1 %v5565_v61  ;;  %3958 = vmatprep.mubr.msk.bf16.mxu1 %vm4834_vm1, %v4833_v31 }
 0xb42   : > { %3968 = vmatprep.subr.bf16.mxu1 %v4833_v31 }
 0xbf0   : > { %v2207_v27 = vpop.f32.mrf.mxu1 }
 0xbf1   : > { %v2213_v28 = vpack.c.bf16 %v2207_v27, %v2207_v27 }
 0xbf2   : > { %v3924_v29 = vpop.f32.mrf.mxu1 }
 0xbf3   : > { %3929 = vmatmul.mubr.msk.bf16.vlgmr.msra.gmra.mxu0 %vm1636_vm3, %v2213_v28 }
 0xbf4   : > { %3939 = vmatpush3.bf16.msra.mxu0 %v5544_v45  ;;  %v2210_v30 = vpop.f32.mrf.mxu1  ;;  %3940 = vmatprep.mubr.msk.bf16.mxu0 %vm4834_vm1, %v4833_v31 }
 0xbf5   : > { %3950 = vmatprep.subr.bf16.mxu0 %v4833_v31 }
 0xbf6   : > { %v3925_v32 = vpop.f32.mrf.mxu1 }
 0xbf8   : > { %v2304_v61 = vpop.f32.mrf.mxu1 }
 0xbf9   : > { %v2310_v35 = vmul.f32 0.35355338, %v2304_v61 }
 0xbfa   : > { %v3936_v36 = vpop.f32.mrf.mxu1 }
 0xbfb   : > { %v2311_v37 = vsel %vm1684_vm4, %v2310_v35, -inf }
 0xbfc   : > { %2312 = vmax.xlane.f32.xlu1 %v2311_v37  ;;  %v2307_v38 = vpop.f32.mrf.mxu1 }
 0xbfe   : > { %v3937_v39 = vpop.f32.mrf.mxu1 }
 0xc00   : > { %v2413_v40 = vpop.f32.mrf.mxu1 }
 0xc01   : > { %v2419_v41 = vmul.f32 0.35355338, %v2413_v40 }
 0xc02   : > { %v3948_v42 = vpop.f32.mrf.mxu1 }
 0xc03   : > { %v2420_v43 = vsel %vm1684_vm4, %v2419_v41, -inf }
 0xc04   : > { %2421 = vmax.xlane.f32.xlu0 %v2420_v43  ;;  %v2416_v44 = vpop.f32.mrf.mxu1 }
 0xc06   : > { %v3949_v46 = vpop.f32.mrf.mxu1 }
 0xc0d   : > { %2566 = vrot.lane.b32.xlu1 %v5626_v10, %s4836_s9 }
 0xc85   : > { %v2313_v48 = vpop.xlane.xlu1 %2312 }
 0xc86   : > { %v2314_v49 = vsub.f32 %v2310_v35, %v2313_v48 }
 0xc88   : > { %v2315_v50 = vmul.f32 1.442695, %v2314_v49 }
 0xc89   : > { %v2567_v24 = vpop.permute.xlu1 %2566 }
 0xc8a   : > { %4231 = vpow2.f32 %v2315_v50 }
 0xc8d   : > { %v2422_v51 = vpop.xlane.xlu0 %2421 }
 0xc8e   : > { %v2423_v9 = vsub.f32 %v2419_v41, %v2422_v51 }
 0xc90   : > { %v2424_v11 = vmul.f32 1.442695, %v2423_v9 }
 0xc92   : > { %4233 = vpow2.f32 %v2424_v11 }
 0xc97   : > { %v4232_v53 = vpop.eup %4231 }
 0xc98   : > { %v2317_v54 = vsel %vm1684_vm4, %v4232_v53, 0.0 }
 0xc99   : > { %2318 = vadd.xlane.f32.xlu0 %v2317_v54 }
 0xc9f   : > { %v4234_v55 = vpop.eup %4233 }
 0xca0   : > { %v2426_v56 = vsel %vm1684_vm4, %v4234_v55, 0.0 }
 0xca1   : > { %2427 = vadd.xlane.f32.xlu0 %v2426_v56 }
 0xcb3   : > { %v2254_v57 = vpop.f32.mrf.mxu0 }
 0xcb4   : > { %v5670_v58 = vadd.f32 %v2254_v57, %v5632_v14 }
 0xcb5   : > { %v3930_v59 = vpop.f32.mrf.mxu0 }
 0xcb7   : > { %v2257_v62 = vpop.f32.mrf.mxu0  ;;  %2433 = vrot.lane.b32.xlu0 %v5544_v45, %s4835_s6 }
 0xcb9   : > { %v3931_v63 = vpop.f32.mrf.mxu0 }
 0xcbb   : > { %2568 = vrot.lane.b32.xlu0 %v5509_v6, %s4836_s9 }
 0xd22   : > { %v2319_v0 = vpop.xlane.xlu0 %2318 }
 0xd23   : > { %4235 = vrcp.f32 %v2319_v0 }
 0xd2a   : > { %v2428_v1 = vpop.xlane.xlu0 %2427 }
 0xd2b   : > { %4237 = vrcp.f32 %v2428_v1 }
 0xd2e   : > { %v2434_v7 = vpop.permute.xlu0 %2433 }
 0xd30   : > { %v4236_v2 = vpop.eup %4235 }
 0xd31   : > { %v2321_v3 = vmul.f32 %v4236_v2, %v4232_v53 }
 0xd32   : > { %v2569_v60 = vpop.permute.xlu0 %2568 }
 0xd33   : > { %v2322_v5 = vpack.c.bf16 %v2321_v3, %v2321_v3 }
 0xd35   : > { %3941 = vmatmul.mubr.msk.bf16.vlgmr.msra.gmra.mxu0 %vm1684_vm4, %v2322_v5 }
 0xd36   : > { %3951 = vmatpush3.bf16.msra.mxu0 %v2434_v7  ;;  %3952 = vmatprep.mubr.msk.bf16.mxu0 %vm4834_vm1, %v4833_v31 }
 0xd37   : > { %3962 = vmatprep.subr.bf16.mxu0 %v4833_v31 }
 0xd38   : > { %v4238_v8 = vpop.eup %4237 }
 0xd39   : > { %v2430_v12 = vmul.f32 %v4238_v8, %v4234_v55  ;;  %v3732_v8 = vld [vmem:[%s6009_s3] ss:$0 sm:$0xff] }
 0xd3b   : > { %v2431_v13 = vpack.c.bf16 %v2430_v12, %v2430_v12  ;;  %v2881_v12 = vadd.f32 %v3732_v8, %v5670_v58 }
 0xd3d   : > { %3953 = vmatmul.mubr.msk.bf16.vlgmr.msra.gmra.mxu0 %vm1684_vm4, %v2431_v13 }
 0xd3e   : > { %3963 = vmatpush3.bf16.msra.mxu0 %v5572_v4  ;;  %3964 = vmatprep.mubr.msk.bf16.mxu0 %vm4834_vm1, %v4833_v31  ;;  %v2574_v4 = vsel %vm1636_vm3, %v2569_v60, 0 }
 0xd3f   : > { %3974 = vmatprep.subr.bf16.mxu0 %v4833_v31 }
 0xdf5   : > { %v2360_v14 = vpop.f32.mrf.mxu0 }
 0xdf6   : > { %v2366_v15 = vpack.c.bf16 %v2360_v14, %v2360_v14 }
 0xdf7   : > { %v3942_v16 = vpop.f32.mrf.mxu0 }
 0xdf8   : > { %3965 = vmatmul.mubr.msk.bf16.vlgmr.msra.gmra.mxu0 %vm1636_vm3, %v2366_v15  ;;  %v2883_v15 = vadd.f32 %v2881_v12, %v5462_v33 }
 0xdf9   : > { %v2363_v17 = vpop.f32.mrf.mxu0  ;;  %3976 = vmatprep.mubr.msk.bf16.mxu0 %vm4834_vm1, %v4833_v31 }
 0xdfb   : > { %v3943_v47 = vpop.f32.mrf.mxu0 }
 0xdfd   : > { %v2473_v19 = vpop.f32.mrf.mxu0 }
 0xdfe   : > { %v2479_v20 = vpack.c.bf16 %v2473_v19, %v2473_v19 }
 0xdff   : > { %v3954_v21 = vpop.f32.mrf.mxu0 }
 0xe00   : > { %3959 = vmatmul.mubr.msk.bf16.vlgmr.msra.gmra.mxu1 %vm1636_vm3, %v2479_v20 }
 0xe01   : > { %3969 = vmatpush3.bf16.xpose.msra.mxu1 %v2574_v4  ;;  %v2476_v22 = vpop.f32.mrf.mxu0  ;;  %3970 = vmatprep.mubr.msk.bf16.mxu1 %vm4834_vm1, %v4833_v31 }
 0xe02   : > { %3980 = vmatprep.subr.bf16.mxu1 %v4833_v31 }
 0xe03   : > { %v3955_v23 = vpop.f32.mrf.mxu0 }
 0xe08   : > { %3971 = vmatmul.mubr.msk.bf16.vlgmr.msra.gmra.mxu1 %vm1636_vm3, %v2567_v24 }
 0xe09   : > { %3981 = vmatpush3.bf16.msra.mxu1 %v5611_v52  ;;  %3982 = vmatprep.mubr.msk.bf16.mxu1 %vm4834_vm1, %v4833_v31 }
 0xe0a   : > { %3992 = vmatprep.subr.bf16.mxu1 %v4833_v31 }
 0xeb8   : > { %v2560_v25 = vpop.f32.mrf.mxu0 }
 0xeba   : > { %v3966_v26 = vpop.f32.mrf.mxu0 }
 0xebc   : > { %v2563_v27 = vpop.f32.mrf.mxu0 }
 0xebe   : > { %v3967_v28 = vpop.f32.mrf.mxu0 }
 0xec0   : > { %v2517_v29 = vpop.f32.mrf.mxu1 }
 0xec1   : > { %v5698_v30 = vadd.f32 %v2560_v25, %v2517_v29 }
 0xec2   : > { %v3960_v32 = vpop.f32.mrf.mxu1 }
 0xec4   : > { %v2520_v61 = vpop.f32.mrf.mxu1 }
 0xec6   : > { %v3961_v35 = vpop.f32.mrf.mxu1 }
 0xec8   : > { %v2610_v36 = vpop.f32.mrf.mxu1 }
 0xec9   : > { %v2616_v37 = vmul.f32 0.35355338, %v2610_v36 }
 0xeca   : > { %v3972_v38 = vpop.f32.mrf.mxu1 }
 0xecb   : > { %v2617_v52 = vsel %vm1684_vm4, %v2616_v37, -inf }
 0xecc   : > { %2618 = vmax.xlane.f32.xlu0 %v2617_v52  ;;  %v2613_v39 = vpop.f32.mrf.mxu1 }
 0xece   : > { %v3973_v40 = vpop.f32.mrf.mxu1 }
 0xee2   : > { %2629 = vrot.lane.b32.xlu0 %v5544_v45, %s4836_s9 }
 0xee6   : > { %2720 = vrot.lane.b32.xlu0 %v5626_v10, %s4837_s23 }
 0xf55   : > { %v2619_v41 = vpop.xlane.xlu0 %2618 }
 0xf56   : > { %v2620_v42 = vsub.f32 %v2616_v37, %v2619_v41 }
 0xf58   : > { %v2621_v43 = vmul.f32 1.442695, %v2620_v42 }
 0xf59   : > { %v2630_v44 = vpop.permute.xlu0 %2629 }
 0xf5a   : > { %4239 = vpow2.f32 %v2621_v43  ;;  %3975 = vmatpush3.bf16.msra.mxu0 %v2630_v44 }
 0xf5b   : > { %3986 = vmatprep.subr.bf16.mxu0 %v4833_v31 }
 0xf5d   : > { %v2721_v53 = vpop.permute.xlu0 %2720 }
 0xf67   : > { %v4240_v46 = vpop.eup %4239 }
 0xf68   : > { %v2623_v48 = vsel %vm1684_vm4, %v4240_v46, 0.0 }
 0xf69   : > { %2624 = vadd.xlane.f32.xlu1 %v2623_v48  ;;  %v4210_v48 = vld [vmem:[%s6011_s20] sm:$0xff]   ;;  %s6022_s20 = sld [smem:[#allocation62_spill]] (!%p3747_p0) }
 0xf7a   : > { %2722 = vrot.lane.b32.xlu1 %v5509_v6, %s4837_s23 }
 0xff2   : > { %v2625_v49 = vpop.xlane.xlu1 %2624 }
 0xff3   : > { %4241 = vrcp.f32 %v2625_v49 }
 0xff6   : > { %v2723_v10 = vpop.permute.xlu1 %2722 }
 0xff7   : > { %v2728_v11 = vsel %vm1636_vm3, %v2723_v10, 0 }
0x1000   : > { %v4242_v50 = vpop.eup %4241 }
0x1001   : > { %v2627_v51 = vmul.f32 %v4242_v50, %v4240_v46  ;;  %v4209_v46 = vld [vmem:[%s6010_s10 + $0x8] sm:$0xff]  }
0x1003   : > { %v2628_v9 = vpack.c.bf16 %v2627_v51, %v2627_v51 }
0x1005   : > { %3977 = vmatmul.mubr.msk.bf16.vlgmr.msra.gmra.mxu0 %vm1684_vm4, %v2628_v9 }
0x1006   : > { %3987 = vmatpush3.bf16.xpose.msra.mxu0 %v2728_v11  ;;  %3988 = vmatprep.mubr.msk.bf16.mxu0 %vm4834_vm1, %v4833_v31 }
0x1007   : > { %3998 = vmatprep.subr.bf16.mxu0 %v4833_v31 }
0x100d   : > { %3989 = vmatmul.mubr.msk.bf16.vlgmr.msra.gmra.mxu0 %vm1636_vm3, %v2721_v53 }
0x100e   : > { %3999 = vmatpush3.bf16.msra.mxu0 %v5636_v18  ;;  %4000 = vmatprep.mubr.msk.bf16.mxu0 %vm4834_vm1, %v4833_v31 }
0x100f   : > { %4012 = vmatprep.subr.bf16.mxu0 %v4833_v31 }
0x10c5   : > { %v2669_v6 = vpop.f32.mrf.mxu0 }
0x10c6   : > { %v2675_v54 = vpack.c.bf16 %v2669_v6, %v2669_v6  ;;  %v3733_v6 = vld [vmem:[%s6012_s8] ss:$0 sm:$0xff] }
0x10c7   : > { %v3978_v55 = vpop.f32.mrf.mxu0 }
0x10c8   : > { %3983 = vmatmul.mubr.msk.bf16.vlgmr.msra.gmra.mxu1 %vm1636_vm3, %v2675_v54 }
0x10c9   : > { %v2672_v56 = vpop.f32.mrf.mxu0  ;;  %3994 = vmatprep.mubr.msk.bf16.mxu1 %vm4834_vm1, %v4833_v31 }
0x10cb   : > { %v3979_v57 = vpop.f32.mrf.mxu0 }
0x10cc   : > { %v3734_v57 = vld [vmem:[%s6013_s12] ss:$0 sm:$0xff] }
0x10cd   : > { %v2764_v59 = vpop.f32.mrf.mxu0 }
0x10ce   : > { %v2770_v62 = vmul.f32 0.35355338, %v2764_v59 }
0x10cf   : > { %v3990_v63 = vpop.f32.mrf.mxu0 }
0x10d0   : > { %v2771_v18 = vsel %vm1684_vm4, %v2770_v62, -inf }
0x10d1   : > { %2772 = vmax.xlane.f32.xlu0 %v2771_v18  ;;  %v2767_v0 = vpop.f32.mrf.mxu0 }
0x10d2   : > { %v4211_v0 = vld [vmem:[%s5435_s1 + $0x18] sm:$0xff]  }
0x10d3   : > { %v3991_v1 = vpop.f32.mrf.mxu0 }
0x10d4   : > { %v4212_v1 = vld [vmem:[%s5435_s1 + $0x10] sm:$0xff]  }
0x10e7   : > { %2783 = vrot.lane.b32.xlu0 %v5544_v45, %s4837_s23  ;;  %v2887_v45 = vsel %vm1428_vm2, %v2883_v15, 0.0  ;;  %s6021_s23 = sld [smem:[#allocation61_spill]] (!%p3747_p0) }
0x115a   : > { %v2773_v2 = vpop.xlane.xlu0 %2772 }
0x115b   : > { %v2774_v3 = vsub.f32 %v2770_v62, %v2773_v2  ;;  %v4213_v2 = vld [vmem:[%s5435_s1 + $0x8] sm:$0xff]  }
0x115d   : > { %v2775_v5 = vmul.f32 1.442695, %v2774_v3  ;;  %v4214_v3 = vld [vmem:[%s5435_s1] sm:$0xff]  }
0x115e   : > { %v2784_v7 = vpop.permute.xlu0 %2783 }
0x115f   : > { %4243 = vpow2.f32 %v2775_v5  ;;  %3993 = vmatpush3.bf16.msra.mxu1 %v2784_v7  ;;  %v3735_v5 = vld [vmem:[%s6014_s17] ss:$0 sm:$0xff] }
0x1160   : > { %4004 = vmatprep.subr.bf16.mxu1 %v4833_v31 }
0x116c   : > { %v4244_v13 = vpop.eup %4243 }
0x116d   : > { %v2777_v14 = vsel %vm1684_vm4, %v4244_v13, 0.0 }
0x116e   : > { %2778 = vadd.xlane.f32.xlu1 %v2777_v14 }
0x1172   : > { %2888 = vadd.xlane.f32.xlu1 %v2887_v45 }
0x1188   : > { %v2713_v16 = vpop.f32.mrf.mxu1 }
0x1189   : > { %v2719_v17 = vadd.f32 %v2713_v16, %v5698_v30 }
0x118a   : > { %v3984_v47 = vpop.f32.mrf.mxu1 }
0x118c   : > { %v2716_v60 = vpop.f32.mrf.mxu1 }
0x118e   : > { %v3985_v19 = vpop.f32.mrf.mxu1 }
0x11f7   : > { %v2779_v20 = vpop.xlane.xlu1 %2778 }
0x11f8   : > { %4245 = vrcp.f32 %v2779_v20 }
0x11fb   : > { %v2889_v21 = vpop.xlane.xlu1 %2888 }
0x11fc   : > { %v2894_v4 = vmul.f32 0.03125, %v2889_v21 }
0x11fe   : > { %v2896_v58 = vsub.f32 %v2883_v15, %v2894_v4 }
0x1200   : > { %v2898_v22 = vmul.f32 %v2896_v58, %v2896_v58 }
0x1202   : > { %v2900_v23 = vsel %vm1428_vm2, %v2898_v22, 0.0 }
0x1203   : > { %2901 = vadd.xlane.f32.xlu0 %v2900_v23 }
0x1205   : > { %v4246_v33 = vpop.eup %4245 }
0x1206   : > { %v2781_v24 = vmul.f32 %v4246_v33, %v4244_v13 }
0x1208   : > { %v2782_v25 = vpack.c.bf16 %v2781_v24, %v2781_v24 }
0x120a   : > { %3995 = vmatmul.mubr.msk.bf16.vlgmr.msra.gmra.mxu1 %vm1684_vm4, %v2782_v25 }
0x120b   : > { %4008 = vmatprep.mubr.msk.bf16.mxu1 %vm4834_vm1, %v4833_v31  ;;  %4005 = vmatpush3.bf16.msra.mxu1 %v4209_v46 }
0x120c   : > { %4006 = vmatprep.subr.bf16.mxu1 %v4833_v31 }
0x120f   : > { %4007 = vmatpush3.bf16.msra.mxu1 %v4210_v48 }
0x12ca   : > { %v2823_v26 = vpop.f32.mrf.mxu1 }
0x12cb   : > { %v2829_v27 = vpack.c.bf16 %v2823_v26, %v2823_v26 }
0x12cc   : > { %v3996_v28 = vpop.f32.mrf.mxu1 }
0x12cd   : > { %4001 = vmatmul.mubr.msk.bf16.vlgmr.msra.gmra.mxu0 %vm1636_vm3, %v2829_v27 }
0x12ce   : > { %v2826_v29 = vpop.f32.mrf.mxu1  ;;  %4020 = vmatprep.mubr.msk.bf16.mxu0 %vm4834_vm1, %v4833_v31  ;;  %4013 = vmatpush3.bf16.msra.mxu0 %v4211_v0  ;;  %v3739_v0 = vld [vmem:[%s1320_s30] ss:$0 sm:$0xff] }
0x12cf   : > { %4014 = vmatprep.subr.bf16.mxu0 %v4833_v31 }
0x12d0   : > { %v3997_v30 = vpop.f32.mrf.mxu1 }
0x12d2   : > { %4015 = vmatpush3.bf16.msra.mxu0 %v4212_v1 }
0x12d3   : > { %4016 = vmatprep.subr.bf16.mxu0 %v4833_v31 }
0x12d6   : > { %4017 = vmatpush3.bf16.msra.mxu0 %v4213_v2 }
0x12d7   : > { %4018 = vmatprep.subr.bf16.mxu0 %v4833_v31 }
0x12da   : > { %4019 = vmatpush3.bf16.msra.mxu0 %v4214_v3 }
0x138d   : > { %v2867_v32 = vpop.f32.mrf.mxu0 }
0x138e   : > { %v2873_v61 = vadd.f32 %v2867_v32, %v2719_v17 }
0x138f   : > { %v4002_v35 = vpop.f32.mrf.mxu0 }
0x1390   : > { %v2882_v36 = vadd.f32 %v3732_v8, %v2873_v61 }
0x1391   : > { %v2870_v37 = vpop.f32.mrf.mxu0 }
0x1392   : > { %v2884_v38 = vadd.f32 %v2882_v36, %v5464_v34  ;;  %v2902_v34 = vpop.xlane.xlu0 %2901 }
0x1393   : > { %v4003_v52 = vpop.f32.mrf.mxu0  ;;  %v2906_v49 = vmul.f32 0.03125, %v2902_v34 }
0x1394   : > { %v2890_v39 = vsel %vm1428_vm2, %v2884_v38, 0.0 }
0x1395   : > { %2891 = vadd.xlane.f32.xlu1 %v2890_v39  ;;  %v2908_v50 = vadd.f32 1e-05, %v2906_v49 }
0x1397   : > { %4247 = vrsqrt.f32 %v2908_v50 }
0x13a4   : > { %v4248_v11 = vpop.eup %4247 }
0x13a5   : > { %v2912_v53 = vmul.f32 %v4248_v11, %v2896_v58 }
0x13a7   : > { %v2920_v56 = vmul.f32 %v3733_v6, %v2912_v53 }
0x13a9   : > { %v5752_v62 = vadd.f32 %v3734_v57, %v2920_v56 }
0x141e   : > { %v2892_v40 = vpop.xlane.xlu1 %2891 }
0x141f   : > { %v2895_v41 = vmul.f32 0.03125, %v2892_v40 }
0x1421   : > { %v2897_v42 = vsub.f32 %v2884_v38, %v2895_v41 }
0x1423   : > { %v2899_v43 = vmul.f32 %v2897_v42, %v2897_v42 }
0x1425   : > { %v2903_v44 = vsel %vm1428_vm2, %v2899_v43, 0.0 }
0x1426   : > { %2904 = vadd.xlane.f32.xlu1 %v2903_v44 }
0x14af   : > { %v2905_v51 = vpop.xlane.xlu1 %2904 }
0x14b0   : > { %v2907_v10 = vmul.f32 0.03125, %v2905_v51 }
0x14b2   : > { %v2909_v9 = vadd.f32 1e-05, %v2907_v10 }
0x14b4   : > { %4249 = vrsqrt.f32 %v2909_v9 }
0x14c1   : > { %v4250_v54 = vpop.eup %4249 }
0x14c2   : > { %v2913_v55 = vmul.f32 %v4250_v54, %v2897_v42 }
0x14c4   : > { %v2921_v59 = vmul.f32 %v3733_v6, %v2913_v55 }
0x14c6   : > { %v5754_v63 = vadd.f32 %v3734_v57, %v2921_v59 }
0x14c8   : > { %v2930_v18 = vpack.c.bf16 %v5754_v63, %v5752_v62 }
0x14ca   : > { %4009 = vmatmul.mubr.msk.bf16.vlgmr.msra.gmra.mxu1 %vm1428_vm2, %v2930_v18 }
0x158a   : > { %v2991_v7 = vpop.f32.mrf.mxu1 }
0x158b   : > { %v2992_v8 = vadd.f32 %v3735_v5, %v2991_v7 }
0x158c   : > { %v4010_v12 = vpop.f32.mrf.mxu1 }
0x158d   : > { %v3000_v13 = vmul.f32 0.70710677, %v2992_v8  ;;  %v2998_v54 = vmul.f32 0.5, %v2992_v8 }
0x158e   : > { %v2994_v14 = vpop.f32.mrf.mxu1 }
0x158f   : > { %v3002_v15 = vand.u32 2147483647, %v3000_v13  ;;  %v2995_v45 = vadd.f32 %v3735_v5, %v2994_v14  ;;  %vm3042_vm6 = vcmp.lt.f32.partialorder %v3000_v13, 0.0 }
0x1590   : > { %v4011_v16 = vpop.f32.mrf.mxu1 }
0x1591   : > { %v3004_v17 = vmul.f32 0.3275911, %v3002_v15  ;;  %v3001_v47 = vmul.f32 0.70710677, %v2995_v45  ;;  %v3030_v31 = vsub.f32 0.0, %v3002_v15  ;;  %v2999_v55 = vmul.f32 0.5, %v2995_v45 }
0x1593   : > { %v3006_v60 = vadd.f32 1.0, %v3004_v17  ;;  %v3003_v19 = vand.u32 2147483647, %v3001_v47  ;;  %v3032_v4 = vmul.f32 %v3030_v31, %v3002_v15  ;;  %vm3043_vm7 = vcmp.lt.f32.partialorder %v3001_v47, 0.0 }
0x1595   : > { %4251 = vrcp.f32 %v3006_v60  ;;  %v3005_v20 = vmul.f32 0.3275911, %v3003_v19  ;;  %v3031_v58 = vsub.f32 0.0, %v3003_v19  ;;  %v3034_v33 = vmul.f32 1.442695, %v3032_v4 }
0x1597   : > { %v3007_v21 = vadd.f32 1.0, %v3005_v20  ;;  %v3033_v24 = vmul.f32 %v3031_v58, %v3003_v19 }
0x1599   : > { %4253 = vrcp.f32 %v3007_v21  ;;  %v3036_v29 = vmul.f32 1.442695, %v3033_v24 }
0x159a   : > { %4255 = vpow2.f32 %v3034_v33 }
0x159b   : > { %4257 = vpow2.f32 %v3036_v29 }
0x15a2   : > { %v4252_v22 = vpop.eup %4251 }
0x15a3   : > { %v3012_v23 = vmul.f32 1.0614054, %v4252_v22 }
0x15a5   : > { %v3014_v25 = vadd.f32 -1.4531521, %v3012_v23 }
0x15a6   : > { %v4254_v26 = vpop.eup %4253 }
0x15a7   : > { %v3016_v27 = vmul.f32 %v4252_v22, %v3014_v25  ;;  %v3013_v28 = vmul.f32 1.0614054, %v4254_v26  ;;  %v4256_v43 = vpop.eup %4255  ;;  %v3745_v25 = vld [vmem:[%s1323_s24] ss:$0 sm:$0xff] }
0x15a8   : > { %v4258_v49 = vpop.eup %4257 }
0x15a9   : > { %v3018_v30 = vadd.f32 1.4214138, %v3016_v27  ;;  %v3015_v32 = vadd.f32 -1.4531521, %v3013_v28  ;;  %v3746_v27 = vld [vmem:[%s1326_s14] ss:$0 sm:$0xff] }
0x15ab   : > { %v3020_v61 = vmul.f32 %v4252_v22, %v3018_v30  ;;  %v3017_v35 = vmul.f32 %v4254_v26, %v3015_v32 }
0x15ad   : > { %v3022_v36 = vadd.f32 -0.28449672, %v3020_v61  ;;  %v3019_v37 = vadd.f32 1.4214138, %v3017_v35 }
0x15af   : > { %v3024_v38 = vmul.f32 %v4252_v22, %v3022_v36  ;;  %v3021_v52 = vmul.f32 %v4254_v26, %v3019_v37 }
0x15b1   : > { %v3026_v39 = vadd.f32 0.2548296, %v3024_v38  ;;  %v3023_v40 = vadd.f32 -0.28449672, %v3021_v52 }
0x15b3   : > { %v3028_v41 = vmul.f32 %v4252_v22, %v3026_v39  ;;  %v3025_v42 = vmul.f32 %v4254_v26, %v3023_v40 }
0x15b5   : > { %v3038_v44 = vmul.f32 %v4256_v43, %v3028_v41  ;;  %v3027_v46 = vadd.f32 0.2548296, %v3025_v42 }
0x15b7   : > { %v3040_v48 = vsub.f32 1.0, %v3038_v44  ;;  %v3029_v34 = vmul.f32 %v4254_v26, %v3027_v46 }
0x15b9   : > { %v3044_v50 = vsub.f32 0.0, %v3040_v48  ;;  %v3039_v51 = vmul.f32 %v4258_v49, %v3029_v34 }
0x15bb   : > { %v3046_v10 = vsel %vm3042_vm6, %v3044_v50, %v3040_v48  ;;  %v3041_v9 = vsub.f32 1.0, %v3039_v51 }
0x15bc   : > { %v3048_v53 = vadd.f32 1.0, %v3046_v10 }
0x15bd   : > { %v3045_v11 = vsub.f32 0.0, %v3041_v9 }
0x15be   : > { %v3050_v57 = vmul.f32 %v3048_v53, %v2998_v54 }
0x15bf   : > { %v3047_v6 = vsel %vm3043_vm7, %v3045_v11, %v3041_v9 }
0x15c0   : > { %v3049_v56 = vadd.f32 1.0, %v3047_v6 }
0x15c2   : > { %v3051_v59 = vmul.f32 %v3049_v56, %v2999_v55 }
0x15c4   : > { %v3052_v18 = vpack.c.bf16 %v3051_v59, %v3050_v57 }
0x15c6   : > { %4021 = vmatmul.mubr.msk.bf16.vlgmr.msra.gmra.mxu0 %vm3092_vm8, %v3052_v18 }
0x1686   : > { %v3130_v1 = vpop.f32.mrf.mxu0 }
0x1687   : > { %v3131_v2 = vadd.f32 %v3739_v0, %v3130_v1 }
0x1688   : > { %v4022_v3 = vpop.f32.mrf.mxu0 }
0x1689   : > { %v3137_v5 = vadd.f32 %v3131_v2, %v5752_v62 }
0x168a   : > { %v3133_v7 = vpop.f32.mrf.mxu0 }
0x168b   : > { %v3134_v12 = vadd.f32 %v3739_v0, %v3133_v7  ;;  %v3141_v8 = vsel %vm1428_vm2, %v3137_v5, 0.0 }
0x168c   : > { %3142 = vadd.xlane.f32.xlu1 %v3141_v8  ;;  %v4023_v13 = vpop.f32.mrf.mxu0 }
0x168d   : > { %v3138_v14 = vadd.f32 %v3134_v12, %v5754_v63 }
0x168f   : > { %v3144_v15 = vsel %vm1428_vm2, %v3138_v14, 0.0 }
0x1690   : > { %3145 = vadd.xlane.f32.xlu1 %v3144_v15 }
0x1715   : > { %v3143_v45 = vpop.xlane.xlu1 %3142 }
0x1716   : > { %v3147_v16 = vmul.f32 0.03125, %v3143_v45 }
0x1718   : > { %v3149_v17 = vsub.f32 %v3137_v5, %v3147_v16 }
0x1719   : > { %v3146_v47 = vpop.xlane.xlu1 %3145 }
0x171a   : > { %v3148_v60 = vmul.f32 0.03125, %v3146_v47  ;;  %v3151_v19 = vmul.f32 %v3149_v17, %v3149_v17 }
0x171c   : > { %v3150_v20 = vsub.f32 %v3138_v14, %v3148_v60  ;;  %v3153_v62 = vsel %vm1428_vm2, %v3151_v19, 0.0 }
0x171d   : > { %3154 = vadd.xlane.f32.xlu1 %v3153_v62 }
0x171e   : > { %v3152_v21 = vmul.f32 %v3150_v20, %v3150_v20 }
0x1720   : > { %v3156_v31 = vsel %vm1428_vm2, %v3152_v21, 0.0 }
0x1721   : > { %3157 = vadd.xlane.f32.xlu1 %v3156_v31 }
0x17a6   : > { %v3155_v63 = vpop.xlane.xlu1 %3154 }
0x17a7   : > { %v3159_v4 = vmul.f32 0.03125, %v3155_v63 }
0x17a9   : > { %v3161_v58 = vadd.f32 1e-05, %v3159_v4 }
0x17aa   : > { %v3158_v22 = vpop.xlane.xlu1 %3157 }
0x17ab   : > { %4259 = vrsqrt.f32 %v3161_v58  ;;  %v3160_v23 = vmul.f32 0.03125, %v3158_v22 }
0x17ad   : > { %v3162_v33 = vadd.f32 1e-05, %v3160_v23 }
0x17af   : > { %4261 = vrsqrt.f32 %v3162_v33 }
0x17b8   : > { %v4260_v24 = vpop.eup %4259 }
0x17b9   : > { %v3165_v26 = vmul.f32 %v4260_v24, %v3149_v17 }
0x17bb   : > { %v3173_v28 = vmul.f32 %v3745_v25, %v3165_v26 }
0x17bc   : > { %v4262_v29 = vpop.eup %4261 }
0x17bd   : > { %v3181_v30 = vadd.f32 %v3746_v27, %v3173_v28  ;;  %v3166_v32 = vmul.f32 %v4262_v29, %v3150_v20 }
0x17bf   : > { %3183 = vst.msk [vmem:[#allocation22] sm:$0xff] %vm1428_vm2, %v3181_v30  ;;  %v3174_v61 = vmul.f32 %v3745_v25, %v3166_v32  ;;  %3188 = sbr.rel (%p3747_p0) target bundleno = 6311 (0x18a7), region = 200 }
0x17c1   : > { %v3182_v35 = vadd.f32 %v3746_v27, %v3174_v61 }
0x17c3   : > { %3184 = vst.msk [vmem:[#allocation22 + $0x8] sm:$0xff] %vm1428_vm2, %v3182_v35 }
0x17c4   : > { %v4263_v36 = vld [vmem:[#allocation21 + $0x8] sm:$0xff]   ;;  %v4838_v37 = vmov 0.0   ;;  %v4264_v38 = vld [vmem:[#allocation21] sm:$0xff]   ;;  %vm4839_vm9 = vmmov 0   ;;  %v3202_v40 = vlaneseq }
0x17c5   : > { %4024 = vmatprep.subr.bf16.mxu0 %v4838_v37  ;;  %4028 = vmatprep.mubr.msk.bf16.mxu0 %vm4839_vm9, %v4838_v37  ;;  %v3198_v52 = vld [vmem:[%s6019_s25] sm:$0x1] }
0x17c6   : > { %4025 = vmatpush3.bf16.msra.mxu0 %v4263_v36  ;;  %v3199_v39 = vadd.f32 1e-05, %v3198_v52  ;;  %v3203_v41 = vshrl.u32 %v3202_v40, 7  ;;  %v3748_v42 = vld [vmem:[%s6020_s5] ss:$0 sm:$0xff] }
0x17c7   : > { %4026 = vmatprep.subr.bf16.mxu0 %v4838_v37  ;;  %v3196_v44 = vsub.f32 %v3181_v30, %v3748_v42  ;;  %v3197_v46 = vsub.f32 %v3182_v35, %v3748_v42  ;;  %v3749_v49 = vld [vmem:[%s6021_s23] ss:$0 sm:$0xff] }
0x17c8   : > { %4265 = vrsqrt.f32 %v3199_v39  ;;  %v3204_v43 = vsub.s32 0, %v3203_v41  ;;  %v3750_v10 = vld [vmem:[%s6022_s20] ss:$0 sm:$0xff] }
0x17ca   : > { %4027 = vmatpush3.bf16.msra.mxu0 %v4264_v38 }
0x17d5   : > { %v4266_v48 = vpop.eup %4265 }
0x17d6   : > { %v3205_v34 = vrot.slane %v4266_v48, %v3204_v43 }
0x17d8   : > { %v3207_v50 = vmul.f32 %v3205_v34, %v3196_v44  ;;  %v3208_v51 = vmul.f32 %v3205_v34, %v3197_v46 }
0x17da   : > { %v3216_v9 = vmul.f32 %v3749_v49, %v3207_v50  ;;  %v3217_v11 = vmul.f32 %v3749_v49, %v3208_v51 }
0x17dc   : > { %v3225_v53 = vadd.f32 %v3750_v10, %v3216_v9  ;;  %v3226_v6 = vadd.f32 %v3750_v10, %v3217_v11 }
0x17de   : > { %v3227_v54 = vpack.c.bf16 %v3226_v6, %v3225_v53 }
0x17e0   : > { %4029 = vmatmul.mubr.msk.bf16.vlgmr.msra.gmra.mxu0 %vm1428_vm2, %v3227_v54 }
0x18a0   : > { %v3281_v55 = vpop.f32.mrf.mxu0 }
0x18a1   : > { %3288 = vst [vmem:[#allocation23] sm:$0xff] %v3281_v55 }
0x18a2   : > { %v4030_v56 = vpop.f32.mrf.mxu0 }
0x18a4   : > { %v3284_v57 = vpop.f32.mrf.mxu0 }
0x18a5   : > { %3289 = vst [vmem:[#allocation23 + $0x8] sm:$0xff] %v3284_v57 }
0x18a6   : > { %v4031_v59 = vpop.f32.mrf.mxu0 }
0x18a7 PF: > { %s6023_s8 = sld [smem:[#allocation34_spill]]  ;;  %s4840_s12 = smov [#allocation22]  }
0x18a8   : > { %s3296_s17 = sshll.u32 %s4840_s12, 4  ;;  %s3297_s17 = int_to_ptr.vmem [resolvable:$true] %s3296_s17 }
0x18a9   : > { %s4705_s21 = scalar_lea.vmem %s3297_s17, 256  ;;  %p4712_p13 = scmp.lt.s32.totalorder %s3297_s17, %s3297_s17 }
0x18aa   : > { %p4706_p1 = scmp.ne.s32.totalorder %s3297_s17, %s4705_s21  ;;  %p4713_p2 = scmp.lt.s32.totalorder %s4705_s21, %s4705_s21 }
0x18ac   : > { %p4714_p3 = por %p4713_p2, %p4712_p13 }
0x18ad   : > { %p4143_p8 = scmp.eq.s32.totalorder %s6023_s8, 1 }
0x18af   : > { %p4707_p12 = pnand %p4706_p1, %p4143_p8 }
0x18b1   : > { %p4708_p4 = pneg %p4707_p12 }
0x18b3   : > { %p4715_p6 = pnand %p4714_p3, %p4708_p4 }
0x18b5   : > { %4718 = shalt.err (!%p4715_p6)
}
0x18b6   : > { %s4841_s1 = smov 128   ;;  %s4842_s19 = smov 8  }
0x18b7   : > { %s6024_s27 = sld [smem:[#allocation63_spill]]  ;;  %s4843_s22 = smov [#allocation23]  }
0x18b8   : > { %s3309_s13 = sshll.u32 %s4843_s22, 4  ;;  %s3310_s13 = int_to_ptr.vmem [resolvable:$true] %s3309_s13 }
0x18b9   : > { %s4729_s2 = scalar_lea.vmem %s3310_s13, 256  ;;  %p4736_p9 = scmp.lt.s32.totalorder %s3310_s13, %s3310_s13 }
0x18ba   : > { %p4730_p7 = scmp.ne.s32.totalorder %s3310_s13, %s4729_s2  ;;  %p4737_p10 = scmp.lt.s32.totalorder %s4729_s2, %s4729_s2 }
0x18bc   : > { %p4731_p5 = pnand %p4730_p7, %p4143_p8  ;;  %p4738_p0 = por %p4737_p10, %p4736_p9 }
0x18bd   : > { %4075 = dma.vmem_to_hbm [thread:$0]  (%p4143_p8), %s3297_s17, 256, %s6024_s27, [#allocation4], %s4841_s1, %s4841_s1, %s4842_s19  }
0x18be   : > { %p4732_p11 = pneg %p4731_p5 }
0x18c0   : > { %p4739_p1 = pnand %p4738_p0, %p4732_p11 }
0x18c2   : > { %4742 = shalt.err (!%p4739_p1)
}
0x18c3   : > { %s6025_s24 = sld [smem:[#allocation64_spill]] }
0x18c9   : > { %4077 = dma.vmem_to_hbm [thread:$0]  (%p4143_p8), %s3310_s13, 256, %s6025_s24, [#allocation24], %s4841_s1, %s4841_s1, %s4842_s19  }
0x18ca   : > { %4790 = dma.done.wait (%p4143_p8), [#allocation4], 256  }
0x18cb   : > { %4792 = vsyncadd (%p4143_p8), [#allocation4], 4294967040 }
0x18cc   : > { %4794 = dma.done.wait (%p4143_p8), [#allocation24], 256  }
0x18cd   : > { %4796 = vsyncadd (%p4143_p8), [#allocation24], 4294967040 }
0x18ce PF: > { %s6026_s30 = sld [smem:[#allocation35_spill]] }
0x18cf   : > { %s6027_s8 = sld [smem:[#allocation32_spill]] }
0x18d0   : > { %s6028_s5 = sld [smem:[#allocation33_spill]] }
0x18d1   : > { %s6029_s9 = sld [smem:[#allocation36_spill]] }
0x18d4   : > { %p41_p12 = scmp.ge.s32.totalorder %s6026_s30, 4  }
0x18d6   :  { %43 = sbr.rel (!%p41_p12) target bundleno = 33 (0x21), region = 325 }
0x18db   :  { %3329 = vsyncpa [#allocation3], 1 }
0x18dc   :  { %3331 = vsyncpa [#allocation3 + $0x1], 1 }
0x18dd   :  { %3332 = vsyncpa [#allocation6], 1 }
0x18de   :  { %3333 = vsyncpa [#allocation9], 1 }
0x18df   :  { %3334 = vsyncpa [#allocation4], 1 }
0x18e0   :  { %3336 = vsyncpa [#allocation4 + $0x1], 1 }
0x18e1   :  { %3337 = vsyncpa [#allocation24], 1 }

</bundles_post_ra>
